<compile_context>
chip_gen: v6e
topology: v6e:2x2x1
jax: 0.10.0
libtpu: 0.0.40
codegen_flags: <defaults>
</compile_context>

<pallas_src>
import jax
import jax.numpy as jnp
from jax.experimental import pallas as pl
from jax.experimental.pallas import tpu as pltpu

HIDDEN = 768
TOTAL_PERSONA = 32   # len(idx2persona) is data-dependent; small demo value
P_PAD = 128          # lane-dense padded logits width (multiple of 128)
MAX_TM = 512         # batch tile cap (amortizes per-step overhead)
MIN_SPLIT_ROWS = 256 # split into >=2 tiles (v7x dual-TC) once B >= 2*this


def _round_up(x, m):
    return (x + m - 1) // m * m


def _mlp_kernel(x_ref,
                w1_ref, b1_ref,
                w2_ref, b2_ref,
                w3_ref, b3_ref,
                w4_ref, b4_ref,
                o_ref):
    # Dropout layers are identity in eval mode; only the affine chain remains.
    # bf16 operands -> native MXU matmuls, f32 accumulation, f32 bias add,
    # then the intermediate is immediately re-materialized as bf16 (cuts the
    # f32 vreg store traffic of the (TM,768) intermediates ~3x).
    h = (jnp.dot(x_ref[...].astype(jnp.bfloat16), w1_ref[...],
                 preferred_element_type=jnp.float32)
         + b1_ref[...]).astype(jnp.bfloat16)
    h = (jnp.dot(h, w2_ref[...], preferred_element_type=jnp.float32)
         + b2_ref[...]).astype(jnp.bfloat16)
    h = (jnp.dot(h, w3_ref[...], preferred_element_type=jnp.float32)
         + b3_ref[...]).astype(jnp.bfloat16)
    o_ref[...] = (jnp.dot(h, w4_ref[...], preferred_element_type=jnp.float32)
                  + b4_ref[...]).astype(o_ref.dtype)
    # TODO(synk): training-mode stochastic dropout not implemented; eval
    # (inference) semantics are reproduced exactly.


def persona_classifier_forward(x, params):
    """x: (B, 768) float32 (or bfloat16).

    params: w1..w3 (768,768) bf16, w4 (768,P_PAD) bf16 (zero-padded cols),
            b1..b3 (1,768) f32,    b4 (1,P_PAD) f32 (zero-padded cols).
    Returns (B, TOTAL_PERSONA) float32 logits.
    """
    B = x.shape[0]

    # --- Tiling policy (caps padding at < TM rows) ---------------------------
    num_tiles = pl.cdiv(B, MAX_TM)
    # v7x has 2 TensorCores: give the "parallel" batch axis >= 2 steps when the
    # batch is big enough that the extra per-core weight DMA is amortized.
    if num_tiles < 2 and B >= 2 * MIN_SPLIT_ROWS:
        num_tiles = 2
    TM = _round_up(pl.cdiv(B, num_tiles), 8)
    B_pad = num_tiles * TM
    if B_pad != B:
        x = jnp.pad(x, ((0, B_pad - B), (0, 0)))

    grid = (num_tiles,)

    # Weights/biases: full-array blocks, same block index every grid step ->
    # VMEM-resident across the whole grid (DMA'd once).  Single-buffered:
    # a second buffer would never be used and just wastes ~3.6 MiB of VMEM.
    def _resident(arr):
        nd = arr.ndim
        return pl.BlockSpec(arr.shape, lambda *_: (0,) * nd,
                            pipeline_mode=pl.Buffered(1))

    out_padded = pl.pallas_call(
        _mlp_kernel,
        out_shape=jax.ShapeDtypeStruct((B_pad, P_PAD), jnp.float32),
        grid=grid,
        in_specs=[
            pl.BlockSpec((TM, HIDDEN), lambda i: (i, 0)),
            _resident(params["w1"]), _resident(params["b1"]),
            _resident(params["w2"]), _resident(params["b2"]),
            _resident(params["w3"]), _resident(params["b3"]),
            _resident(params["w4"]), _resident(params["b4"]),
        ],
        out_specs=pl.BlockSpec((TM, P_PAD), lambda i: (i, 0)),
        compiler_params=pltpu.CompilerParams(
            dimension_semantics=("parallel",)),
    )(x,
      params["w1"], params["b1"],
      params["w2"], params["b2"],
      params["w3"], params["b3"],
      params["w4"], params["b4"])

    return out_padded[:B, :TOTAL_PERSONA]


def init_params(key):
    """Deterministic init mimicking nn.Linear's U(-1/sqrt(fan_in), 1/sqrt(fan_in)).

    Weights are stored pre-transposed as (in, out) and cast to bf16; the last
    layer is zero-padded from TOTAL_PERSONA to P_PAD output columns.
    """
    ks = jax.random.split(key, 8)
    bound = 1.0 / jnp.sqrt(HIDDEN)

    def lin(kw, kb, fan_in, fan_out):
        w = jax.random.uniform(kw, (fan_in, fan_out), jnp.float32, -bound, bound)
        b = jax.random.uniform(kb, (1, fan_out), jnp.float32, -bound, bound)
        return w, b

    w1, b1 = lin(ks[0], ks[1], HIDDEN, HIDDEN)
    w2, b2 = lin(ks[2], ks[3], HIDDEN, HIDDEN)
    w3, b3 = lin(ks[4], ks[5], HIDDEN, HIDDEN)
    w4, b4 = lin(ks[6], ks[7], HIDDEN, TOTAL_PERSONA)

    # Pad final layer to a lane-dense 128-wide output (zero columns).
    w4 = jnp.pad(w4, ((0, 0), (0, P_PAD - TOTAL_PERSONA)))
    b4 = jnp.pad(b4, ((0, 0), (0, P_PAD - TOTAL_PERSONA)))

    return dict(
        w1=w1.astype(jnp.bfloat16), b1=b1,
        w2=w2.astype(jnp.bfloat16), b2=b2,
        w3=w3.astype(jnp.bfloat16), b3=b3,
        w4=w4.astype(jnp.bfloat16), b4=b4,
    )


def reference_forward(x, p):
    """f32-activation reference using the same (bf16-stored) weights.

    Note: the true PyTorch model keeps f32 weights and f32 activations; bf16
    weight storage + bf16 intermediates is an accepted precision tradeoff here,
    so this reference only measures the kernel's additional activation-rounding
    error (~1e-3), not the gap to a full-f32 model.
    """
    h = x @ p["w1"].astype(jnp.float32) + p["b1"]
    h = h @ p["w2"].astype(jnp.float32) + p["b2"]
    h = h @ p["w3"].astype(jnp.float32) + p["b3"]
    h = h @ p["w4"].astype(jnp.float32) + p["b4"]
    return h[:, :TOTAL_PERSONA]


if __name__ == "__main__":
    key = jax.random.PRNGKey(0)
    k_x, k_p = jax.random.split(key)

    B = 8
    x = jax.random.normal(k_x, (B, HIDDEN), dtype=jnp.float32)
    params = init_params(k_p)

    out = persona_classifier_forward(x, params)
    out = jax.block_until_ready(out)

    ref = reference_forward(x, params)
    assert out.shape == (B, TOTAL_PERSONA), out.shape
    # bf16 operands / bf16 intermediate activations -> relaxed tolerance vs f32 ref.
    assert jnp.allclose(out, ref, atol=5e-2, rtol=5e-2), (
        "mismatch vs reference; max abs diff = %f"
        % float(jnp.max(jnp.abs(out - ref))))

    print("KERNEL_OK")
</pallas_src>

<mosaic_0001>
module attributes {stable_mosaic.version = 11 : i64} {
  func.func @_mlp_kernel(%arg0: i32, %arg1: memref<8x768xf32, #tpu.memory_space<vmem>>, %arg2: memref<768x768xbf16, #tpu.memory_space<vmem>>, %arg3: memref<1x768xf32, #tpu.memory_space<vmem>>, %arg4: memref<768x768xbf16, #tpu.memory_space<vmem>>, %arg5: memref<1x768xf32, #tpu.memory_space<vmem>>, %arg6: memref<768x768xbf16, #tpu.memory_space<vmem>>, %arg7: memref<1x768xf32, #tpu.memory_space<vmem>>, %arg8: memref<768x128xbf16, #tpu.memory_space<vmem>>, %arg9: memref<1x128xf32, #tpu.memory_space<vmem>>, %arg10: memref<8x128xf32, #tpu.memory_space<vmem>>) attributes {dimension_semantics = [#tpu.dimension_semantics<parallel>], iteration_bounds = array<i64: 1>, scalar_prefetch = 0 : i64, scratch_operands = 0 : i64, tpu.core_type = #tpu.core_type<tc>, window_params = [{transform_indices = @transform_0, window_bounds = array<i64: 8, 768>}, {pipeline_mode = #tpu.pipeline_mode<synchronous>, transform_indices = @transform_1, window_bounds = array<i64: 768, 768>}, {pipeline_mode = #tpu.pipeline_mode<synchronous>, transform_indices = @transform_2, window_bounds = array<i64: 1, 768>}, {pipeline_mode = #tpu.pipeline_mode<synchronous>, transform_indices = @transform_3, window_bounds = array<i64: 768, 768>}, {pipeline_mode = #tpu.pipeline_mode<synchronous>, transform_indices = @transform_4, window_bounds = array<i64: 1, 768>}, {pipeline_mode = #tpu.pipeline_mode<synchronous>, transform_indices = @transform_5, window_bounds = array<i64: 768, 768>}, {pipeline_mode = #tpu.pipeline_mode<synchronous>, transform_indices = @transform_6, window_bounds = array<i64: 1, 768>}, {pipeline_mode = #tpu.pipeline_mode<synchronous>, transform_indices = @transform_7, window_bounds = array<i64: 768, 128>}, {pipeline_mode = #tpu.pipeline_mode<synchronous>, transform_indices = @transform_8, window_bounds = array<i64: 1, 128>}, {transform_indices = @transform_9, window_bounds = array<i64: 8, 128>}]} {
    %c0 = arith.constant 0 : index
    %c0_0 = arith.constant 0 : index
    %0 = vector.load %arg1[%c0, %c0_0] : memref<8x768xf32, #tpu.memory_space<vmem>>, vector<8x768xf32>
    %1 = arith.truncf %0 : vector<8x768xf32> to vector<8x768xbf16>
    %c0_1 = arith.constant 0 : index
    %c0_2 = arith.constant 0 : index
    %2 = vector.load %arg2[%c0_1, %c0_2] : memref<768x768xbf16, #tpu.memory_space<vmem>>, vector<768x768xbf16>
    %cst = arith.constant dense<0.000000e+00> : vector<8x768xf32>
    %3 = tpu.matmul %1, %2, %cst {dimension_numbers = #tpu.dot_dimension_numbers<[1], [0], [0], [1], [0, 0, 1, 1], [], []>} : vector<8x768xbf16>, vector<768x768xbf16>, vector<8x768xf32> -> vector<8x768xf32>
    %c0_3 = arith.constant 0 : index
    %c0_4 = arith.constant 0 : index
    %4 = vector.load %arg3[%c0_3, %c0_4] : memref<1x768xf32, #tpu.memory_space<vmem>>, vector<1x768xf32>
    %5 = vector.broadcast %4 : vector<1x768xf32> to vector<8x768xf32>
    %6 = arith.addf %3, %5 : vector<8x768xf32>
    %7 = arith.truncf %6 : vector<8x768xf32> to vector<8x768xbf16>
    %c0_5 = arith.constant 0 : index
    %c0_6 = arith.constant 0 : index
    %8 = vector.load %arg4[%c0_5, %c0_6] : memref<768x768xbf16, #tpu.memory_space<vmem>>, vector<768x768xbf16>
    %cst_7 = arith.constant dense<0.000000e+00> : vector<8x768xf32>
    %9 = tpu.matmul %7, %8, %cst_7 {dimension_numbers = #tpu.dot_dimension_numbers<[1], [0], [0], [1], [0, 0, 1, 1], [], []>} : vector<8x768xbf16>, vector<768x768xbf16>, vector<8x768xf32> -> vector<8x768xf32>
    %c0_8 = arith.constant 0 : index
    %c0_9 = arith.constant 0 : index
    %10 = vector.load %arg5[%c0_8, %c0_9] : memref<1x768xf32, #tpu.memory_space<vmem>>, vector<1x768xf32>
    %11 = vector.broadcast %10 : vector<1x768xf32> to vector<8x768xf32>
    %12 = arith.addf %9, %11 : vector<8x768xf32>
    %13 = arith.truncf %12 : vector<8x768xf32> to vector<8x768xbf16>
    %c0_10 = arith.constant 0 : index
    %c0_11 = arith.constant 0 : index
    %14 = vector.load %arg6[%c0_10, %c0_11] : memref<768x768xbf16, #tpu.memory_space<vmem>>, vector<768x768xbf16>
    %cst_12 = arith.constant dense<0.000000e+00> : vector<8x768xf32>
    %15 = tpu.matmul %13, %14, %cst_12 {dimension_numbers = #tpu.dot_dimension_numbers<[1], [0], [0], [1], [0, 0, 1, 1], [], []>} : vector<8x768xbf16>, vector<768x768xbf16>, vector<8x768xf32> -> vector<8x768xf32>
    %c0_13 = arith.constant 0 : index
    %c0_14 = arith.constant 0 : index
    %16 = vector.load %arg7[%c0_13, %c0_14] : memref<1x768xf32, #tpu.memory_space<vmem>>, vector<1x768xf32>
    %17 = vector.broadcast %16 : vector<1x768xf32> to vector<8x768xf32>
    %18 = arith.addf %15, %17 : vector<8x768xf32>
    %19 = arith.truncf %18 : vector<8x768xf32> to vector<8x768xbf16>
    %c0_15 = arith.constant 0 : index
    %c0_16 = arith.constant 0 : index
    %20 = vector.load %arg8[%c0_15, %c0_16] : memref<768x128xbf16, #tpu.memory_space<vmem>>, vector<768x128xbf16>
    %cst_17 = arith.constant dense<0.000000e+00> : vector<8x128xf32>
    %21 = tpu.matmul %19, %20, %cst_17 {dimension_numbers = #tpu.dot_dimension_numbers<[1], [0], [0], [1], [0, 0, 1, 1], [], []>} : vector<8x768xbf16>, vector<768x128xbf16>, vector<8x128xf32> -> vector<8x128xf32>
    %c0_18 = arith.constant 0 : index
    %c0_19 = arith.constant 0 : index
    %22 = vector.load %arg9[%c0_18, %c0_19] : memref<1x128xf32, #tpu.memory_space<vmem>>, vector<1x128xf32>
    %23 = vector.broadcast %22 : vector<1x128xf32> to vector<8x128xf32>
    %24 = arith.addf %21, %23 : vector<8x128xf32>
    %c0_20 = arith.constant 0 : index
    %c0_21 = arith.constant 0 : index
    %25 = vector.load %arg10[%c0_20, %c0_21] : memref<8x128xf32, #tpu.memory_space<vmem>>, vector<8x128xf32>
    tpu.vector_store %arg10[%c0_20, %c0_21], %24 {strides = array<i32>} : memref<8x128xf32, #tpu.memory_space<vmem>>, vector<8x128xf32>,
    return
  }
  func.func @transform_0(%arg0: i32) -> (i32, i32) {
    %c0_i32 = arith.constant 0 : i32
    %c0_i32_0 = arith.constant 0 : i32
    return %arg0, %c0_i32 : i32, i32
  }
  func.func @transform_1(%arg0: i32) -> (i32, i32) {
    %c0_i32 = arith.constant 0 : i32
    %c0_i32_0 = arith.constant 0 : i32
    %c0_i32_1 = arith.constant 0 : i32
    return %c0_i32, %c0_i32_0 : i32, i32
  }
  func.func @transform_2(%arg0: i32) -> (i32, i32) {
    %c0_i32 = arith.constant 0 : i32
    %c0_i32_0 = arith.constant 0 : i32
    %c0_i32_1 = arith.constant 0 : i32
    return %c0_i32, %c0_i32_0 : i32, i32
  }
  func.func @transform_3(%arg0: i32) -> (i32, i32) {
    %c0_i32 = arith.constant 0 : i32
    %c0_i32_0 = arith.constant 0 : i32
    %c0_i32_1 = arith.constant 0 : i32
    return %c0_i32, %c0_i32_0 : i32, i32
  }
  func.func @transform_4(%arg0: i32) -> (i32, i32) {
    %c0_i32 = arith.constant 0 : i32
    %c0_i32_0 = arith.constant 0 : i32
    %c0_i32_1 = arith.constant 0 : i32
    return %c0_i32, %c0_i32_0 : i32, i32
  }
  func.func @transform_5(%arg0: i32) -> (i32, i32) {
    %c0_i32 = arith.constant 0 : i32
    %c0_i32_0 = arith.constant 0 : i32
    %c0_i32_1 = arith.constant 0 : i32
    return %c0_i32, %c0_i32_0 : i32, i32
  }
  func.func @transform_6(%arg0: i32) -> (i32, i32) {
    %c0_i32 = arith.constant 0 : i32
    %c0_i32_0 = arith.constant 0 : i32
    %c0_i32_1 = arith.constant 0 : i32
    return %c0_i32, %c0_i32_0 : i32, i32
  }
  func.func @transform_7(%arg0: i32) -> (i32, i32) {
    %c0_i32 = arith.constant 0 : i32
    %c0_i32_0 = arith.constant 0 : i32
    %c0_i32_1 = arith.constant 0 : i32
    return %c0_i32, %c0_i32_0 : i32, i32
  }
  func.func @transform_8(%arg0: i32) -> (i32, i32) {
    %c0_i32 = arith.constant 0 : i32
    %c0_i32_0 = arith.constant 0 : i32
    %c0_i32_1 = arith.constant 0 : i32
    return %c0_i32, %c0_i32_0 : i32, i32
  }
  func.func @transform_9(%arg0: i32) -> (i32, i32) {
    %c0_i32 = arith.constant 0 : i32
    %c0_i32_0 = arith.constant 0 : i32
    return %arg0, %c0_i32 : i32, i32
  }
}

</mosaic_0001>

<bundles_post_ra>
// kernel: tpu_custom_call.1
= control target key start
LH: loop header
LB: loop body
LE: loop exit
PB: predicated region body
PF: predicated region fallthrough
CT: control target
= control target key end

     0   :  { %14 = vsyncpa [#allocation3], 0  ;;  %s9978_s0 = inlined_call_operand.hbm [shape: f32[8,768], index: 0, kind: input, shape index: {}]   ;;  %s9979_s1 = inlined_call_operand.hbm [shape: bf16[768,768], index: 1, kind: input, shape index: {}]   ;;  %s9980_s2 = inlined_call_operand.hbm [shape: f32[1,768], index: 2, kind: input, shape index: {}]   ;;  %s9981_s3 = inlined_call_operand.hbm [shape: bf16[768,768], index: 3, kind: input, shape index: {}]   ;;  %s9982_s4 = inlined_call_operand.hbm [shape: f32[1,768], index: 4, kind: input, shape index: {}]   ;;  %s9983_s5 = inlined_call_operand.hbm [shape: bf16[768,768], index: 5, kind: input, shape index: {}]   ;;  %s9984_s6 = inlined_call_operand.hbm [shape: f32[1,768], index: 6, kind: input, shape index: {}]   ;;  %s9985_s7 = inlined_call_operand.hbm [shape: bf16[768,128], index: 7, kind: input, shape index: {}]   ;;  %s9986_s8 = inlined_call_operand.hbm [shape: f32[1,128], index: 8, kind: input, shape index: {}]   ;;  %s9987_s9 = inlined_call_operand.hbm [shape: f32[8,128], index: 9, kind: output, shape index: {}]  }
   0x1   :  { %15 = vsyncpa [#allocation6], 0 }
   0x2   :  { %16 = vsyncpa [#allocation9], 0 }
   0x3   :  { %17 = vsyncpa [#allocation12], 0 }
   0x4   :  { %18 = vsyncpa [#allocation15], 0 }
   0x5   :  { %19 = vsyncpa [#allocation4], 0  ;;  %s9644_s30 = smov [#allocation5]  }
   0x6   :  { %s35_s10 = sshll.u32 %s9644_s30, 4  ;;  %s36_s10 = int_to_ptr.vmem [resolvable:$true] %s35_s10 }
   0x7   :  { %s9440_s11 = scalar_lea.vmem %s36_s10, 36864  ;;  %p9445_p1 = scmp.lt.s32.totalorder %s36_s10, %s36_s10 }
   0x8   :  { %p9441_p0 = scmp.ne.s32.totalorder %s36_s10, %s9440_s11  ;;  %p9446_p2 = scmp.lt.s32.totalorder %s9440_s11, %s9440_s11 }
   0xa   :  { %p9447_p3 = por %p9446_p2, %p9445_p1 }
   0xc   :  { %p9448_p4 = pnand %p9447_p3, %p9441_p0 }
   0xe   :  { %9451 = shalt.err (!%p9448_p4)
}
   0xf   :  { %s9645_s12 = smov 384   ;;  %s9646_s13 = smov 24  }
  0x10   :  { %41 = dma.hbm_to_vmem [thread:$0]  %s9979_s1, 36864, %s36_s10, [#allocation6], %s9645_s12, %s9645_s12, %s9646_s13  }
  0x11   :  { %s9647_s16 = smov [#allocation8]   ;;  %s9648_s18 = smov [#allocation11]  }
  0x12   :  { %s57_s17 = sshll.u32 %s9647_s16, 4  ;;  %s79_s19 = sshll.u32 %s9648_s18, 4  ;;  %s58_s17 = int_to_ptr.vmem [resolvable:$true] %s57_s17  ;;  %s80_s19 = int_to_ptr.vmem [resolvable:$true] %s79_s19 }
  0x13   :  { %s9460_s20 = scalar_lea.vmem %s58_s17, 36864  ;;  %p9465_p6 = scmp.lt.s32.totalorder %s58_s17, %s58_s17 }
  0x14   :  { %p9461_p5 = scmp.ne.s32.totalorder %s58_s17, %s9460_s20  ;;  %p9466_p7 = scmp.lt.s32.totalorder %s9460_s20, %s9460_s20 }
  0x16   :  { %p9467_p8 = por %p9466_p7, %p9465_p6 }
  0x18   :  { %p9468_p9 = pnand %p9467_p8, %p9461_p5 }
  0x1a   :  { %9471 = shalt.err (!%p9468_p9)
}
  0x1b   :  { %63 = dma.hbm_to_vmem [thread:$0]  %s9981_s3, 36864, %s58_s17, [#allocation9], %s9645_s12, %s9645_s12, %s9646_s13  }
  0x1c   :  { %s9480_s23 = scalar_lea.vmem %s80_s19, 36864  ;;  %p9485_p11 = scmp.lt.s32.totalorder %s80_s19, %s80_s19 }
  0x1d   :  { %p9481_p10 = scmp.ne.s32.totalorder %s80_s19, %s9480_s23  ;;  %p9486_p12 = scmp.lt.s32.totalorder %s9480_s23, %s9480_s23 }
  0x1f   :  { %p9487_p13 = por %p9486_p12, %p9485_p11 }
  0x21   :  { %p9488_p0 = pnand %p9487_p13, %p9481_p10 }
  0x23   :  { %9491 = shalt.err (!%p9488_p0)
}
  0x24   :  { %85 = dma.hbm_to_vmem [thread:$0]  %s9983_s5, 36864, %s80_s19, [#allocation12], %s9645_s12, %s9645_s12, %s9646_s13  }
  0x25   :  { %s9649_s25 = smov [#allocation14]  }
  0x26   :  { %s101_s26 = sshll.u32 %s9649_s25, 4  ;;  %s102_s26 = int_to_ptr.vmem [resolvable:$true] %s101_s26 }
  0x27   :  { %s9500_s27 = scalar_lea.vmem %s102_s26, 6144  ;;  %p9505_p2 = scmp.lt.s32.totalorder %s102_s26, %s102_s26 }
  0x28   :  { %p9501_p1 = scmp.ne.s32.totalorder %s102_s26, %s9500_s27  ;;  %p9506_p3 = scmp.lt.s32.totalorder %s9500_s27, %s9500_s27 }
  0x2a   :  { %p9507_p4 = por %p9506_p3, %p9505_p2 }
  0x2c   :  { %p9508_p5 = pnand %p9507_p4, %p9501_p1 }
  0x2e   :  { %9511 = shalt.err (!%p9508_p5)
}
  0x2f   :  { %s9650_s3 = smov 64   ;;  %s9651_s28 = smov 4  }
  0x30   :  { %107 = dma.hbm_to_vmem [thread:$0]  %s9985_s7, 6144, %s102_s26, [#allocation15], %s9650_s3, %s9650_s3, %s9651_s28  }
  0x31   :  { %s9652_s10 = smov [#allocation2]   ;;  %s9653_s14 = smov [#allocation7]  }
  0x32   :  { %s26_s11 = sshll.u32 %s9652_s10, 4  ;;  %s48_s5 = sshll.u32 %s9653_s14, 4  ;;  %s27_s11 = int_to_ptr.vmem [resolvable:$true] %s26_s11  ;;  %s49_s5 = int_to_ptr.vmem [resolvable:$true] %s48_s5 }
  0x33   :  { %s9520_s12 = scalar_lea.vmem %s27_s11, 768  ;;  %p9525_p7 = scmp.lt.s32.totalorder %s27_s11, %s27_s11 }
  0x34   :  { %p9521_p6 = scmp.ne.s32.totalorder %s27_s11, %s9520_s12  ;;  %p9526_p8 = scmp.lt.s32.totalorder %s9520_s12, %s9520_s12 }
  0x36   :  { %p9527_p9 = por %p9526_p8, %p9525_p7 }
  0x38   :  { %p9528_p10 = pnand %p9527_p9, %p9521_p6 }
  0x3a   :  { %9531 = shalt.err (!%p9528_p10)
}
  0x3b   :  { %29 = dma.hbm_to_vmem [thread:$0]  %s9978_s0, 768, %s27_s11, [#allocation3]  }
  0x3c   :  { %s9540_s16 = scalar_lea.vmem %s49_s5, 96  ;;  %p9545_p12 = scmp.lt.s32.totalorder %s49_s5, %s49_s5 }
  0x3d   :  { %p9541_p11 = scmp.ne.s32.totalorder %s49_s5, %s9540_s16  ;;  %p9546_p13 = scmp.lt.s32.totalorder %s9540_s16, %s9540_s16 }
  0x3f   :  { %p9547_p0 = por %p9546_p13, %p9545_p12 }
  0x41   :  { %p9548_p1 = pnand %p9547_p0, %p9541_p11 }
  0x43   :  { %9551 = shalt.err (!%p9548_p1)
}
  0x44   :  { %51 = dma.hbm_to_vmem [thread:$0]  %s9980_s2, 96, %s49_s5, [#allocation6]  }
  0x45   :  { %s9654_s18 = smov [#allocation10]   ;;  %s9655_s20 = smov [#allocation13]  }
  0x46   :  { %s70_s19 = sshll.u32 %s9654_s18, 4  ;;  %s92_s21 = sshll.u32 %s9655_s20, 4  ;;  %s71_s19 = int_to_ptr.vmem [resolvable:$true] %s70_s19  ;;  %s93_s21 = int_to_ptr.vmem [resolvable:$true] %s92_s21 }
  0x47   :  { %s9560_s22 = scalar_lea.vmem %s71_s19, 96  ;;  %p9565_p3 = scmp.lt.s32.totalorder %s71_s19, %s71_s19 }
  0x48   :  { %p9561_p2 = scmp.ne.s32.totalorder %s71_s19, %s9560_s22  ;;  %p9566_p4 = scmp.lt.s32.totalorder %s9560_s22, %s9560_s22 }
  0x4a   :  { %p9567_p5 = por %p9566_p4, %p9565_p3 }
  0x4c   :  { %p9568_p6 = pnand %p9567_p5, %p9561_p2 }
  0x4e   :  { %9571 = shalt.err (!%p9568_p6)
}
  0x4f   :  { %73 = dma.hbm_to_vmem [thread:$0]  %s9982_s4, 96, %s71_s19, [#allocation9]  }
  0x50   :  { %s9580_s1 = scalar_lea.vmem %s93_s21, 96  ;;  %p9585_p8 = scmp.lt.s32.totalorder %s93_s21, %s93_s21 }
  0x51   :  { %p9581_p7 = scmp.ne.s32.totalorder %s93_s21, %s9580_s1  ;;  %p9586_p9 = scmp.lt.s32.totalorder %s9580_s1, %s9580_s1 }
  0x53   :  { %p9587_p10 = por %p9586_p9, %p9585_p8 }
  0x55   :  { %p9588_p11 = pnand %p9587_p10, %p9581_p7 }
  0x57   :  { %9591 = shalt.err (!%p9588_p11)
}
  0x58   :  { %95 = dma.hbm_to_vmem [thread:$0]  %s9984_s6, 96, %s93_s21, [#allocation12]  }
  0x59   :  { %s9656_s25 = smov [#allocation16]  }
  0x5a   :  { %s114_s26 = sshll.u32 %s9656_s25, 4  ;;  %s115_s26 = int_to_ptr.vmem [resolvable:$true] %s114_s26 }
  0x5b   :  { %s9600_s27 = scalar_lea.vmem %s115_s26, 16  ;;  %s9604_s3 = scalar_lea.vmem %s115_s26, 32 }
  0x5c   :  { %p9601_p12 = scmp.ne.s32.totalorder %s115_s26, %s9600_s27  ;;  %p9605_p13 = scmp.lt.s32.totalorder %s115_s26, %s115_s26 }
  0x5d   :  { %p9606_p0 = scmp.lt.s32.totalorder %s9604_s3, %s9600_s27 }
  0x5f   :  { %p9607_p1 = por %p9606_p0, %p9605_p13 }
  0x61   :  { %p9608_p2 = pnand %p9607_p1, %p9601_p12 }
  0x63   :  { %9611 = shalt.err (!%p9608_p2)
}
  0x64   :  { %117 = dma.hbm_to_vmem [thread:$0]  %s9986_s8, 16, %s115_s26, [#allocation15]  }
  0x65   :  { %9632 = dma.done.wait [#allocation3], 768  }
  0x66   :  { %9633 = vsyncadd [#allocation3], 4294966528 }
  0x67   :  { %9634 = dma.done.wait [#allocation6], 36960  }
  0x68   :  { %9635 = vsyncadd [#allocation6], 4294930336 }
  0x69   :  { %9636 = dma.done.wait [#allocation9], 36960  }
  0x6a   :  { %9637 = vsyncadd [#allocation9], 4294930336 }
  0x6b   :  { %9638 = dma.done.wait [#allocation12], 36960  }
  0x6c   :  { %9639 = vsyncadd [#allocation12], 4294930336 }
  0x6d   :  { %9640 = dma.done.wait [#allocation15], 6160  }
  0x6e   :  { %9641 = vsyncadd [#allocation15], 4294961136  ;;  %v8087_v0 = vld [vmem:[#allocation5 + $0x154] ss:$24 sps:$4 sm:$0xff]   ;;  %v8089_v1 = vld [vmem:[#allocation5 + $0x150] ss:$24 sps:$4 sm:$0xff]  }
  0x6f   :  { %1918 = vmatprep.subr.bf16.mxu0 %v8087_v0  ;;  %v8090_v2 = vld [vmem:[#allocation5 + $0x454] ss:$24 sps:$4 sm:$0xff]   ;;  %v8092_v3 = vld [vmem:[#allocation5 + $0x450] ss:$24 sps:$4 sm:$0xff]   ;;  %v8093_v4 = vld [vmem:[#allocation5 + $0x124] ss:$24 sps:$4 sm:$0xff]  }
  0x70   :  { %1919 = vmatpush1.bf16.msra.mxu0 %v8089_v1  ;;  %v8095_v5 = vld [vmem:[#allocation5 + $0x120] ss:$24 sps:$4 sm:$0xff]   ;;  %1959 = vmatprep.subr.bf16.mxu1 %v8090_v2  ;;  %v8096_v6 = vld [vmem:[#allocation5 + $0x424] ss:$24 sps:$4 sm:$0xff]   ;;  %v8099_v8 = vld [vmem:[#allocation5 + $0xf4] ss:$24 sps:$4 sm:$0xff]  }
  0x71   :  { %1960 = vmatpush1.bf16.msra.mxu1 %v8092_v3  ;;  %1920 = vmatprep.subr.bf16.mxu0 %v8093_v4  ;;  %v8098_v7 = vld [vmem:[#allocation5 + $0x420] ss:$24 sps:$4 sm:$0xff]   ;;  %v8101_v9 = vld [vmem:[#allocation5 + $0xf0] ss:$24 sps:$4 sm:$0xff]   ;;  %v8102_v10 = vld [vmem:[#allocation5 + $0x3f4] ss:$24 sps:$4 sm:$0xff]  }
  0x72   :  { %1961 = vmatprep.subr.bf16.mxu1 %v8096_v6  ;;  %v8105_v11 = vld [vmem:[#allocation5 + $0xc4] ss:$24 sps:$4 sm:$0xff]   ;;  %v8104_v12 = vld [vmem:[#allocation5 + $0x3f0] ss:$24 sps:$4 sm:$0xff]   ;;  %v8107_v14 = vld [vmem:[#allocation5 + $0xc0] ss:$24 sps:$4 sm:$0xff]  }
  0x73   :  { %v8108_v13 = vld [vmem:[#allocation5 + $0x3c4] ss:$24 sps:$4 sm:$0xff]   ;;  %v8111_v15 = vld [vmem:[#allocation5 + $0x94] ss:$24 sps:$4 sm:$0xff]   ;;  %v8110_v16 = vld [vmem:[#allocation5 + $0x3c0] ss:$24 sps:$4 sm:$0xff]  }
  0x74   :  { %1921 = vmatpush1.bf16.msra.mxu0 %v8095_v5  ;;  %v8114_v17 = vld [vmem:[#allocation5 + $0x394] ss:$24 sps:$4 sm:$0xff]   ;;  %v8113_v18 = vld [vmem:[#allocation5 + $0x90] ss:$24 sps:$4 sm:$0xff]   ;;  %v8117_v19 = vld [vmem:[#allocation5 + $0x64] ss:$24 sps:$4 sm:$0xff]  }
  0x75   :  { %1922 = vmatprep.subr.bf16.mxu0 %v8099_v8  ;;  %1962 = vmatpush1.bf16.msra.mxu1 %v8098_v7  ;;  %v8116_v20 = vld [vmem:[#allocation5 + $0x390] ss:$24 sps:$4 sm:$0xff]   ;;  %v8120_v21 = vld [vmem:[#allocation5 + $0x364] ss:$24 sps:$4 sm:$0xff]   ;;  %v8119_v22 = vld [vmem:[#allocation5 + $0x60] ss:$24 sps:$4 sm:$0xff]  }
  0x76   :  { %1963 = vmatprep.subr.bf16.mxu1 %v8102_v10  ;;  %v8123_v23 = vld [vmem:[#allocation5 + $0x34] ss:$24 sps:$4 sm:$0xff]   ;;  %v8122_v24 = vld [vmem:[#allocation5 + $0x360] ss:$24 sps:$4 sm:$0xff]   ;;  %v8125_v26 = vld [vmem:[#allocation5 + $0x30] ss:$24 sps:$4 sm:$0xff]  }
  0x77   :  { %v8126_v25 = vld [vmem:[#allocation5 + $0x334] ss:$24 sps:$4 sm:$0xff]   ;;  %v8129_v27 = vld [vmem:[#allocation5 + $0x4] ss:$24 sps:$4 sm:$0xff]   ;;  %v8128_v28 = vld [vmem:[#allocation5 + $0x330] ss:$24 sps:$4 sm:$0xff]  }
  0x78   :  { %1923 = vmatpush1.bf16.msra.mxu0 %v8101_v9  ;;  %v8132_v29 = vld [vmem:[#allocation5 + $0x304] ss:$24 sps:$4 sm:$0xff]   ;;  %v8131_v30 = vld [vmem:[#allocation5] ss:$24 sps:$4 sm:$0xff]   ;;  %v8135_v31 = vld [vmem:[#allocation5 + $0x2d4] ss:$24 sps:$4 sm:$0xff]  }
  0x79   :  { %1924 = vmatprep.subr.bf16.mxu0 %v8105_v11  ;;  %1964 = vmatpush1.bf16.msra.mxu1 %v8104_v12  ;;  %v8134_v32 = vld [vmem:[#allocation5 + $0x300] ss:$24 sps:$4 sm:$0xff]   ;;  %v8138_v33 = vld [vmem:[#allocation5 + $0x5d4] ss:$24 sps:$4 sm:$0xff]   ;;  %v8137_v34 = vld [vmem:[#allocation5 + $0x2d0] ss:$24 sps:$4 sm:$0xff]  }
  0x7a   :  { %1965 = vmatprep.subr.bf16.mxu1 %v8108_v13  ;;  %v8141_v35 = vld [vmem:[#allocation5 + $0x2a4] ss:$24 sps:$4 sm:$0xff]   ;;  %v8140_v36 = vld [vmem:[#allocation5 + $0x5d0] ss:$24 sps:$4 sm:$0xff]   ;;  %v8143_v38 = vld [vmem:[#allocation5 + $0x2a0] ss:$24 sps:$4 sm:$0xff]  }
  0x7b   :  { %v8144_v37 = vld [vmem:[#allocation5 + $0x5a4] ss:$24 sps:$4 sm:$0xff]   ;;  %v8147_v39 = vld [vmem:[#allocation5 + $0x274] ss:$24 sps:$4 sm:$0xff]   ;;  %v8146_v40 = vld [vmem:[#allocation5 + $0x5a0] ss:$24 sps:$4 sm:$0xff]  }
  0x7c   :  { %1925 = vmatpush1.bf16.msra.mxu0 %v8107_v14  ;;  %v8150_v41 = vld [vmem:[#allocation5 + $0x574] ss:$24 sps:$4 sm:$0xff]   ;;  %v8149_v42 = vld [vmem:[#allocation5 + $0x270] ss:$24 sps:$4 sm:$0xff]   ;;  %v8153_v43 = vld [vmem:[#allocation5 + $0x244] ss:$24 sps:$4 sm:$0xff]  }
  0x7d   :  { %1926 = vmatprep.subr.bf16.mxu0 %v8111_v15  ;;  %1966 = vmatpush1.bf16.msra.mxu1 %v8110_v16  ;;  %v8152_v44 = vld [vmem:[#allocation5 + $0x570] ss:$24 sps:$4 sm:$0xff]   ;;  %v8156_v45 = vld [vmem:[#allocation5 + $0x544] ss:$24 sps:$4 sm:$0xff]   ;;  %v8155_v47 = vld [vmem:[#allocation5 + $0x240] ss:$24 sps:$4 sm:$0xff]  }
  0x7e   :  { %1967 = vmatprep.subr.bf16.mxu1 %v8114_v17  ;;  %v147_v46 = vld [vmem:[#allocation2 + $0x8] sm:$0xff]  ;;  %v8159_v49 = vld [vmem:[#allocation5 + $0x214] ss:$24 sps:$4 sm:$0xff]   ;;  %v8161_v54 = vld [vmem:[#allocation5 + $0x210] ss:$24 sps:$4 sm:$0xff]   ;;  %s9657_s6 = smov [#allocation17]  }
  0x7f   :  { %v9735_v48 = vpack.c.bf16 %v147_v46, %v147_v46  ;;  %v149_v50 = vld [vmem:[#allocation2 + $0x18] sm:$0xff]  ;;  %v8158_v51 = vld [vmem:[#allocation5 + $0x540] ss:$24 sps:$4 sm:$0xff]   ;;  %v8165_v55 = vld [vmem:[#allocation5 + $0x1e4] ss:$24 sps:$4 sm:$0xff]   ;;  %s7081_s8 = sshll.u32 %s9657_s6, 4  ;;  %s7082_s8 = int_to_ptr.vmem [resolvable:$true] %s7081_s8 }
  0x80   :  { %1927 = vmatpush1.bf16.msra.mxu0 %v8113_v18  ;;  %v9738_v52 = vpack.c.bf16 %v149_v50, %v149_v50  ;;  %v8162_v53 = vld [vmem:[#allocation5 + $0x514] ss:$24 sps:$4 sm:$0xff]   ;;  %v8164_v56 = vld [vmem:[#allocation5 + $0x510] ss:$24 sps:$4 sm:$0xff]   ;;  %v8168_v57 = vld [vmem:[#allocation5 + $0x4e4] ss:$24 sps:$4 sm:$0xff]   ;;  %p9617_p4 = scmp.lt.s32.totalorder %s7082_s8, %s7082_s8 }
  0x81   :  { %1928 = vmatprep.subr.bf16.mxu0 %v8117_v19  ;;  %1968 = vmatpush1.bf16.msra.mxu1 %v8116_v20  ;;  %v8167_v58 = vld [vmem:[#allocation5 + $0x1e0] ss:$24 sps:$4 sm:$0xff]   ;;  %v8171_v59 = vld [vmem:[#allocation5 + $0x1b4] ss:$24 sps:$4 sm:$0xff]   ;;  %v8173_v62 = vld [vmem:[#allocation5 + $0x1b0] ss:$24 sps:$4 sm:$0xff]  }
  0x82   :  { %1969 = vmatprep.subr.bf16.mxu1 %v8120_v21  ;;  %1950 = vmatprep.mubr.bf16.mxu0 %v9735_v48  ;;  %v8170_v60 = vld [vmem:[#allocation5 + $0x4e0] ss:$24 sps:$4 sm:$0xff]   ;;  %v8174_v61 = vld [vmem:[#allocation5 + $0x4b4] ss:$24 sps:$4 sm:$0xff]   ;;  %v8177_v63 = vld [vmem:[#allocation5 + $0x184] ss:$24 sps:$4 sm:$0xff]  }
  0x83   :  { %1991 = vmatprep.mubr.bf16.mxu1 %v9738_v52  ;;  %v8176_v0 = vld [vmem:[#allocation5 + $0x4b0] ss:$24 sps:$4 sm:$0xff]   ;;  %v8179_v1 = vld [vmem:[#allocation5 + $0x180] ss:$24 sps:$4 sm:$0xff]   ;;  %v8180_v2 = vld [vmem:[#allocation5 + $0x484] ss:$24 sps:$4 sm:$0xff]  }
  0x84   :  { %1929 = vmatpush1.bf16.msra.mxu0 %v8119_v22  ;;  %v8182_v3 = vld [vmem:[#allocation5 + $0x480] ss:$24 sps:$4 sm:$0xff]   ;;  %v146_v4 = vld [vmem:[#allocation2] sm:$0xff]  ;;  %v8191_v11 = vld [vmem:[#allocation5 + $0x724] ss:$24 sps:$4 sm:$0xff]   ;;  %s9612_s29 = scalar_lea.vmem %s7082_s8, 128 }
  0x85   :  { %1930 = vmatprep.subr.bf16.mxu0 %v8123_v23  ;;  %1970 = vmatpush1.bf16.msra.mxu1 %v8122_v24  ;;  %v8185_v5 = vld [vmem:[#allocation5 + $0x754] ss:$24 sps:$4 sm:$0xff]   ;;  %v148_v6 = vld [vmem:[#allocation2 + $0x10] sm:$0xff]  ;;  %v9741_v7 = vpack.c.bf16 %v146_v4, %v146_v4  ;;  %v8183_v9 = vld [vmem:[#allocation5 + $0x750] ss:$24 sps:$4 sm:$0xff]   ;;  %p9613_p3 = scmp.ne.s32.totalorder %s7082_s8, %s9612_s29  ;;  %p9618_p5 = scmp.lt.s32.totalorder %s9612_s29, %s9612_s29 }
  0x86   :  { %1971 = vmatprep.subr.bf16.mxu1 %v8126_v25  ;;  %v8188_v8 = vld [vmem:[#allocation5 + $0x15c] ss:$24 sps:$4 sm:$0xff]   ;;  %v9743_v10 = vpack.c.bf16 %v148_v6, %v148_v6  ;;  %v8186_v12 = vld [vmem:[#allocation5 + $0x158] ss:$24 sps:$4 sm:$0xff]   ;;  %v8194_v13 = vld [vmem:[#allocation5 + $0x12c] ss:$24 sps:$4 sm:$0xff]  }
  0x87   :  { %v8189_v14 = vld [vmem:[#allocation5 + $0x720] ss:$24 sps:$4 sm:$0xff]   ;;  %v8197_v15 = vld [vmem:[#allocation5 + $0x6f4] ss:$24 sps:$4 sm:$0xff]   ;;  %v8195_v18 = vld [vmem:[#allocation5 + $0x6f0] ss:$24 sps:$4 sm:$0xff]   ;;  %p9619_p6 = por %p9618_p5, %p9617_p4 }
  0x88   :  { %1931 = vmatpush1.bf16.msra.mxu0 %v8125_v26  ;;  %v8192_v16 = vld [vmem:[#allocation5 + $0x128] ss:$24 sps:$4 sm:$0xff]   ;;  %v8200_v17 = vld [vmem:[#allocation5 + $0xfc] ss:$24 sps:$4 sm:$0xff]   ;;  %v8198_v20 = vld [vmem:[#allocation5 + $0xf8] ss:$24 sps:$4 sm:$0xff]  }
  0x89   :  { %1932 = vmatprep.subr.bf16.mxu0 %v8129_v27  ;;  %1972 = vmatpush1.bf16.msra.mxu1 %v8128_v28  ;;  %v8203_v19 = vld [vmem:[#allocation5 + $0x6c4] ss:$24 sps:$4 sm:$0xff]   ;;  %v8201_v22 = vld [vmem:[#allocation5 + $0x6c0] ss:$24 sps:$4 sm:$0xff]   ;;  %v8209_v23 = vld [vmem:[#allocation5 + $0x694] ss:$24 sps:$4 sm:$0xff]   ;;  %p9620_p7 = pnand %p9619_p6, %p9613_p3 }
  0x8a   :  { %1973 = vmatprep.subr.bf16.mxu1 %v8132_v29  ;;  %v8206_v21 = vld [vmem:[#allocation5 + $0xcc] ss:$24 sps:$4 sm:$0xff]   ;;  %v8204_v24 = vld [vmem:[#allocation5 + $0xc8] ss:$24 sps:$4 sm:$0xff]   ;;  %v8212_v25 = vld [vmem:[#allocation5 + $0x9c] ss:$24 sps:$4 sm:$0xff]  }
  0x8b   :  { %v8207_v26 = vld [vmem:[#allocation5 + $0x690] ss:$24 sps:$4 sm:$0xff]   ;;  %v8215_v27 = vld [vmem:[#allocation5 + $0x664] ss:$24 sps:$4 sm:$0xff]   ;;  %v8245_v50 = vld [vmem:[#allocation5 + $0x874] ss:$24 sps:$4 sm:$0xff]  }
  0x8c   :  { %1933 = vmatpush1.bf16.msra.mxu0 %v8131_v30  ;;  %v8210_v28 = vld [vmem:[#allocation5 + $0x98] ss:$24 sps:$4 sm:$0xff]   ;;  %v8218_v29 = vld [vmem:[#allocation5 + $0x6c] ss:$24 sps:$4 sm:$0xff]   ;;  %v8264_v4 = vld [vmem:[#allocation5 + $0x1e8] ss:$24 sps:$4 sm:$0xff]  }
  0x8d   :  { %1934 = vmatprep.subr.bf16.mxu0 %v8135_v31  ;;  %1974 = vmatpush1.bf16.msra.mxu1 %v8134_v32  ;;  %v8213_v30 = vld [vmem:[#allocation5 + $0x660] ss:$24 sps:$4 sm:$0xff]   ;;  %v8221_v31 = vld [vmem:[#allocation5 + $0x634] ss:$24 sps:$4 sm:$0xff]   ;;  %v8267_v6 = vld [vmem:[#allocation5 + $0x7b0] ss:$24 sps:$4 sm:$0xff]  }
  0x8e   :  { %1975 = vmatprep.subr.bf16.mxu1 %v8138_v33  ;;  %v8216_v32 = vld [vmem:[#allocation5 + $0x68] ss:$24 sps:$4 sm:$0xff]   ;;  %v8224_v33 = vld [vmem:[#allocation5 + $0x3c] ss:$24 sps:$4 sm:$0xff]   ;;  %v8234_v46 = vld [vmem:[#allocation5 + $0x2d8] ss:$24 sps:$4 sm:$0xff]  }
  0x90   :  { %1935 = vmatpush2.bf16.msra.mxu0 %v8137_v34  ;;  %v151_v34 = vld [vmem:[#allocation2 + $0x28] sm:$0xff] }
  0x91   :  { %1936 = vmatprep.subr.bf16.mxu0 %v8141_v35  ;;  %1976 = vmatpush2.bf16.msra.mxu1 %v8140_v36  ;;  %v8219_v35 = vld [vmem:[#allocation5 + $0x630] ss:$24 sps:$4 sm:$0xff]   ;;  %v9748_v36 = vpack.c.bf16 %v151_v34, %v151_v34 }
  0x92   :  { %1977 = vmatprep.subr.bf16.mxu1 %v8144_v37  ;;  %v8227_v37 = vld [vmem:[#allocation5 + $0x604] ss:$24 sps:$4 sm:$0xff]   ;;  %v8303_v34 = vld [vmem:[#allocation5 + $0x398] ss:$24 sps:$4 sm:$0xff]  }
  0x94   :  { %1937 = vmatpush2.bf16.msra.mxu0 %v8143_v38  ;;  %v8222_v38 = vld [vmem:[#allocation5 + $0x38] ss:$24 sps:$4 sm:$0xff]  }
  0x95   :  { %1938 = vmatprep.subr.bf16.mxu0 %v8147_v39  ;;  %1978 = vmatpush2.bf16.msra.mxu1 %v8146_v40  ;;  %v8230_v39 = vld [vmem:[#allocation5 + $0xc] ss:$24 sps:$4 sm:$0xff]   ;;  %v8225_v40 = vld [vmem:[#allocation5 + $0x600] ss:$24 sps:$4 sm:$0xff]  }
  0x96   :  { %1979 = vmatprep.subr.bf16.mxu1 %v8150_v41  ;;  %v8233_v41 = vld [vmem:[#allocation5 + $0x8d4] ss:$24 sps:$4 sm:$0xff]  }
  0x98   :  { %1939 = vmatpush2.bf16.msra.mxu0 %v8149_v42  ;;  %v8228_v42 = vld [vmem:[#allocation5 + $0x8] ss:$24 sps:$4 sm:$0xff]  }
  0x99   :  { %1940 = vmatprep.subr.bf16.mxu0 %v8153_v43  ;;  %1980 = vmatpush2.bf16.msra.mxu1 %v8152_v44  ;;  %v8236_v43 = vld [vmem:[#allocation5 + $0x2dc] ss:$24 sps:$4 sm:$0xff]   ;;  %v8231_v44 = vld [vmem:[#allocation5 + $0x8d0] ss:$24 sps:$4 sm:$0xff]  }
  0x9a   :  { %1981 = vmatprep.subr.bf16.mxu1 %v8156_v45  ;;  %v8239_v45 = vld [vmem:[#allocation5 + $0x8a4] ss:$24 sps:$4 sm:$0xff]  }
  0x9c   :  { %1941 = vmatpush2.bf16.msra.mxu0 %v8155_v47  ;;  %v8242_v47 = vld [vmem:[#allocation5 + $0x2ac] ss:$24 sps:$4 sm:$0xff]  }
  0x9d   :  { %1942 = vmatprep.subr.bf16.mxu0 %v8159_v49  ;;  %1982 = vmatpush2.bf16.msra.mxu1 %v8158_v51  ;;  %v8237_v49 = vld [vmem:[#allocation5 + $0x8a0] ss:$24 sps:$4 sm:$0xff]  }
  0x9e   :  { %1983 = vmatprep.subr.bf16.mxu1 %v8162_v53  ;;  %v8240_v51 = vld [vmem:[#allocation5 + $0x2a8] ss:$24 sps:$4 sm:$0xff]   ;;  %v8248_v53 = vld [vmem:[#allocation5 + $0x27c] ss:$24 sps:$4 sm:$0xff]  }
  0xa0   :  { %1943 = vmatpush2.bf16.msra.mxu0 %v8161_v54  ;;  %v8243_v54 = vld [vmem:[#allocation5 + $0x870] ss:$24 sps:$4 sm:$0xff]  }
  0xa1   :  { %1944 = vmatprep.subr.bf16.mxu0 %v8165_v55  ;;  %1984 = vmatpush2.bf16.msra.mxu1 %v8164_v56  ;;  %v8251_v55 = vld [vmem:[#allocation5 + $0x844] ss:$24 sps:$4 sm:$0xff]   ;;  %v8246_v56 = vld [vmem:[#allocation5 + $0x278] ss:$24 sps:$4 sm:$0xff]  }
  0xa2   :  { %1985 = vmatprep.subr.bf16.mxu1 %v8168_v57  ;;  %v8254_v57 = vld [vmem:[#allocation5 + $0x24c] ss:$24 sps:$4 sm:$0xff]  }
  0xa4   :  { %1945 = vmatpush2.bf16.msra.mxu0 %v8167_v58  ;;  %v8249_v58 = vld [vmem:[#allocation5 + $0x840] ss:$24 sps:$4 sm:$0xff]  }
  0xa5   :  { %1946 = vmatprep.subr.bf16.mxu0 %v8171_v59  ;;  %1986 = vmatpush2.bf16.msra.mxu1 %v8170_v60  ;;  %v8257_v59 = vld [vmem:[#allocation5 + $0x814] ss:$24 sps:$4 sm:$0xff]   ;;  %v8252_v60 = vld [vmem:[#allocation5 + $0x248] ss:$24 sps:$4 sm:$0xff]  }
  0xa6   :  { %1987 = vmatprep.subr.bf16.mxu1 %v8174_v61  ;;  %v8260_v61 = vld [vmem:[#allocation5 + $0x21c] ss:$24 sps:$4 sm:$0xff]  }
  0xa8   :  { %1947 = vmatpush2.bf16.msra.mxu0 %v8173_v62  ;;  %v8255_v62 = vld [vmem:[#allocation5 + $0x810] ss:$24 sps:$4 sm:$0xff]  }
  0xa9   :  { %1948 = vmatprep.subr.bf16.mxu0 %v8177_v63  ;;  %1988 = vmatpush2.bf16.msra.mxu1 %v8176_v0  ;;  %v8263_v63 = vld [vmem:[#allocation5 + $0x7e4] ss:$24 sps:$4 sm:$0xff]   ;;  %v8258_v0 = vld [vmem:[#allocation5 + $0x218] ss:$24 sps:$4 sm:$0xff]  }
  0xaa   :  { %1989 = vmatprep.subr.bf16.mxu1 %v8180_v2  ;;  %v8261_v2 = vld [vmem:[#allocation5 + $0x7e0] ss:$24 sps:$4 sm:$0xff]  }
  0xac   :  { %1949 = vmatpush2.bf16.msra.mxu0 %v8179_v1  ;;  %v8266_v1 = vld [vmem:[#allocation5 + $0x1ec] ss:$24 sps:$4 sm:$0xff]  }
  0xad   :  { %2000 = vmatprep.subr.bf16.mxu0 %v8185_v5  ;;  %1990 = vmatpush2.bf16.msra.mxu1 %v8182_v3  ;;  %v8269_v3 = vld [vmem:[#allocation5 + $0x7b4] ss:$24 sps:$4 sm:$0xff]  }
  0xae   :  { %2041 = vmatprep.subr.bf16.mxu1 %v8188_v8  ;;  %v8272_v5 = vld [vmem:[#allocation5 + $0x1bc] ss:$24 sps:$4 sm:$0xff]  }
  0xaf   :  { %1951 = vmatmul.mubr.bf16.vlgmr.msra.gmra.mxu0 %v9741_v7  ;;  %v8275_v8 = vld [vmem:[#allocation5 + $0x784] ss:$24 sps:$4 sm:$0xff]  }
  0xb0   :  { %2001 = vmatpush1.bf16.msra.mxu0 %v8183_v9  ;;  %1992 = vmatmul.mubr.bf16.vlgmr.msra.gmra.mxu1 %v9743_v10  ;;  %v8270_v9 = vld [vmem:[#allocation5 + $0x1b8] ss:$24 sps:$4 sm:$0xff]  }
  0xb1   :  { %2002 = vmatprep.subr.bf16.mxu0 %v8191_v11  ;;  %2042 = vmatpush1.bf16.msra.mxu1 %v8186_v12  ;;  %v8273_v11 = vld [vmem:[#allocation5 + $0x780] ss:$24 sps:$4 sm:$0xff]   ;;  %v8278_v12 = vld [vmem:[#allocation5 + $0x18c] ss:$24 sps:$4 sm:$0xff]  }
  0xb2   :  { %2073 = vmatprep.mubr.bf16.mxu1 %v9735_v48  ;;  %2043 = vmatprep.subr.bf16.mxu1 %v8194_v13  ;;  %v150_v13 = vld [vmem:[#allocation2 + $0x20] sm:$0xff] }
  0xb3   :  { %2032 = vmatprep.mubr.bf16.mxu0 %v9748_v36 }
  0xb4   :  { %2003 = vmatpush1.bf16.msra.mxu0 %v8189_v14  ;;  %v8281_v14 = vld [vmem:[#allocation5 + $0x45c] ss:$24 sps:$4 sm:$0xff]  }
  0xb5   :  { %2004 = vmatprep.subr.bf16.mxu0 %v8197_v15  ;;  %2044 = vmatpush1.bf16.msra.mxu1 %v8192_v16  ;;  %v8276_v15 = vld [vmem:[#allocation5 + $0x188] ss:$24 sps:$4 sm:$0xff]   ;;  %v9751_v16 = vpack.c.bf16 %v150_v13, %v150_v13 }
  0xb6   :  { %2045 = vmatprep.subr.bf16.mxu1 %v8200_v17  ;;  %v8284_v17 = vld [vmem:[#allocation5 + $0x75c] ss:$24 sps:$4 sm:$0xff]   ;;  %v8360_v13 = vld [vmem:[#allocation5 + $0x7e8] ss:$24 sps:$4 sm:$0xff]  }
  0xb8   :  { %2005 = vmatpush1.bf16.msra.mxu0 %v8195_v18  ;;  %v8279_v18 = vld [vmem:[#allocation5 + $0x458] ss:$24 sps:$4 sm:$0xff]  }
  0xb9   :  { %2006 = vmatprep.subr.bf16.mxu0 %v8203_v19  ;;  %2046 = vmatpush1.bf16.msra.mxu1 %v8198_v20  ;;  %v8287_v19 = vld [vmem:[#allocation5 + $0x42c] ss:$24 sps:$4 sm:$0xff]   ;;  %v8282_v20 = vld [vmem:[#allocation5 + $0x758] ss:$24 sps:$4 sm:$0xff]  }
  0xba   :  { %2047 = vmatprep.subr.bf16.mxu1 %v8206_v21  ;;  %v8290_v21 = vld [vmem:[#allocation5 + $0x72c] ss:$24 sps:$4 sm:$0xff]  }
  0xbc   :  { %2007 = vmatpush1.bf16.msra.mxu0 %v8201_v22  ;;  %v8285_v22 = vld [vmem:[#allocation5 + $0x428] ss:$24 sps:$4 sm:$0xff]  }
  0xbd   :  { %2008 = vmatprep.subr.bf16.mxu0 %v8209_v23  ;;  %2048 = vmatpush1.bf16.msra.mxu1 %v8204_v24  ;;  %v8293_v23 = vld [vmem:[#allocation5 + $0x3fc] ss:$24 sps:$4 sm:$0xff]   ;;  %v8288_v24 = vld [vmem:[#allocation5 + $0x728] ss:$24 sps:$4 sm:$0xff]  }
  0xbe   :  { %2049 = vmatprep.subr.bf16.mxu1 %v8212_v25  ;;  %v8296_v25 = vld [vmem:[#allocation5 + $0x6fc] ss:$24 sps:$4 sm:$0xff]  }
  0xc0   :  { %2009 = vmatpush1.bf16.msra.mxu0 %v8207_v26  ;;  %v8291_v26 = vld [vmem:[#allocation5 + $0x3f8] ss:$24 sps:$4 sm:$0xff]  }
  0xc1   :  { %2010 = vmatprep.subr.bf16.mxu0 %v8215_v27  ;;  %2050 = vmatpush1.bf16.msra.mxu1 %v8210_v28  ;;  %v8299_v27 = vld [vmem:[#allocation5 + $0x3cc] ss:$24 sps:$4 sm:$0xff]   ;;  %v8294_v28 = vld [vmem:[#allocation5 + $0x6f8] ss:$24 sps:$4 sm:$0xff]  }
  0xc2   :  { %2051 = vmatprep.subr.bf16.mxu1 %v8218_v29  ;;  %v8302_v29 = vld [vmem:[#allocation5 + $0x6cc] ss:$24 sps:$4 sm:$0xff]  }
  0xc4   :  { %2011 = vmatpush1.bf16.msra.mxu0 %v8213_v30  ;;  %v8297_v30 = vld [vmem:[#allocation5 + $0x3c8] ss:$24 sps:$4 sm:$0xff]  }
  0xc5   :  { %2012 = vmatprep.subr.bf16.mxu0 %v8221_v31  ;;  %2052 = vmatpush1.bf16.msra.mxu1 %v8216_v32  ;;  %v8305_v31 = vld [vmem:[#allocation5 + $0x39c] ss:$24 sps:$4 sm:$0xff]   ;;  %v8300_v32 = vld [vmem:[#allocation5 + $0x6c8] ss:$24 sps:$4 sm:$0xff]  }
  0xc6   :  { %2053 = vmatprep.subr.bf16.mxu1 %v8224_v33  ;;  %v8308_v33 = vld [vmem:[#allocation5 + $0x69c] ss:$24 sps:$4 sm:$0xff]  }
  0xc8   :  { %2013 = vmatpush1.bf16.msra.mxu0 %v8219_v35  ;;  %v8311_v35 = vld [vmem:[#allocation5 + $0x36c] ss:$24 sps:$4 sm:$0xff]  }
  0xc9   :  { %2014 = vmatprep.subr.bf16.mxu0 %v8227_v37  ;;  %2054 = vmatpush1.bf16.msra.mxu1 %v8222_v38  ;;  %v8306_v37 = vld [vmem:[#allocation5 + $0x698] ss:$24 sps:$4 sm:$0xff]   ;;  %v8314_v38 = vld [vmem:[#allocation5 + $0x66c] ss:$24 sps:$4 sm:$0xff]  }
  0xca   :  { %2055 = vmatprep.subr.bf16.mxu1 %v8230_v39  ;;  %v8309_v39 = vld [vmem:[#allocation5 + $0x368] ss:$24 sps:$4 sm:$0xff]  }
  0xcc   :  { %2015 = vmatpush1.bf16.msra.mxu0 %v8225_v40  ;;  %v8317_v40 = vld [vmem:[#allocation5 + $0x33c] ss:$24 sps:$4 sm:$0xff]  }
  0xcd   :  { %2016 = vmatprep.subr.bf16.mxu0 %v8233_v41  ;;  %2056 = vmatpush1.bf16.msra.mxu1 %v8228_v42  ;;  %v8312_v41 = vld [vmem:[#allocation5 + $0x668] ss:$24 sps:$4 sm:$0xff]   ;;  %v8320_v42 = vld [vmem:[#allocation5 + $0x63c] ss:$24 sps:$4 sm:$0xff]  }
  0xce   :  { %2057 = vmatprep.subr.bf16.mxu1 %v8236_v43  ;;  %v8315_v43 = vld [vmem:[#allocation5 + $0x338] ss:$24 sps:$4 sm:$0xff]  }
  0xd0   :  { %2017 = vmatpush2.bf16.msra.mxu0 %v8231_v44  ;;  %v8323_v44 = vld [vmem:[#allocation5 + $0x30c] ss:$24 sps:$4 sm:$0xff]  }
  0xd1   :  { %2018 = vmatprep.subr.bf16.mxu0 %v8239_v45  ;;  %2058 = vmatpush2.bf16.msra.mxu1 %v8234_v46  ;;  %v8318_v45 = vld [vmem:[#allocation5 + $0x638] ss:$24 sps:$4 sm:$0xff]   ;;  %v8326_v46 = vld [vmem:[#allocation5 + $0x60c] ss:$24 sps:$4 sm:$0xff]  }
  0xd2   :  { %2059 = vmatprep.subr.bf16.mxu1 %v8242_v47  ;;  %v8321_v47 = vld [vmem:[#allocation5 + $0x308] ss:$24 sps:$4 sm:$0xff]  }
  0xd4   :  { %2019 = vmatpush2.bf16.msra.mxu0 %v8237_v49  ;;  %v8329_v49 = vld [vmem:[#allocation5 + $0x5dc] ss:$24 sps:$4 sm:$0xff]  }
  0xd5   :  { %2020 = vmatprep.subr.bf16.mxu0 %v8245_v50  ;;  %2060 = vmatpush2.bf16.msra.mxu1 %v8240_v51  ;;  %v8324_v50 = vld [vmem:[#allocation5 + $0x608] ss:$24 sps:$4 sm:$0xff]   ;;  %v8332_v51 = vld [vmem:[#allocation5 + $0x8dc] ss:$24 sps:$4 sm:$0xff]  }
  0xd6   :  { %2061 = vmatprep.subr.bf16.mxu1 %v8248_v53  ;;  %v8327_v53 = vld [vmem:[#allocation5 + $0x5d8] ss:$24 sps:$4 sm:$0xff]  }
  0xd8   :  { %2021 = vmatpush2.bf16.msra.mxu0 %v8243_v54  ;;  %v8335_v54 = vld [vmem:[#allocation5 + $0x5ac] ss:$24 sps:$4 sm:$0xff]  }
  0xd9   :  { %2022 = vmatprep.subr.bf16.mxu0 %v8251_v55  ;;  %2062 = vmatpush2.bf16.msra.mxu1 %v8246_v56  ;;  %v8330_v55 = vld [vmem:[#allocation5 + $0x8d8] ss:$24 sps:$4 sm:$0xff]   ;;  %v8338_v56 = vld [vmem:[#allocation5 + $0x8ac] ss:$24 sps:$4 sm:$0xff]  }
  0xda   :  { %2063 = vmatprep.subr.bf16.mxu1 %v8254_v57  ;;  %v8333_v57 = vld [vmem:[#allocation5 + $0x5a8] ss:$24 sps:$4 sm:$0xff]  }
  0xdc   :  { %2023 = vmatpush2.bf16.msra.mxu0 %v8249_v58  ;;  %v8341_v58 = vld [vmem:[#allocation5 + $0x57c] ss:$24 sps:$4 sm:$0xff]  }
  0xdd   :  { %2024 = vmatprep.subr.bf16.mxu0 %v8257_v59  ;;  %2064 = vmatpush2.bf16.msra.mxu1 %v8252_v60  ;;  %v8336_v59 = vld [vmem:[#allocation5 + $0x8a8] ss:$24 sps:$4 sm:$0xff]   ;;  %v8344_v60 = vld [vmem:[#allocation5 + $0x87c] ss:$24 sps:$4 sm:$0xff]  }
  0xde   :  { %2065 = vmatprep.subr.bf16.mxu1 %v8260_v61  ;;  %v8339_v61 = vld [vmem:[#allocation5 + $0x578] ss:$24 sps:$4 sm:$0xff]  }
  0xe0   :  { %2025 = vmatpush2.bf16.msra.mxu0 %v8255_v62  ;;  %v8347_v62 = vld [vmem:[#allocation5 + $0x54c] ss:$24 sps:$4 sm:$0xff]  }
  0xe1   :  { %2026 = vmatprep.subr.bf16.mxu0 %v8263_v63  ;;  %2066 = vmatpush2.bf16.msra.mxu1 %v8258_v0  ;;  %v8342_v63 = vld [vmem:[#allocation5 + $0x878] ss:$24 sps:$4 sm:$0xff]   ;;  %v8350_v0 = vld [vmem:[#allocation5 + $0x84c] ss:$24 sps:$4 sm:$0xff]  }
  0xe2   :  { %2067 = vmatprep.subr.bf16.mxu1 %v8266_v1  ;;  %v8345_v1 = vld [vmem:[#allocation5 + $0x548] ss:$24 sps:$4 sm:$0xff]  }
  0xe4   :  { %2027 = vmatpush2.bf16.msra.mxu0 %v8261_v2  ;;  %v8353_v2 = vld [vmem:[#allocation5 + $0x51c] ss:$24 sps:$4 sm:$0xff]  }
  0xe5   :  { %2028 = vmatprep.subr.bf16.mxu0 %v8269_v3  ;;  %2068 = vmatpush2.bf16.msra.mxu1 %v8264_v4  ;;  %v8348_v3 = vld [vmem:[#allocation5 + $0x848] ss:$24 sps:$4 sm:$0xff]   ;;  %v8356_v4 = vld [vmem:[#allocation5 + $0x81c] ss:$24 sps:$4 sm:$0xff]  }
  0xe6   :  { %2069 = vmatprep.subr.bf16.mxu1 %v8272_v5  ;;  %v8351_v5 = vld [vmem:[#allocation5 + $0x518] ss:$24 sps:$4 sm:$0xff]  }
  0xe8   :  { %2029 = vmatpush2.bf16.msra.mxu0 %v8267_v6  ;;  %v8359_v6 = vld [vmem:[#allocation5 + $0x4ec] ss:$24 sps:$4 sm:$0xff]  }
  0xe9   :  { %2030 = vmatprep.subr.bf16.mxu0 %v8275_v8  ;;  %2070 = vmatpush2.bf16.msra.mxu1 %v8270_v9  ;;  %v8354_v8 = vld [vmem:[#allocation5 + $0x818] ss:$24 sps:$4 sm:$0xff]   ;;  %v8362_v9 = vld [vmem:[#allocation5 + $0x7ec] ss:$24 sps:$4 sm:$0xff]  }
  0xea   :  { %2071 = vmatprep.subr.bf16.mxu1 %v8278_v12  ;;  %v8365_v12 = vld [vmem:[#allocation5 + $0x4bc] ss:$24 sps:$4 sm:$0xff]  }
  0xec   :  { %2031 = vmatpush2.bf16.msra.mxu0 %v8273_v11  ;;  %v8357_v11 = vld [vmem:[#allocation5 + $0x4e8] ss:$24 sps:$4 sm:$0xff]  }
  0xed   :  { %2082 = vmatprep.subr.bf16.mxu0 %v8281_v14  ;;  %2072 = vmatpush2.bf16.msra.mxu1 %v8276_v15  ;;  %v8368_v14 = vld [vmem:[#allocation5 + $0x7bc] ss:$24 sps:$4 sm:$0xff]   ;;  %v8363_v15 = vld [vmem:[#allocation5 + $0x4b8] ss:$24 sps:$4 sm:$0xff]  }
  0xee   :  { %2123 = vmatprep.subr.bf16.mxu1 %v8284_v17  ;;  %v8371_v17 = vld [vmem:[#allocation5 + $0x48c] ss:$24 sps:$4 sm:$0xff]  }
  0xef   :  { %2033 = vmatmul.mubr.bf16.vlgmr.msra.gmra.mxu0 %v9751_v16 }
  0xf0   :  { %2083 = vmatpush1.bf16.msra.mxu0 %v8279_v18  ;;  %2114 = vmatprep.mubr.bf16.mxu0 %v9738_v52  ;;  %v8366_v18 = vld [vmem:[#allocation5 + $0x7b8] ss:$24 sps:$4 sm:$0xff]  }
  0xf1   :  { %2074 = vmatmul.mubr.bf16.vlgmr.msra.gmra.mxu1 %v9741_v7  ;;  %2084 = vmatprep.subr.bf16.mxu0 %v8287_v19  ;;  %v8374_v19 = vld [vmem:[#allocation5 + $0x78c] ss:$24 sps:$4 sm:$0xff]  }
  0xf2   :  { %2124 = vmatpush1.bf16.msra.mxu1 %v8282_v20  ;;  %2155 = vmatprep.mubr.bf16.mxu1 %v9748_v36  ;;  %v8369_v20 = vld [vmem:[#allocation5 + $0x488] ss:$24 sps:$4 sm:$0xff]  }
  0xf3   :  { %2125 = vmatprep.subr.bf16.mxu1 %v8290_v21  ;;  %v8377_v21 = vld [vmem:[#allocation5 + $0x164] ss:$24 sps:$4 sm:$0xff]  }
  0xf4   :  { %2085 = vmatpush1.bf16.msra.mxu0 %v8285_v22  ;;  %v8372_v22 = vld [vmem:[#allocation5 + $0x788] ss:$24 sps:$4 sm:$0xff]  }
  0xf5   :  { %2086 = vmatprep.subr.bf16.mxu0 %v8293_v23  ;;  %v8380_v23 = vld [vmem:[#allocation5 + $0x464] ss:$24 sps:$4 sm:$0xff]  }
  0xf6   :  { %2126 = vmatpush1.bf16.msra.mxu1 %v8288_v24  ;;  %v8375_v24 = vld [vmem:[#allocation5 + $0x160] ss:$24 sps:$4 sm:$0xff]  }
  0xf7   :  { %2127 = vmatprep.subr.bf16.mxu1 %v8296_v25  ;;  %v8383_v25 = vld [vmem:[#allocation5 + $0x134] ss:$24 sps:$4 sm:$0xff]  }
  0xf8   :  { %2087 = vmatpush1.bf16.msra.mxu0 %v8291_v26  ;;  %v8378_v26 = vld [vmem:[#allocation5 + $0x460] ss:$24 sps:$4 sm:$0xff]  }
  0xf9   :  { %2088 = vmatprep.subr.bf16.mxu0 %v8299_v27  ;;  %v8386_v27 = vld [vmem:[#allocation5 + $0x434] ss:$24 sps:$4 sm:$0xff]  }
  0xfa   :  { %2128 = vmatpush1.bf16.msra.mxu1 %v8294_v28  ;;  %v8381_v28 = vld [vmem:[#allocation5 + $0x130] ss:$24 sps:$4 sm:$0xff]  }
  0xfb   :  { %2129 = vmatprep.subr.bf16.mxu1 %v8302_v29  ;;  %v8389_v29 = vld [vmem:[#allocation5 + $0x104] ss:$24 sps:$4 sm:$0xff]  }
  0xfc   :  { %2089 = vmatpush1.bf16.msra.mxu0 %v8297_v30  ;;  %v8384_v30 = vld [vmem:[#allocation5 + $0x430] ss:$24 sps:$4 sm:$0xff]  }
  0xfd   :  { %2090 = vmatprep.subr.bf16.mxu0 %v8305_v31  ;;  %v8392_v31 = vld [vmem:[#allocation5 + $0x404] ss:$24 sps:$4 sm:$0xff]  }
  0xfe   :  { %2130 = vmatpush1.bf16.msra.mxu1 %v8300_v32  ;;  %v8387_v32 = vld [vmem:[#allocation5 + $0x100] ss:$24 sps:$4 sm:$0xff]  }
  0xff   :  { %2131 = vmatprep.subr.bf16.mxu1 %v8308_v33  ;;  %v8395_v33 = vld [vmem:[#allocation5 + $0xd4] ss:$24 sps:$4 sm:$0xff]  }
 0x100   :  { %2091 = vmatpush1.bf16.msra.mxu0 %v8303_v34  ;;  %v8390_v34 = vld [vmem:[#allocation5 + $0x400] ss:$24 sps:$4 sm:$0xff]  }
 0x101   :  { %2092 = vmatprep.subr.bf16.mxu0 %v8311_v35  ;;  %v8398_v35 = vld [vmem:[#allocation5 + $0x3d4] ss:$24 sps:$4 sm:$0xff]  }
 0x102   :  { %2132 = vmatpush1.bf16.msra.mxu1 %v8306_v37  ;;  %v8401_v37 = vld [vmem:[#allocation5 + $0xa4] ss:$24 sps:$4 sm:$0xff]  }
 0x103   :  { %2133 = vmatprep.subr.bf16.mxu1 %v8314_v38  ;;  %v8396_v38 = vld [vmem:[#allocation5 + $0x3d0] ss:$24 sps:$4 sm:$0xff]  }
 0x104   :  { %2093 = vmatpush1.bf16.msra.mxu0 %v8309_v39  ;;  %v8404_v39 = vld [vmem:[#allocation5 + $0x3a4] ss:$24 sps:$4 sm:$0xff]  }
 0x105   :  { %2094 = vmatprep.subr.bf16.mxu0 %v8317_v40  ;;  %v8407_v40 = vld [vmem:[#allocation5 + $0x74] ss:$24 sps:$4 sm:$0xff]  }
 0x106   :  { %2134 = vmatpush1.bf16.msra.mxu1 %v8312_v41  ;;  %v8402_v41 = vld [vmem:[#allocation5 + $0x3a0] ss:$24 sps:$4 sm:$0xff]  }
 0x107   :  { %2135 = vmatprep.subr.bf16.mxu1 %v8320_v42  ;;  %v8410_v42 = vld [vmem:[#allocation5 + $0x374] ss:$24 sps:$4 sm:$0xff]  }
 0x108   :  { %2095 = vmatpush1.bf16.msra.mxu0 %v8315_v43  ;;  %v8405_v43 = vld [vmem:[#allocation5 + $0x70] ss:$24 sps:$4 sm:$0xff]  }
 0x109   :  { %2096 = vmatprep.subr.bf16.mxu0 %v8323_v44  ;;  %v8413_v44 = vld [vmem:[#allocation5 + $0x44] ss:$24 sps:$4 sm:$0xff]  }
 0x10a   :  { %2136 = vmatpush1.bf16.msra.mxu1 %v8318_v45  ;;  %v8408_v45 = vld [vmem:[#allocation5 + $0x370] ss:$24 sps:$4 sm:$0xff]  }
 0x10b   :  { %2137 = vmatprep.subr.bf16.mxu1 %v8326_v46  ;;  %v8416_v46 = vld [vmem:[#allocation5 + $0x344] ss:$24 sps:$4 sm:$0xff]  }
 0x10c   :  { %2097 = vmatpush1.bf16.msra.mxu0 %v8321_v47  ;;  %v8411_v47 = vld [vmem:[#allocation5 + $0x40] ss:$24 sps:$4 sm:$0xff]  }
 0x10d   :  { %2098 = vmatprep.subr.bf16.mxu0 %v8329_v49  ;;  %v8419_v49 = vld [vmem:[#allocation5 + $0x14] ss:$24 sps:$4 sm:$0xff]  }
 0x10e   :  { %2138 = vmatpush1.bf16.msra.mxu1 %v8324_v50  ;;  %v8414_v50 = vld [vmem:[#allocation5 + $0x340] ss:$24 sps:$4 sm:$0xff]  }
 0x10f   :  { %2139 = vmatprep.subr.bf16.mxu1 %v8332_v51  ;;  %v8422_v51 = vld [vmem:[#allocation5 + $0x314] ss:$24 sps:$4 sm:$0xff]  }
 0x110   :  { %2099 = vmatpush2.bf16.msra.mxu0 %v8327_v53  ;;  %v8417_v53 = vld [vmem:[#allocation5 + $0x10] ss:$24 sps:$4 sm:$0xff]  }
 0x111   :  { %2100 = vmatprep.subr.bf16.mxu0 %v8335_v54  ;;  %v8425_v54 = vld [vmem:[#allocation5 + $0x2e4] ss:$24 sps:$4 sm:$0xff]  }
 0x112   :  { %2140 = vmatpush2.bf16.msra.mxu1 %v8330_v55  ;;  %v8420_v55 = vld [vmem:[#allocation5 + $0x310] ss:$24 sps:$4 sm:$0xff]  }
 0x113   :  { %2141 = vmatprep.subr.bf16.mxu1 %v8338_v56  ;;  %v8428_v56 = vld [vmem:[#allocation5 + $0x5e4] ss:$24 sps:$4 sm:$0xff]  }
 0x114   :  { %2101 = vmatpush2.bf16.msra.mxu0 %v8333_v57  ;;  %v8423_v57 = vld [vmem:[#allocation5 + $0x2e0] ss:$24 sps:$4 sm:$0xff]  }
 0x115   :  { %2102 = vmatprep.subr.bf16.mxu0 %v8341_v58  ;;  %v8431_v58 = vld [vmem:[#allocation5 + $0x2b4] ss:$24 sps:$4 sm:$0xff]  }
 0x116   :  { %2142 = vmatpush2.bf16.msra.mxu1 %v8336_v59  ;;  %v8426_v59 = vld [vmem:[#allocation5 + $0x5e0] ss:$24 sps:$4 sm:$0xff]  }
 0x117   :  { %2143 = vmatprep.subr.bf16.mxu1 %v8344_v60  ;;  %v8434_v60 = vld [vmem:[#allocation5 + $0x5b4] ss:$24 sps:$4 sm:$0xff]  }
 0x118   :  { %2103 = vmatpush2.bf16.msra.mxu0 %v8339_v61  ;;  %v8429_v61 = vld [vmem:[#allocation5 + $0x2b0] ss:$24 sps:$4 sm:$0xff]  }
 0x119   :  { %2104 = vmatprep.subr.bf16.mxu0 %v8347_v62  ;;  %v8432_v62 = vld [vmem:[#allocation5 + $0x5b0] ss:$24 sps:$4 sm:$0xff]  }
 0x11a   :  { %2144 = vmatpush2.bf16.msra.mxu1 %v8342_v63  ;;  %v8437_v63 = vld [vmem:[#allocation5 + $0x284] ss:$24 sps:$4 sm:$0xff]  }
 0x11b   :  { %2145 = vmatprep.subr.bf16.mxu1 %v8350_v0  ;;  %v8440_v0 = vld [vmem:[#allocation5 + $0x584] ss:$24 sps:$4 sm:$0xff]  }
 0x11c   :  { %2105 = vmatpush2.bf16.msra.mxu0 %v8345_v1  ;;  %v8435_v1 = vld [vmem:[#allocation5 + $0x280] ss:$24 sps:$4 sm:$0xff]  }
 0x11d   :  { %2106 = vmatprep.subr.bf16.mxu0 %v8353_v2  ;;  %v8438_v2 = vld [vmem:[#allocation5 + $0x580] ss:$24 sps:$4 sm:$0xff]  }
 0x11e   :  { %2146 = vmatpush2.bf16.msra.mxu1 %v8348_v3  ;;  %v8443_v3 = vld [vmem:[#allocation5 + $0x254] ss:$24 sps:$4 sm:$0xff]  }
 0x11f   :  { %2147 = vmatprep.subr.bf16.mxu1 %v8356_v4  ;;  %v8446_v4 = vld [vmem:[#allocation5 + $0x554] ss:$24 sps:$4 sm:$0xff]  }
 0x120   :  { %2107 = vmatpush2.bf16.msra.mxu0 %v8351_v5  ;;  %v8441_v5 = vld [vmem:[#allocation5 + $0x250] ss:$24 sps:$4 sm:$0xff]  }
 0x121   :  { %2108 = vmatprep.subr.bf16.mxu0 %v8359_v6  ;;  %v8444_v6 = vld [vmem:[#allocation5 + $0x550] ss:$24 sps:$4 sm:$0xff]  }
 0x122   :  { %2148 = vmatpush2.bf16.msra.mxu1 %v8354_v8  ;;  %v8449_v8 = vld [vmem:[#allocation5 + $0x224] ss:$24 sps:$4 sm:$0xff]  }
 0x123   :  { %2149 = vmatprep.subr.bf16.mxu1 %v8362_v9  ;;  %v8452_v9 = vld [vmem:[#allocation5 + $0x524] ss:$24 sps:$4 sm:$0xff]  }
 0x124   :  { %2109 = vmatpush2.bf16.msra.mxu0 %v8357_v11  ;;  %v8447_v11 = vld [vmem:[#allocation5 + $0x220] ss:$24 sps:$4 sm:$0xff]  }
 0x125   :  { %2110 = vmatprep.subr.bf16.mxu0 %v8365_v12  ;;  %v8450_v12 = vld [vmem:[#allocation5 + $0x520] ss:$24 sps:$4 sm:$0xff]  }
 0x126   :  { %2150 = vmatpush2.bf16.msra.mxu1 %v8360_v13  ;;  %v8455_v13 = vld [vmem:[#allocation5 + $0x1f4] ss:$24 sps:$4 sm:$0xff]  }
 0x127   :  { %2151 = vmatprep.subr.bf16.mxu1 %v8368_v14  ;;  %v8458_v14 = vld [vmem:[#allocation5 + $0x4f4] ss:$24 sps:$4 sm:$0xff]  }
 0x128   :  { %2111 = vmatpush2.bf16.msra.mxu0 %v8363_v15  ;;  %v8453_v15 = vld [vmem:[#allocation5 + $0x1f0] ss:$24 sps:$4 sm:$0xff]  }
 0x129   :  { %2112 = vmatprep.subr.bf16.mxu0 %v8371_v17  ;;  %v8456_v17 = vld [vmem:[#allocation5 + $0x4f0] ss:$24 sps:$4 sm:$0xff]  }
 0x12a   :  { %2152 = vmatpush2.bf16.msra.mxu1 %v8366_v18  ;;  %v8461_v18 = vld [vmem:[#allocation5 + $0x1c4] ss:$24 sps:$4 sm:$0xff]  }
 0x12b   :  { %2153 = vmatprep.subr.bf16.mxu1 %v8374_v19  ;;  %v8464_v19 = vld [vmem:[#allocation5 + $0x4c4] ss:$24 sps:$4 sm:$0xff]  }
 0x12c   :  { %2113 = vmatpush2.bf16.msra.mxu0 %v8369_v20  ;;  %v8459_v20 = vld [vmem:[#allocation5 + $0x1c0] ss:$24 sps:$4 sm:$0xff]  }
 0x12d   :  { %2164 = vmatprep.subr.bf16.mxu0 %v8377_v21  ;;  %v8467_v21 = vld [vmem:[#allocation5 + $0x194] ss:$24 sps:$4 sm:$0xff]  }
 0x12e   :  { %2154 = vmatpush2.bf16.msra.mxu1 %v8372_v22  ;;  %v8462_v22 = vld [vmem:[#allocation5 + $0x4c0] ss:$24 sps:$4 sm:$0xff]  }
 0x12f   :  { %2115 = vmatmul.mubr.bf16.vlgmr.msra.gmra.mxu0 %v9743_v10  ;;  %2205 = vmatprep.subr.bf16.mxu1 %v8380_v23  ;;  %v8470_v23 = vld [vmem:[#allocation5 + $0x494] ss:$24 sps:$4 sm:$0xff]  }
 0x130   :  { %2165 = vmatpush1.bf16.msra.mxu0 %v8375_v24  ;;  %2196 = vmatprep.mubr.bf16.mxu0 %v9735_v48  ;;  %v8393_v48 = vld [vmem:[#allocation5 + $0xd0] ss:$24 sps:$4 sm:$0xff]  }
 0x131   :  { %2156 = vmatmul.mubr.bf16.vlgmr.msra.gmra.mxu1 %v9751_v16  ;;  %2166 = vmatprep.subr.bf16.mxu0 %v8383_v25  ;;  %v8465_v24 = vld [vmem:[#allocation5 + $0x190] ss:$24 sps:$4 sm:$0xff]   ;;  %v8473_v25 = vld [vmem:[#allocation5 + $0x764] ss:$24 sps:$4 sm:$0xff]  }
 0x132   :  { %2206 = vmatpush1.bf16.msra.mxu1 %v8378_v26  ;;  %2237 = vmatprep.mubr.bf16.mxu1 %v9738_v52  ;;  %v8399_v52 = vld [vmem:[#allocation5 + $0xa0] ss:$24 sps:$4 sm:$0xff]   ;;  %v8468_v26 = vld [vmem:[#allocation5 + $0x490] ss:$24 sps:$4 sm:$0xff]  }
 0x133   :  { %2207 = vmatprep.subr.bf16.mxu1 %v8386_v27  ;;  %v8482_v27 = vld [vmem:[#allocation8 + $0x154] ss:$24 sps:$4 sm:$0xff]  }
 0x134   :  { %2167 = vmatpush1.bf16.msra.mxu0 %v8381_v28  ;;  %v8471_v28 = vld [vmem:[#allocation5 + $0x760] ss:$24 sps:$4 sm:$0xff]  }
 0x135   :  { %2168 = vmatprep.subr.bf16.mxu0 %v8389_v29  ;;  %v8476_v29 = vld [vmem:[#allocation5 + $0x734] ss:$24 sps:$4 sm:$0xff]  }
 0x136   :  { %2208 = vmatpush1.bf16.msra.mxu1 %v8384_v30  ;;  %v8474_v30 = vld [vmem:[#allocation5 + $0x730] ss:$24 sps:$4 sm:$0xff]  }
 0x137   :  { %2209 = vmatprep.subr.bf16.mxu1 %v8392_v31  ;;  %v8480_v31 = vld [vmem:[#allocation8 + $0x150] ss:$24 sps:$4 sm:$0xff]  }
 0x138   :  { %2169 = vmatpush1.bf16.msra.mxu0 %v8387_v32 }
 0x139   :  { %2170 = vmatprep.subr.bf16.mxu0 %v8395_v33  ;;  %v8479_v33 = vld [vmem:[#allocation5 + $0x704] ss:$24 sps:$4 sm:$0xff]  }
 0x13a   :  { %2210 = vmatpush1.bf16.msra.mxu1 %v8390_v34  ;;  %v8488_v34 = vld [vmem:[#allocation8 + $0x124] ss:$24 sps:$4 sm:$0xff]  }
 0x13b   :  { %2211 = vmatprep.subr.bf16.mxu1 %v8398_v35 }
 0x13c   :  { %2171 = vmatpush1.bf16.msra.mxu0 %v8393_v48 }
 0x13d   :  { %2172 = vmatprep.subr.bf16.mxu0 %v8401_v37  ;;  %v8477_v37 = vld [vmem:[#allocation5 + $0x700] ss:$24 sps:$4 sm:$0xff]  }
 0x13e   :  { %2212 = vmatpush1.bf16.msra.mxu1 %v8396_v38  ;;  %v8486_v38 = vld [vmem:[#allocation8 + $0x120] ss:$24 sps:$4 sm:$0xff]  }
 0x13f   :  { %2213 = vmatprep.subr.bf16.mxu1 %v8404_v39 }
 0x140   :  { %2173 = vmatpush1.bf16.msra.mxu0 %v8399_v52 }
 0x141   :  { %2174 = vmatprep.subr.bf16.mxu0 %v8407_v40  ;;  %v8494_v40 = vld [vmem:[#allocation8 + $0xf4] ss:$24 sps:$4 sm:$0xff]  }
 0x142   :  { %2214 = vmatpush1.bf16.msra.mxu1 %v8402_v41 }
 0x143   :  { %2215 = vmatprep.subr.bf16.mxu1 %v8410_v42  ;;  %v8483_v42 = vld [vmem:[#allocation5 + $0x6d0] ss:$24 sps:$4 sm:$0xff]  }
 0x144   :  { %2175 = vmatpush1.bf16.msra.mxu0 %v8405_v43  ;;  %v8492_v43 = vld [vmem:[#allocation8 + $0xf0] ss:$24 sps:$4 sm:$0xff]  }
 0x145   :  { %2176 = vmatprep.subr.bf16.mxu0 %v8413_v44  ;;  %v8491_v44 = vld [vmem:[#allocation5 + $0x6a4] ss:$24 sps:$4 sm:$0xff]  }
 0x146   :  { %2216 = vmatpush1.bf16.msra.mxu1 %v8408_v45 }
 0x147   :  { %2217 = vmatprep.subr.bf16.mxu1 %v8416_v46  ;;  %v8489_v46 = vld [vmem:[#allocation5 + $0x6a0] ss:$24 sps:$4 sm:$0xff]  }
 0x148   :  { %2177 = vmatpush1.bf16.msra.mxu0 %v8411_v47  ;;  %v8498_v47 = vld [vmem:[#allocation8 + $0xc0] ss:$24 sps:$4 sm:$0xff]  }
 0x149   :  { %2178 = vmatprep.subr.bf16.mxu0 %v8419_v49  ;;  %v8506_v49 = vld [vmem:[#allocation8 + $0x94] ss:$24 sps:$4 sm:$0xff]  }
 0x14a   :  { %2218 = vmatpush1.bf16.msra.mxu1 %v8414_v50  ;;  %v8497_v50 = vld [vmem:[#allocation5 + $0x674] ss:$24 sps:$4 sm:$0xff]  }
 0x14b   :  { %2219 = vmatprep.subr.bf16.mxu1 %v8422_v51  ;;  %v8495_v51 = vld [vmem:[#allocation5 + $0x670] ss:$24 sps:$4 sm:$0xff]  }
 0x14c   :  { %2179 = vmatpush1.bf16.msra.mxu0 %v8417_v53  ;;  %v8504_v53 = vld [vmem:[#allocation8 + $0x90] ss:$24 sps:$4 sm:$0xff]  }
 0x14d   :  { %2180 = vmatprep.subr.bf16.mxu0 %v8425_v54  ;;  %v8512_v54 = vld [vmem:[#allocation8 + $0x64] ss:$24 sps:$4 sm:$0xff]  }
 0x14e   :  { %2220 = vmatpush1.bf16.msra.mxu1 %v8420_v55  ;;  %v8503_v55 = vld [vmem:[#allocation5 + $0x644] ss:$24 sps:$4 sm:$0xff]  }
 0x14f   :  { %2221 = vmatprep.subr.bf16.mxu1 %v8428_v56  ;;  %v8501_v56 = vld [vmem:[#allocation5 + $0x640] ss:$24 sps:$4 sm:$0xff]  }
 0x150   :  { %2181 = vmatpush2.bf16.msra.mxu0 %v8423_v57  ;;  %v8510_v57 = vld [vmem:[#allocation8 + $0x60] ss:$24 sps:$4 sm:$0xff]  }
 0x151   :  { %2182 = vmatprep.subr.bf16.mxu0 %v8431_v58  ;;  %v8518_v58 = vld [vmem:[#allocation8 + $0x34] ss:$24 sps:$4 sm:$0xff]  }
 0x152   :  { %2222 = vmatpush2.bf16.msra.mxu1 %v8426_v59  ;;  %v8509_v59 = vld [vmem:[#allocation5 + $0x614] ss:$24 sps:$4 sm:$0xff]  }
 0x153   :  { %2223 = vmatprep.subr.bf16.mxu1 %v8434_v60  ;;  %v8507_v60 = vld [vmem:[#allocation5 + $0x610] ss:$24 sps:$4 sm:$0xff]  }
 0x154   :  { %2183 = vmatpush2.bf16.msra.mxu0 %v8429_v61  ;;  %v8516_v61 = vld [vmem:[#allocation8 + $0x30] ss:$24 sps:$4 sm:$0xff]  }
 0x155   :  { %2184 = vmatprep.subr.bf16.mxu0 %v8437_v63  ;;  %v8515_v63 = vld [vmem:[#allocation5 + $0x8e4] ss:$24 sps:$4 sm:$0xff]  }
 0x156   :  { %2224 = vmatpush2.bf16.msra.mxu1 %v8432_v62  ;;  %v8524_v62 = vld [vmem:[#allocation8 + $0x4] ss:$24 sps:$4 sm:$0xff]  }
 0x157   :  { %2225 = vmatprep.subr.bf16.mxu1 %v8440_v0  ;;  %v8513_v0 = vld [vmem:[#allocation5 + $0x8e0] ss:$24 sps:$4 sm:$0xff]  }
 0x158   :  { %2185 = vmatpush2.bf16.msra.mxu0 %v8435_v1  ;;  %v8522_v1 = vld [vmem:[#allocation8] ss:$24 sps:$4 sm:$0xff]  }
 0x159   :  { %2186 = vmatprep.subr.bf16.mxu0 %v8443_v3  ;;  %v8521_v3 = vld [vmem:[#allocation5 + $0x8b4] ss:$24 sps:$4 sm:$0xff]  }
 0x15a   :  { %2226 = vmatpush2.bf16.msra.mxu1 %v8438_v2  ;;  %v8530_v2 = vld [vmem:[#allocation8 + $0x2d4] ss:$24 sps:$4 sm:$0xff]  }
 0x15b   :  { %2227 = vmatprep.subr.bf16.mxu1 %v8446_v4  ;;  %v8519_v4 = vld [vmem:[#allocation5 + $0x8b0] ss:$24 sps:$4 sm:$0xff]  }
 0x15c   :  { %2187 = vmatpush2.bf16.msra.mxu0 %v8441_v5  ;;  %v8528_v5 = vld [vmem:[#allocation8 + $0x2d0] ss:$24 sps:$4 sm:$0xff]  }
 0x15d   :  { %2188 = vmatprep.subr.bf16.mxu0 %v8449_v8  ;;  %v8527_v8 = vld [vmem:[#allocation5 + $0x884] ss:$24 sps:$4 sm:$0xff]  }
 0x15e   :  { %2228 = vmatpush2.bf16.msra.mxu1 %v8444_v6  ;;  %v8536_v6 = vld [vmem:[#allocation8 + $0x2a4] ss:$24 sps:$4 sm:$0xff]  }
 0x15f   :  { %2229 = vmatprep.subr.bf16.mxu1 %v8452_v9  ;;  %v8525_v9 = vld [vmem:[#allocation5 + $0x880] ss:$24 sps:$4 sm:$0xff]  }
 0x160   :  { %2189 = vmatpush2.bf16.msra.mxu0 %v8447_v11  ;;  %v8534_v11 = vld [vmem:[#allocation8 + $0x2a0] ss:$24 sps:$4 sm:$0xff]  }
 0x161   :  { %2190 = vmatprep.subr.bf16.mxu0 %v8455_v13  ;;  %v8533_v13 = vld [vmem:[#allocation5 + $0x854] ss:$24 sps:$4 sm:$0xff]  }
 0x162   :  { %2230 = vmatpush2.bf16.msra.mxu1 %v8450_v12  ;;  %v8542_v12 = vld [vmem:[#allocation8 + $0x274] ss:$24 sps:$4 sm:$0xff]  }
 0x163   :  { %2231 = vmatprep.subr.bf16.mxu1 %v8458_v14  ;;  %v8531_v14 = vld [vmem:[#allocation5 + $0x850] ss:$24 sps:$4 sm:$0xff]  }
 0x164   :  { %2191 = vmatpush2.bf16.msra.mxu0 %v8453_v15  ;;  %v8540_v15 = vld [vmem:[#allocation8 + $0x270] ss:$24 sps:$4 sm:$0xff]  }
 0x165   :  { %2192 = vmatprep.subr.bf16.mxu0 %v8461_v18  ;;  %v8539_v18 = vld [vmem:[#allocation5 + $0x824] ss:$24 sps:$4 sm:$0xff]  }
 0x166   :  { %2232 = vmatpush2.bf16.msra.mxu1 %v8456_v17  ;;  %v8548_v17 = vld [vmem:[#allocation8 + $0x244] ss:$24 sps:$4 sm:$0xff]  }
 0x167   :  { %2233 = vmatprep.subr.bf16.mxu1 %v8464_v19  ;;  %v8537_v19 = vld [vmem:[#allocation5 + $0x820] ss:$24 sps:$4 sm:$0xff]  }
 0x168   :  { %2193 = vmatpush2.bf16.msra.mxu0 %v8459_v20  ;;  %v8546_v20 = vld [vmem:[#allocation8 + $0x240] ss:$24 sps:$4 sm:$0xff]  }
 0x169   :  { %2194 = vmatprep.subr.bf16.mxu0 %v8467_v21  ;;  %v8554_v21 = vld [vmem:[#allocation8 + $0x214] ss:$24 sps:$4 sm:$0xff]  }
 0x16a   :  { %2234 = vmatpush2.bf16.msra.mxu1 %v8462_v22  ;;  %v448_v22 = vlaneseq }
 0x16b   :  { %2235 = vmatprep.subr.bf16.mxu1 %v8470_v23  ;;  %v8545_v23 = vld [vmem:[#allocation5 + $0x7f4] ss:$24 sps:$4 sm:$0xff]  }
 0x16c   :  { %2195 = vmatpush2.bf16.msra.mxu0 %v8465_v24  ;;  %v8543_v24 = vld [vmem:[#allocation5 + $0x7f0] ss:$24 sps:$4 sm:$0xff]  }
 0x16d   :  { %2246 = vmatprep.subr.bf16.mxu0 %v8473_v25  ;;  %v8552_v25 = vld [vmem:[#allocation8 + $0x210] ss:$24 sps:$4 sm:$0xff]  }
 0x16e   :  { %2236 = vmatpush2.bf16.msra.mxu1 %v8468_v26  ;;  %v8560_v26 = vld [vmem:[#allocation8 + $0x1e4] ss:$24 sps:$4 sm:$0xff]  }
 0x16f   :  { %v9761_v32 = vpop.f32.mrf.mxu0  ;;  %2197 = vmatmul.mubr.bf16.vlgmr.msra.gmra.mxu0 %v9741_v7  ;;  %4053 = vmatprep.subr.bf16.mxu1 %v8482_v27  ;;  %v8485_v7 = vld [vmem:[#allocation5 + $0x6d4] ss:$24 sps:$4 sm:$0xff]   ;;  %v9772_v27 = vshrl.u32 %v448_v22, 7 }
 0x170   :  { %2247 = vmatpush1.bf16.msra.mxu0 %v8471_v28  ;;  %2278 = vmatprep.mubr.bf16.mxu0 %v9748_v36  ;;  %v9767_v48 = vpop.f32.mrf.mxu1  ;;  %v8551_v28 = vld [vmem:[#allocation5 + $0x7c4] ss:$24 sps:$4 sm:$0xff]   ;;  %v8591_v22 = vld [vmem:[#allocation8 + $0x5d0] ss:$24 sps:$4 sm:$0xff]  }
 0x171   :  { %v9765_v35 = vpop.f32.mrf.mxu0  ;;  %2238 = vmatmul.mubr.bf16.vlgmr.msra.gmra.mxu1 %v9743_v10  ;;  %2248 = vmatprep.subr.bf16.mxu0 %v8476_v29  ;;  %v8500_v10 = vld [vmem:[#allocation8 + $0xc4] ss:$24 sps:$4 sm:$0xff]  }
 0x172   :  { %4054 = vmatpush1.bf16.msra.mxu1 %v8480_v31  ;;  %v9770_v52 = vpop.f32.mrf.mxu1  ;;  %v9774_v29 = vld [vmem:[#allocation7] sm:$0x3f] }
 0x173   :  { %v1956_v39 = vpop.f32.mrf.mxu0  ;;  %4055 = vmatprep.subr.bf16.mxu1 %v8488_v34  ;;  %v8558_v31 = vld [vmem:[#allocation8 + $0x1e0] ss:$24 sps:$4 sm:$0xff]   ;;  %v9777_v34 = vsub.s32 0, %v9772_v27 }
 0x174   :  { %2249 = vmatpush1.bf16.msra.mxu0 %v8474_v30  ;;  %v1997_v36 = vpop.f32.mrf.mxu1  ;;  %v8549_v30 = vld [vmem:[#allocation5 + $0x7c0] ss:$24 sps:$4 sm:$0xff]   ;;  %v8555_v39 = vld [vmem:[#allocation5 + $0x790] ss:$24 sps:$4 sm:$0xff]  }
 0x175   :  { %v1957_v41 = vpop.f32.mrf.mxu0  ;;  %2250 = vmatprep.subr.bf16.mxu0 %v8479_v33  ;;  %v8563_v33 = vld [vmem:[#allocation8 + $0x1b4] ss:$24 sps:$4 sm:$0xff]  }
 0x176   :  { %4056 = vmatpush1.bf16.msra.mxu1 %v8486_v38  ;;  %v1998_v45 = vpop.f32.mrf.mxu1  ;;  %v9780_v38 = vsub.s32 1, %v9772_v27  ;;  %v451_v41 = vrot.slane %v9774_v29, %v9777_v34  ;;  %v8569_v36 = vld [vmem:[#allocation8 + $0x454] ss:$24 sps:$4 sm:$0xff]  }
 0x177   :  { %4057 = vmatprep.subr.bf16.mxu1 %v8494_v40  ;;  %v8566_v40 = vld [vmem:[#allocation8 + $0x184] ss:$24 sps:$4 sm:$0xff]  }
 0x178   :  { %2251 = vmatpush1.bf16.msra.mxu0 %v8477_v37  ;;  %v8557_v37 = vld [vmem:[#allocation5 + $0x794] ss:$24 sps:$4 sm:$0xff]  }
 0x179   :  { %2252 = vmatprep.subr.bf16.mxu0 %v8485_v7  ;;  %v8561_v7 = vld [vmem:[#allocation8 + $0x1b0] ss:$24 sps:$4 sm:$0xff]   ;;  %v8572_v45 = vld [vmem:[#allocation8 + $0x424] ss:$24 sps:$4 sm:$0xff]  }
 0x17a   :  { %4058 = vmatpush1.bf16.msra.mxu1 %v8492_v43  ;;  %v8564_v43 = vld [vmem:[#allocation8 + $0x180] ss:$24 sps:$4 sm:$0xff]  }
 0x17b   :  { %4059 = vmatprep.subr.bf16.mxu1 %v8500_v10  ;;  %v1953_v10 = vadd.f32 %v9761_v32, %v451_v41  ;;  %v8711_v41 = vld [vmem:[#allocation8 + $0x8d0] ss:$24 sps:$4 sm:$0xff]  }
 0x17c   :  { %2253 = vmatpush1.bf16.msra.mxu0 %v8483_v42  ;;  %v455_v42 = vrot.slane %v9774_v29, %v9780_v38 }
 0x17d   :  { %2254 = vmatprep.subr.bf16.mxu0 %v8491_v44  ;;  %v8567_v44 = vld [vmem:[#allocation8 + $0x450] ss:$24 sps:$4 sm:$0xff]  }
 0x17e   :  { %4060 = vmatpush1.bf16.msra.mxu1 %v8498_v47  ;;  %v1994_v47 = vadd.f32 %v9767_v48, %v1953_v10  ;;  %v8578_v48 = vld [vmem:[#allocation8 + $0x3c4] ss:$24 sps:$4 sm:$0xff]  }
 0x17f   :  { %4061 = vmatprep.subr.bf16.mxu1 %v8506_v49  ;;  %v8608_v10 = vld [vmem:[#allocation8 + $0x4e4] ss:$24 sps:$4 sm:$0xff]  }
 0x180   :  { %2255 = vmatpush1.bf16.msra.mxu0 %v8489_v46  ;;  %v1955_v46 = vadd.f32 %v9765_v35, %v455_v42  ;;  %v8719_v42 = vld [vmem:[#allocation8 + $0x8a4] ss:$24 sps:$4 sm:$0xff]  }
 0x181   :  { %2256 = vmatprep.subr.bf16.mxu0 %v8497_v50  ;;  %v8570_v50 = vld [vmem:[#allocation8 + $0x420] ss:$24 sps:$4 sm:$0xff]  }
 0x182   :  { %4062 = vmatpush1.bf16.msra.mxu1 %v8504_v53  ;;  %v8575_v53 = vld [vmem:[#allocation8 + $0x3f4] ss:$24 sps:$4 sm:$0xff]  }
 0x183   :  { %4063 = vmatprep.subr.bf16.mxu1 %v8512_v54 }
 0x184   :  { %2257 = vmatpush1.bf16.msra.mxu0 %v8495_v51  ;;  %v1996_v51 = vadd.f32 %v9770_v52, %v1955_v46  ;;  %v8606_v46 = vld [vmem:[#allocation8 + $0x4e0] ss:$24 sps:$4 sm:$0xff]  }
 0x185   :  { %2258 = vmatprep.subr.bf16.mxu0 %v8503_v55 }
 0x186   :  { %4064 = vmatpush1.bf16.msra.mxu1 %v8510_v57  ;;  %v8573_v57 = vld [vmem:[#allocation8 + $0x3f0] ss:$24 sps:$4 sm:$0xff]  }
 0x187   :  { %4065 = vmatprep.subr.bf16.mxu1 %v8518_v58 }
 0x188   :  { %2259 = vmatpush1.bf16.msra.mxu0 %v8501_v56 }
 0x189   :  { %2260 = vmatprep.subr.bf16.mxu0 %v8509_v59 }
 0x18a   :  { %4066 = vmatpush1.bf16.msra.mxu1 %v8516_v61  ;;  %v8665_v61 = vld [vmem:[#allocation8 + $0x754] ss:$24 sps:$4 sm:$0xff]  }
 0x18b   :  { %4067 = vmatprep.subr.bf16.mxu1 %v8524_v62  ;;  %v8663_v62 = vld [vmem:[#allocation8 + $0x750] ss:$24 sps:$4 sm:$0xff]  }
 0x18c   :  { %2261 = vmatpush1.bf16.msra.mxu0 %v8507_v60 }
 0x18d   :  { %2262 = vmatprep.subr.bf16.mxu0 %v8515_v63  ;;  %v8576_v63 = vld [vmem:[#allocation8 + $0x3c0] ss:$24 sps:$4 sm:$0xff]  }
 0x18e   :  { %4068 = vmatpush1.bf16.msra.mxu1 %v8522_v1  ;;  %v8581_v1 = vld [vmem:[#allocation8 + $0x394] ss:$24 sps:$4 sm:$0xff]  }
 0x18f   :  { %4069 = vmatprep.subr.bf16.mxu1 %v8530_v2  ;;  %v8671_v2 = vld [vmem:[#allocation8 + $0x724] ss:$24 sps:$4 sm:$0xff]  }
 0x190   :  { %2263 = vmatpush2.bf16.msra.mxu0 %v8513_v0 }
 0x191   :  { %2264 = vmatprep.subr.bf16.mxu0 %v8521_v3  ;;  %v8579_v3 = vld [vmem:[#allocation8 + $0x390] ss:$24 sps:$4 sm:$0xff]  }
 0x192   :  { %4070 = vmatpush2.bf16.msra.mxu1 %v8528_v5  ;;  %v8584_v5 = vld [vmem:[#allocation8 + $0x364] ss:$24 sps:$4 sm:$0xff]  }
 0x193   :  { %4071 = vmatprep.subr.bf16.mxu1 %v8536_v6  ;;  %v8677_v6 = vld [vmem:[#allocation8 + $0x6f4] ss:$24 sps:$4 sm:$0xff]  }
 0x194   :  { %2265 = vmatpush2.bf16.msra.mxu0 %v8519_v4  ;;  %v8669_v4 = vld [vmem:[#allocation8 + $0x720] ss:$24 sps:$4 sm:$0xff]  }
 0x195   :  { %2266 = vmatprep.subr.bf16.mxu0 %v8527_v8  ;;  %v8582_v8 = vld [vmem:[#allocation8 + $0x360] ss:$24 sps:$4 sm:$0xff]  }
 0x196   :  { %4072 = vmatpush2.bf16.msra.mxu1 %v8534_v11  ;;  %v8587_v11 = vld [vmem:[#allocation8 + $0x334] ss:$24 sps:$4 sm:$0xff]  }
 0x197   :  { %4073 = vmatprep.subr.bf16.mxu1 %v8542_v12  ;;  %v8683_v12 = vld [vmem:[#allocation8 + $0x6c4] ss:$24 sps:$4 sm:$0xff]  }
 0x198   :  { %2267 = vmatpush2.bf16.msra.mxu0 %v8525_v9  ;;  %v8675_v9 = vld [vmem:[#allocation8 + $0x6f0] ss:$24 sps:$4 sm:$0xff]  }
 0x199   :  { %2268 = vmatprep.subr.bf16.mxu0 %v8533_v13  ;;  %v8585_v13 = vld [vmem:[#allocation8 + $0x330] ss:$24 sps:$4 sm:$0xff]  }
 0x19a   :  { %4074 = vmatpush2.bf16.msra.mxu1 %v8540_v15  ;;  %v8590_v15 = vld [vmem:[#allocation8 + $0x304] ss:$24 sps:$4 sm:$0xff]  }
 0x19b   :  { %4075 = vmatprep.subr.bf16.mxu1 %v8548_v17  ;;  %v8689_v17 = vld [vmem:[#allocation8 + $0x694] ss:$24 sps:$4 sm:$0xff]  }
 0x19c   :  { %2269 = vmatpush2.bf16.msra.mxu0 %v8531_v14  ;;  %v8681_v14 = vld [vmem:[#allocation8 + $0x6c0] ss:$24 sps:$4 sm:$0xff]  }
 0x19d   :  { %2270 = vmatprep.subr.bf16.mxu0 %v8539_v18  ;;  %v8588_v18 = vld [vmem:[#allocation8 + $0x300] ss:$24 sps:$4 sm:$0xff]  }
 0x19e   :  { %4076 = vmatpush2.bf16.msra.mxu1 %v8546_v20  ;;  %v8593_v20 = vld [vmem:[#allocation8 + $0x5d4] ss:$24 sps:$4 sm:$0xff]  }
 0x19f   :  { %4077 = vmatprep.subr.bf16.mxu1 %v8554_v21  ;;  %v8695_v21 = vld [vmem:[#allocation8 + $0x664] ss:$24 sps:$4 sm:$0xff]  }
 0x1a0   :  { %2271 = vmatpush2.bf16.msra.mxu0 %v8537_v19  ;;  %v8687_v19 = vld [vmem:[#allocation8 + $0x690] ss:$24 sps:$4 sm:$0xff]  }
 0x1a1   :  { %2272 = vmatprep.subr.bf16.mxu0 %v8545_v23  ;;  %v8693_v23 = vld [vmem:[#allocation8 + $0x660] ss:$24 sps:$4 sm:$0xff]  }
 0x1a2   :  { %4078 = vmatpush2.bf16.msra.mxu1 %v8552_v25  ;;  %v8701_v25 = vld [vmem:[#allocation8 + $0x634] ss:$24 sps:$4 sm:$0xff]  }
 0x1a3   :  { %4079 = vmatprep.subr.bf16.mxu1 %v8560_v26  ;;  %v8594_v26 = vld [vmem:[#allocation8 + $0x5a0] ss:$24 sps:$4 sm:$0xff]  }
 0x1a4   :  { %2273 = vmatpush2.bf16.msra.mxu0 %v8543_v24  ;;  %v8596_v24 = vld [vmem:[#allocation8 + $0x5a4] ss:$24 sps:$4 sm:$0xff]  }
 0x1a5   :  { %2274 = vmatprep.subr.bf16.mxu0 %v8551_v28  ;;  %v8699_v28 = vld [vmem:[#allocation8 + $0x630] ss:$24 sps:$4 sm:$0xff]  }
 0x1a6   :  { %4080 = vmatpush2.bf16.msra.mxu1 %v8558_v31  ;;  %v8707_v31 = vld [vmem:[#allocation8 + $0x604] ss:$24 sps:$4 sm:$0xff]  }
 0x1a7   :  { %4081 = vmatprep.subr.bf16.mxu1 %v8563_v33  ;;  %v8597_v33 = vld [vmem:[#allocation8 + $0x570] ss:$24 sps:$4 sm:$0xff]  }
 0x1a8   :  { %2275 = vmatpush2.bf16.msra.mxu0 %v8549_v30  ;;  %v8599_v30 = vld [vmem:[#allocation8 + $0x574] ss:$24 sps:$4 sm:$0xff]  }
 0x1a9   :  { %2276 = vmatprep.subr.bf16.mxu0 %v8557_v37  ;;  %v8705_v37 = vld [vmem:[#allocation8 + $0x600] ss:$24 sps:$4 sm:$0xff]  }
 0x1aa   :  { %4082 = vmatpush2.bf16.msra.mxu1 %v8561_v7  ;;  %v8713_v7 = vld [vmem:[#allocation8 + $0x8d4] ss:$24 sps:$4 sm:$0xff]  }
 0x1ab   :  { %4083 = vmatprep.subr.bf16.mxu1 %v8566_v40  ;;  %v8600_v40 = vld [vmem:[#allocation8 + $0x540] ss:$24 sps:$4 sm:$0xff]  }
 0x1ac   :  { %2277 = vmatpush2.bf16.msra.mxu0 %v8555_v39  ;;  %v8602_v39 = vld [vmem:[#allocation8 + $0x544] ss:$24 sps:$4 sm:$0xff]  }
 0x1ad   :  { %4094 = vmatprep.subr.bf16.mxu0 %v8569_v36  ;;  %v8605_v36 = vld [vmem:[#allocation8 + $0x514] ss:$24 sps:$4 sm:$0xff]  }
 0x1ae   :  { %4084 = vmatpush2.bf16.msra.mxu1 %v8564_v43  ;;  %v8603_v43 = vld [vmem:[#allocation8 + $0x510] ss:$24 sps:$4 sm:$0xff]  }
 0x1af   :  { %v2034_v49 = vpop.f32.mrf.mxu0  ;;  %2279 = vmatmul.mubr.bf16.vlgmr.msra.gmra.mxu0 %v9751_v16  ;;  %4135 = vmatprep.subr.bf16.mxu1 %v8665_v61  ;;  %v8743_v61 = vld [vmem:[#allocation8 + $0x7e4] ss:$24 sps:$4 sm:$0xff]  }
 0x1b0   :  { %4095 = vmatpush1.bf16.msra.mxu0 %v8567_v44  ;;  %v2035_v54 = vadd.f32 %v2034_v49, %v1994_v47  ;;  %v8717_v44 = vld [vmem:[#allocation8 + $0x8a0] ss:$24 sps:$4 sm:$0xff]   ;;  %v8723_v47 = vld [vmem:[#allocation8 + $0x870] ss:$24 sps:$4 sm:$0xff]   ;;  %v8611_v49 = vld [vmem:[#allocation8 + $0x4b4] ss:$24 sps:$4 sm:$0xff]  }
 0x1b1   :  { %v2036_v55 = vpop.f32.mrf.mxu0  ;;  %4096 = vmatprep.subr.bf16.mxu0 %v8572_v45  ;;  %v9791_v32 = vpop.f32.mrf.mxu1  ;;  %v8725_v45 = vld [vmem:[#allocation8 + $0x874] ss:$24 sps:$4 sm:$0xff]  }
 0x1b2   :  { %v2037_v56 = vadd.f32 %v2036_v55, %v1996_v51  ;;  %v9797_v16 = vpack.c.bf16 %v2035_v54, %v2035_v54  ;;  %v8609_v51 = vld [vmem:[#allocation8 + $0x4b0] ss:$24 sps:$4 sm:$0xff]   ;;  %v8614_v54 = vld [vmem:[#allocation8 + $0x484] ss:$24 sps:$4 sm:$0xff]   ;;  %v9802_v55 = vsub.s32 2, %v9772_v27 }
 0x1b3   :  { %v2038_v35 = vpop.f32.mrf.mxu0  ;;  %v9793_v58 = vpop.f32.mrf.mxu1 }
 0x1b4   :  { %v9795_v59 = vpack.c.bf16 %v2037_v56, %v2037_v56  ;;  %4097 = vmatpush1.bf16.msra.mxu0 %v8570_v50  ;;  %v8731_v50 = vld [vmem:[#allocation8 + $0x844] ss:$24 sps:$4 sm:$0xff]   ;;  %v8737_v56 = vld [vmem:[#allocation8 + $0x814] ss:$24 sps:$4 sm:$0xff]   ;;  %v9805_v35 = vsub.s32 3, %v9772_v27 }
 0x1b5   :  { %v2039_v60 = vpop.f32.mrf.mxu0  ;;  %4098 = vmatprep.subr.bf16.mxu0 %v8575_v53  ;;  %v2079_v52 = vpop.f32.mrf.mxu1  ;;  %v8729_v53 = vld [vmem:[#allocation8 + $0x840] ss:$24 sps:$4 sm:$0xff]  }
 0x1b6   :  { %4085 = vmatprep.mubr.bf16.mxu1 %v9795_v59  ;;  %v8617_v60 = vld [vmem:[#allocation8 + $0x15c] ss:$24 sps:$4 sm:$0xff]   ;;  %v459_v52 = vrot.slane %v9774_v29, %v9802_v55 }
 0x1b7   :  { %4086 = vmatmul.mubr.bf16.vlgmr.msra.gmra.mxu1 %v9797_v16  ;;  %v2080_v0 = vpop.f32.mrf.mxu1 }
 0x1b8   :  { %4099 = vmatpush1.bf16.msra.mxu0 %v8573_v57  ;;  %4136 = vmatpush1.bf16.msra.mxu1 %v8663_v62  ;;  %v8612_v57 = vld [vmem:[#allocation8 + $0x480] ss:$24 sps:$4 sm:$0xff]   ;;  %v463_v62 = vrot.slane %v9774_v29, %v9805_v35  ;;  %v2076_v0 = vadd.f32 %v9791_v32, %v459_v52 }
 0x1b9   :  { %4100 = vmatprep.subr.bf16.mxu0 %v8578_v48  ;;  %4137 = vmatprep.subr.bf16.mxu1 %v8671_v2  ;;  %v8735_v48 = vld [vmem:[#allocation8 + $0x810] ss:$24 sps:$4 sm:$0xff]   ;;  %v8753_v29 = vld [vmem:[#allocation8 + $0x780] ss:$24 sps:$4 sm:$0xff]  }
 0x1ba   :  { %v2078_v2 = vadd.f32 %v9793_v58, %v463_v62 }
 0x1bc   :  { %4101 = vmatpush1.bf16.msra.mxu0 %v8576_v63  ;;  %4138 = vmatpush1.bf16.msra.mxu1 %v8669_v4  ;;  %v8741_v63 = vld [vmem:[#allocation8 + $0x7e0] ss:$24 sps:$4 sm:$0xff]  }
 0x1bd   :  { %4102 = vmatprep.subr.bf16.mxu0 %v8581_v1  ;;  %4139 = vmatprep.subr.bf16.mxu1 %v8677_v6  ;;  %v8749_v1 = vld [vmem:[#allocation8 + $0x7b4] ss:$24 sps:$4 sm:$0xff]  }
 0x1c0   :  { %4103 = vmatpush1.bf16.msra.mxu0 %v8579_v3  ;;  %4140 = vmatpush1.bf16.msra.mxu1 %v8675_v9  ;;  %v8747_v3 = vld [vmem:[#allocation8 + $0x7b0] ss:$24 sps:$4 sm:$0xff]   ;;  %v8755_v9 = vld [vmem:[#allocation8 + $0x784] ss:$24 sps:$4 sm:$0xff]  }
 0x1c1   :  { %4104 = vmatprep.subr.bf16.mxu0 %v8584_v5  ;;  %4141 = vmatprep.subr.bf16.mxu1 %v8683_v12 }
 0x1c4   :  { %4105 = vmatpush1.bf16.msra.mxu0 %v8582_v8  ;;  %4142 = vmatpush1.bf16.msra.mxu1 %v8681_v14 }
 0x1c5   :  { %4106 = vmatprep.subr.bf16.mxu0 %v8587_v11  ;;  %4143 = vmatprep.subr.bf16.mxu1 %v8689_v17 }
 0x1c8   :  { %4107 = vmatpush1.bf16.msra.mxu0 %v8585_v13  ;;  %4144 = vmatpush1.bf16.msra.mxu1 %v8687_v19  ;;  %v8615_v19 = vld [vmem:[#allocation8 + $0x158] ss:$24 sps:$4 sm:$0xff]  }
 0x1c9   :  { %4108 = vmatprep.subr.bf16.mxu0 %v8590_v15  ;;  %4145 = vmatprep.subr.bf16.mxu1 %v8695_v21  ;;  %v8620_v21 = vld [vmem:[#allocation8 + $0x12c] ss:$24 sps:$4 sm:$0xff]  }
 0x1cc   :  { %4109 = vmatpush1.bf16.msra.mxu0 %v8588_v18  ;;  %4146 = vmatpush1.bf16.msra.mxu1 %v8693_v23  ;;  %v8761_v18 = vld [vmem:[#allocation8 + $0x45c] ss:$24 sps:$4 sm:$0xff]   ;;  %v8618_v23 = vld [vmem:[#allocation8 + $0x128] ss:$24 sps:$4 sm:$0xff]  }
 0x1cd   :  { %4110 = vmatprep.subr.bf16.mxu0 %v8593_v20  ;;  %4147 = vmatprep.subr.bf16.mxu1 %v8701_v25  ;;  %v8621_v25 = vld [vmem:[#allocation8 + $0xf8] ss:$24 sps:$4 sm:$0xff]  }
 0x1d0   :  { %4111 = vmatpush2.bf16.msra.mxu0 %v8591_v22  ;;  %4148 = vmatpush1.bf16.msra.mxu1 %v8699_v28  ;;  %v8624_v28 = vld [vmem:[#allocation8 + $0xc8] ss:$24 sps:$4 sm:$0xff]  }
 0x1d1   :  { %4112 = vmatprep.subr.bf16.mxu0 %v8596_v24  ;;  %4149 = vmatprep.subr.bf16.mxu1 %v8707_v31  ;;  %v8623_v24 = vld [vmem:[#allocation8 + $0xfc] ss:$24 sps:$4 sm:$0xff]   ;;  %v8627_v31 = vld [vmem:[#allocation8 + $0x98] ss:$24 sps:$4 sm:$0xff]  }
 0x1d4   :  { %4113 = vmatpush2.bf16.msra.mxu0 %v8594_v26  ;;  %4150 = vmatpush1.bf16.msra.mxu1 %v8705_v37  ;;  %v8626_v26 = vld [vmem:[#allocation8 + $0xcc] ss:$24 sps:$4 sm:$0xff]   ;;  %v8630_v37 = vld [vmem:[#allocation8 + $0x68] ss:$24 sps:$4 sm:$0xff]  }
 0x1d5   :  { %4114 = vmatprep.subr.bf16.mxu0 %v8599_v30  ;;  %4151 = vmatprep.subr.bf16.mxu1 %v8713_v7  ;;  %v8629_v30 = vld [vmem:[#allocation8 + $0x9c] ss:$24 sps:$4 sm:$0xff]   ;;  %v8633_v7 = vld [vmem:[#allocation8 + $0x38] ss:$24 sps:$4 sm:$0xff]  }
 0x1d8   :  { %4115 = vmatpush2.bf16.msra.mxu0 %v8597_v33  ;;  %4152 = vmatpush2.bf16.msra.mxu1 %v8711_v41  ;;  %v8632_v33 = vld [vmem:[#allocation8 + $0x6c] ss:$24 sps:$4 sm:$0xff]   ;;  %v8636_v41 = vld [vmem:[#allocation8 + $0x8] ss:$24 sps:$4 sm:$0xff]  }
 0x1d9   :  { %4116 = vmatprep.subr.bf16.mxu0 %v8602_v39  ;;  %4153 = vmatprep.subr.bf16.mxu1 %v8719_v42  ;;  %v8635_v39 = vld [vmem:[#allocation8 + $0x3c] ss:$24 sps:$4 sm:$0xff]   ;;  %v8639_v42 = vld [vmem:[#allocation8 + $0x2d8] ss:$24 sps:$4 sm:$0xff]  }
 0x1dc   :  { %4117 = vmatpush2.bf16.msra.mxu0 %v8600_v40  ;;  %4154 = vmatpush2.bf16.msra.mxu1 %v8717_v44  ;;  %v8638_v40 = vld [vmem:[#allocation8 + $0xc] ss:$24 sps:$4 sm:$0xff]   ;;  %v8642_v44 = vld [vmem:[#allocation8 + $0x2a8] ss:$24 sps:$4 sm:$0xff]  }
 0x1dd   :  { %4118 = vmatprep.subr.bf16.mxu0 %v8605_v36  ;;  %4155 = vmatprep.subr.bf16.mxu1 %v8725_v45  ;;  %v8641_v36 = vld [vmem:[#allocation8 + $0x2dc] ss:$24 sps:$4 sm:$0xff]   ;;  %v8645_v45 = vld [vmem:[#allocation8 + $0x278] ss:$24 sps:$4 sm:$0xff]  }
 0x1e0   :  { %4119 = vmatpush2.bf16.msra.mxu0 %v8603_v43  ;;  %4156 = vmatpush2.bf16.msra.mxu1 %v8723_v47  ;;  %v8644_v43 = vld [vmem:[#allocation8 + $0x2ac] ss:$24 sps:$4 sm:$0xff]   ;;  %v8648_v47 = vld [vmem:[#allocation8 + $0x248] ss:$24 sps:$4 sm:$0xff]  }
 0x1e1   :  { %4120 = vmatprep.subr.bf16.mxu0 %v8608_v10  ;;  %4157 = vmatprep.subr.bf16.mxu1 %v8731_v50  ;;  %v8647_v10 = vld [vmem:[#allocation8 + $0x27c] ss:$24 sps:$4 sm:$0xff]   ;;  %v8651_v50 = vld [vmem:[#allocation8 + $0x218] ss:$24 sps:$4 sm:$0xff]  }
 0x1e4   :  { %4121 = vmatpush2.bf16.msra.mxu0 %v8606_v46  ;;  %4158 = vmatpush2.bf16.msra.mxu1 %v8729_v53  ;;  %v8650_v46 = vld [vmem:[#allocation8 + $0x24c] ss:$24 sps:$4 sm:$0xff]   ;;  %v8654_v53 = vld [vmem:[#allocation8 + $0x1e8] ss:$24 sps:$4 sm:$0xff]  }
 0x1e5   :  { %4122 = vmatprep.subr.bf16.mxu0 %v8611_v49  ;;  %4159 = vmatprep.subr.bf16.mxu1 %v8737_v56  ;;  %v8653_v49 = vld [vmem:[#allocation8 + $0x21c] ss:$24 sps:$4 sm:$0xff]   ;;  %v8657_v56 = vld [vmem:[#allocation8 + $0x1b8] ss:$24 sps:$4 sm:$0xff]  }
 0x1e8   :  { %4123 = vmatpush2.bf16.msra.mxu0 %v8609_v51  ;;  %4160 = vmatpush2.bf16.msra.mxu1 %v8735_v48  ;;  %v8656_v51 = vld [vmem:[#allocation8 + $0x1ec] ss:$24 sps:$4 sm:$0xff]  }
 0x1e9   :  { %4124 = vmatprep.subr.bf16.mxu0 %v8614_v54  ;;  %4161 = vmatprep.subr.bf16.mxu1 %v8743_v61  ;;  %v8659_v54 = vld [vmem:[#allocation8 + $0x1bc] ss:$24 sps:$4 sm:$0xff]   ;;  %v8662_v48 = vld [vmem:[#allocation8 + $0x18c] ss:$24 sps:$4 sm:$0xff]   ;;  %v8660_v61 = vld [vmem:[#allocation8 + $0x188] ss:$24 sps:$4 sm:$0xff]  }
 0x1ec   :  { %4125 = vmatpush2.bf16.msra.mxu0 %v8612_v57  ;;  %4162 = vmatpush2.bf16.msra.mxu1 %v8741_v63 }
 0x1ed   :  { %4176 = vmatprep.subr.bf16.mxu0 %v8617_v60  ;;  %4163 = vmatprep.subr.bf16.mxu1 %v8749_v1 }
 0x1ef   :  { %v2116_v4 = vpop.f32.mrf.mxu0 }
 0x1f0   :  { %v2117_v5 = vadd.f32 %v2116_v4, %v2076_v0  ;;  %4164 = vmatpush2.bf16.msra.mxu1 %v8747_v3  ;;  %v8668_v0 = vld [vmem:[#allocation8 + $0x75c] ss:$24 sps:$4 sm:$0xff]   ;;  %v8674_v4 = vld [vmem:[#allocation8 + $0x72c] ss:$24 sps:$4 sm:$0xff]  }
 0x1f1   :  { %v2118_v6 = vpop.f32.mrf.mxu0  ;;  %v2157_v8 = vpop.f32.mrf.mxu1  ;;  %4165 = vmatprep.subr.bf16.mxu1 %v8755_v9  ;;  %v8678_v9 = vld [vmem:[#allocation8 + $0x6f8] ss:$24 sps:$4 sm:$0xff]  }
 0x1f2   :  { %v2119_v11 = vadd.f32 %v2118_v6, %v2078_v2  ;;  %v2158_v12 = vadd.f32 %v2157_v8, %v2117_v5  ;;  %v8666_v2 = vld [vmem:[#allocation8 + $0x758] ss:$24 sps:$4 sm:$0xff]   ;;  %v8672_v6 = vld [vmem:[#allocation8 + $0x728] ss:$24 sps:$4 sm:$0xff]   ;;  %v8680_v8 = vld [vmem:[#allocation8 + $0x6fc] ss:$24 sps:$4 sm:$0xff]  }
 0x1f3   :  { %v2120_v13 = vpop.f32.mrf.mxu0  ;;  %v2159_v14 = vpop.f32.mrf.mxu1 }
 0x1f4   :  { %v2160_v32 = vadd.f32 %v2159_v14, %v2119_v11  ;;  %4166 = vmatpush2.bf16.msra.mxu1 %v8753_v29  ;;  %v9815_v20 = vpack.c.bf16 %v2158_v12, %v2158_v12  ;;  %v8686_v11 = vld [vmem:[#allocation8 + $0x6cc] ss:$24 sps:$4 sm:$0xff]   ;;  %v8684_v29 = vld [vmem:[#allocation8 + $0x6c8] ss:$24 sps:$4 sm:$0xff]   ;;  %v8692_v12 = vld [vmem:[#allocation8 + $0x69c] ss:$24 sps:$4 sm:$0xff]  }
 0x1f5   :  { %v2121_v15 = vpop.f32.mrf.mxu0  ;;  %v2161_v17 = vpop.f32.mrf.mxu1  ;;  %4217 = vmatprep.subr.bf16.mxu1 %v8761_v18  ;;  %v8690_v13 = vld [vmem:[#allocation8 + $0x698] ss:$24 sps:$4 sm:$0xff]   ;;  %v8698_v14 = vld [vmem:[#allocation8 + $0x66c] ss:$24 sps:$4 sm:$0xff]  }
 0x1f6   :  { %v9813_v58 = vpack.c.bf16 %v2160_v32, %v2160_v32  ;;  %v8696_v32 = vld [vmem:[#allocation8 + $0x668] ss:$24 sps:$4 sm:$0xff]   ;;  %v8704_v15 = vld [vmem:[#allocation8 + $0x63c] ss:$24 sps:$4 sm:$0xff]   ;;  %v8702_v17 = vld [vmem:[#allocation8 + $0x638] ss:$24 sps:$4 sm:$0xff]  }
 0x1f7   :  { %v2162_v22 = vpop.f32.mrf.mxu1  ;;  %v8710_v18 = vld [vmem:[#allocation8 + $0x60c] ss:$24 sps:$4 sm:$0xff]  }
 0x1f8   :  { %4126 = vmatprep.mubr.bf16.mxu0 %v9813_v58  ;;  %v8714_v22 = vld [vmem:[#allocation8 + $0x8d8] ss:$24 sps:$4 sm:$0xff]  }
 0x1f9   :  { %4127 = vmatmul.mubr.bf16.vlgmr.msra.gmra.mxu0 %v9815_v20 }
 0x1fa   :  { %4177 = vmatpush1.bf16.msra.mxu0 %v8615_v19  ;;  %4208 = vmatprep.mubr.bf16.mxu0 %v9795_v59  ;;  %v8708_v19 = vld [vmem:[#allocation8 + $0x608] ss:$24 sps:$4 sm:$0xff]  }
 0x1fb   :  { %4178 = vmatprep.subr.bf16.mxu0 %v8620_v21  ;;  %v8716_v21 = vld [vmem:[#allocation8 + $0x8dc] ss:$24 sps:$4 sm:$0xff]  }
 0x1fe   :  { %4179 = vmatpush1.bf16.msra.mxu0 %v8618_v23  ;;  %v8722_v23 = vld [vmem:[#allocation8 + $0x8ac] ss:$24 sps:$4 sm:$0xff]  }
 0x1ff   :  { %4180 = vmatprep.subr.bf16.mxu0 %v8623_v24  ;;  %v8720_v24 = vld [vmem:[#allocation8 + $0x8a8] ss:$24 sps:$4 sm:$0xff]  }
 0x202   :  { %4181 = vmatpush1.bf16.msra.mxu0 %v8621_v25  ;;  %v8728_v25 = vld [vmem:[#allocation8 + $0x87c] ss:$24 sps:$4 sm:$0xff]  }
 0x203   :  { %4182 = vmatprep.subr.bf16.mxu0 %v8626_v26  ;;  %v8726_v26 = vld [vmem:[#allocation8 + $0x878] ss:$24 sps:$4 sm:$0xff]  }
 0x206   :  { %4183 = vmatpush1.bf16.msra.mxu0 %v8624_v28  ;;  %v8734_v28 = vld [vmem:[#allocation8 + $0x84c] ss:$24 sps:$4 sm:$0xff]  }
 0x207   :  { %4184 = vmatprep.subr.bf16.mxu0 %v8629_v30  ;;  %v8732_v30 = vld [vmem:[#allocation8 + $0x848] ss:$24 sps:$4 sm:$0xff]  }
 0x20a   :  { %4185 = vmatpush1.bf16.msra.mxu0 %v8627_v31  ;;  %v9830_v31 = vsub.s32 4, %v9772_v27 }
 0x20b   :  { %4186 = vmatprep.subr.bf16.mxu0 %v8632_v33  ;;  %v8740_v33 = vld [vmem:[#allocation8 + $0x81c] ss:$24 sps:$4 sm:$0xff]  }
 0x20e   :  { %4187 = vmatpush1.bf16.msra.mxu0 %v8630_v37  ;;  %v9833_v37 = vsub.s32 5, %v9772_v27  ;;  %v8750_v27 = vld [vmem:[#allocation8 + $0x7b8] ss:$24 sps:$4 sm:$0xff]  }
 0x20f   :  { %4188 = vmatprep.subr.bf16.mxu0 %v8635_v39  ;;  %v8738_v39 = vld [vmem:[#allocation8 + $0x818] ss:$24 sps:$4 sm:$0xff]  }
 0x212   :  { %4189 = vmatpush1.bf16.msra.mxu0 %v8633_v7  ;;  %v9431_v7 = vld [vmem:[#allocation7] sm:$0x3f] }
 0x213   :  { %4190 = vmatprep.subr.bf16.mxu0 %v8638_v40  ;;  %v467_v40 = vrot.slane %v9431_v7, %v9830_v31 }
 0x216   :  { %4191 = vmatpush1.bf16.msra.mxu0 %v8636_v41  ;;  %v8746_v41 = vld [vmem:[#allocation8 + $0x7ec] ss:$24 sps:$4 sm:$0xff]  }
 0x217   :  { %4192 = vmatprep.subr.bf16.mxu0 %v8641_v36  ;;  %v471_v36 = vrot.slane %v9431_v7, %v9833_v37  ;;  %v8809_v7 = vld [vmem:[#allocation8 + $0x5dc] ss:$24 sps:$4 sm:$0xff]  }
 0x21a   :  { %4193 = vmatpush2.bf16.msra.mxu0 %v8639_v42  ;;  %v8744_v42 = vld [vmem:[#allocation8 + $0x7e8] ss:$24 sps:$4 sm:$0xff]  }
 0x21b   :  { %4194 = vmatprep.subr.bf16.mxu0 %v8644_v43 }
 0x21e   :  { %4195 = vmatpush2.bf16.msra.mxu0 %v8642_v44  ;;  %v8752_v44 = vld [vmem:[#allocation8 + $0x7bc] ss:$24 sps:$4 sm:$0xff]  }
 0x21f   :  { %4196 = vmatprep.subr.bf16.mxu0 %v8647_v10 }
 0x222   :  { %4197 = vmatpush2.bf16.msra.mxu0 %v8645_v45 }
 0x223   :  { %4198 = vmatprep.subr.bf16.mxu0 %v8650_v46 }
 0x226   :  { %4199 = vmatpush2.bf16.msra.mxu0 %v8648_v47  ;;  %v8758_v47 = vld [vmem:[#allocation8 + $0x78c] ss:$24 sps:$4 sm:$0xff]  }
 0x227   :  { %4200 = vmatprep.subr.bf16.mxu0 %v8653_v49 }
 0x22a   :  { %4201 = vmatpush2.bf16.msra.mxu0 %v8651_v50 }
 0x22b   :  { %4202 = vmatprep.subr.bf16.mxu0 %v8656_v51 }
 0x22e   :  { %4203 = vmatpush2.bf16.msra.mxu0 %v8654_v53 }
 0x22f   :  { %v9820_v57 = vpop.f32.mrf.mxu0  ;;  %4204 = vmatprep.subr.bf16.mxu0 %v8659_v54  ;;  %v8756_v54 = vld [vmem:[#allocation8 + $0x788] ss:$24 sps:$4 sm:$0xff]  }
 0x230   :  { %v2199_v43 = vadd.f32 %v9820_v57, %v467_v40  ;;  %v8804_v40 = vld [vmem:[#allocation8 + $0x310] ss:$24 sps:$4 sm:$0xff]  }
 0x231   :  { %v9822_v60 = vpop.f32.mrf.mxu0  ;;  %v9824_v52 = vpop.f32.mrf.mxu1 }
 0x232   :  { %4205 = vmatpush2.bf16.msra.mxu0 %v8657_v56  ;;  %v2201_v10 = vadd.f32 %v9822_v60, %v471_v36  ;;  %v2240_v45 = vadd.f32 %v9824_v52, %v2199_v43  ;;  %v8762_v52 = vld [vmem:[#allocation8 + $0x460] ss:$24 sps:$4 sm:$0xff]  }
 0x233   :  { %v2202_v62 = vpop.f32.mrf.mxu0  ;;  %v9826_v63 = vpop.f32.mrf.mxu1  ;;  %4206 = vmatprep.subr.bf16.mxu0 %v8662_v48  ;;  %v8759_v48 = vld [vmem:[#allocation8 + $0x458] ss:$24 sps:$4 sm:$0xff]  }
 0x234   :  { %v2242_v49 = vadd.f32 %v9826_v63, %v2201_v10  ;;  %v8764_v62 = vld [vmem:[#allocation8 + $0x464] ss:$24 sps:$4 sm:$0xff]   ;;  %v8807_v36 = vld [vmem:[#allocation8 + $0x5d8] ss:$24 sps:$4 sm:$0xff]   ;;  %v8813_v10 = vld [vmem:[#allocation8 + $0x5a8] ss:$24 sps:$4 sm:$0xff]  }
 0x235   :  { %v2203_v1 = vpop.f32.mrf.mxu0  ;;  %v2243_v3 = vpop.f32.mrf.mxu1  ;;  %v8810_v43 = vld [vmem:[#allocation8 + $0x5e0] ss:$24 sps:$4 sm:$0xff]  }
 0x236   :  { %4207 = vmatpush2.bf16.msra.mxu0 %v8660_v61  ;;  %v8770_v1 = vld [vmem:[#allocation8 + $0x434] ss:$24 sps:$4 sm:$0xff]  }
 0x237   :  { %4258 = vmatprep.subr.bf16.mxu0 %v8668_v0  ;;  %v2244_v5 = vpop.f32.mrf.mxu1  ;;  %v8767_v0 = vld [vmem:[#allocation8 + $0x42c] ss:$24 sps:$4 sm:$0xff]  }
 0x238   :  { %v8768_v5 = vld [vmem:[#allocation8 + $0x430] ss:$24 sps:$4 sm:$0xff]  }
 0x239   :  { %4209 = vmatmul.mubr.bf16.vlgmr.msra.gmra.mxu0 %v9797_v16 }
 0x23a   :  { %4259 = vmatpush1.bf16.msra.mxu0 %v8666_v2  ;;  %v8765_v2 = vld [vmem:[#allocation8 + $0x428] ss:$24 sps:$4 sm:$0xff]  }
 0x23b   :  { %4260 = vmatprep.subr.bf16.mxu0 %v8674_v4  ;;  %v8773_v4 = vld [vmem:[#allocation8 + $0x3fc] ss:$24 sps:$4 sm:$0xff]  }
 0x23e   :  { %4261 = vmatpush1.bf16.msra.mxu0 %v8672_v6 }
 0x23f   :  { %4262 = vmatprep.subr.bf16.mxu0 %v8680_v8  ;;  %v8776_v8 = vld [vmem:[#allocation8 + $0x404] ss:$24 sps:$4 sm:$0xff]  }
 0x242   :  { %4263 = vmatpush1.bf16.msra.mxu0 %v8678_v9  ;;  %v8771_v9 = vld [vmem:[#allocation8 + $0x3f8] ss:$24 sps:$4 sm:$0xff]  }
 0x243   :  { %4264 = vmatprep.subr.bf16.mxu0 %v8686_v11 }
 0x246   :  { %4265 = vmatpush1.bf16.msra.mxu0 %v8684_v29  ;;  %v8779_v29 = vld [vmem:[#allocation8 + $0x3cc] ss:$24 sps:$4 sm:$0xff]  }
 0x247   :  { %4266 = vmatprep.subr.bf16.mxu0 %v8692_v12  ;;  %v8774_v12 = vld [vmem:[#allocation8 + $0x400] ss:$24 sps:$4 sm:$0xff]  }
 0x24a   :  { %4267 = vmatpush1.bf16.msra.mxu0 %v8690_v13  ;;  %v8782_v13 = vld [vmem:[#allocation8 + $0x3d4] ss:$24 sps:$4 sm:$0xff]  }
 0x24b   :  { %4268 = vmatprep.subr.bf16.mxu0 %v8698_v14  ;;  %v8777_v14 = vld [vmem:[#allocation8 + $0x3c8] ss:$24 sps:$4 sm:$0xff]  }
 0x24e   :  { %4269 = vmatpush1.bf16.msra.mxu0 %v8696_v32  ;;  %v8785_v32 = vld [vmem:[#allocation8 + $0x39c] ss:$24 sps:$4 sm:$0xff]  }
 0x24f   :  { %4270 = vmatprep.subr.bf16.mxu0 %v8704_v15  ;;  %v8788_v15 = vld [vmem:[#allocation8 + $0x3a4] ss:$24 sps:$4 sm:$0xff]  }
 0x252   :  { %4271 = vmatpush1.bf16.msra.mxu0 %v8702_v17  ;;  %v8783_v17 = vld [vmem:[#allocation8 + $0x398] ss:$24 sps:$4 sm:$0xff]  }
 0x253   :  { %4272 = vmatprep.subr.bf16.mxu0 %v8710_v18  ;;  %v8791_v18 = vld [vmem:[#allocation8 + $0x36c] ss:$24 sps:$4 sm:$0xff]  }
 0x256   :  { %4273 = vmatpush1.bf16.msra.mxu0 %v8708_v19  ;;  %v8786_v19 = vld [vmem:[#allocation8 + $0x3a0] ss:$24 sps:$4 sm:$0xff]  }
 0x257   :  { %4274 = vmatprep.subr.bf16.mxu0 %v8716_v21  ;;  %v8794_v21 = vld [vmem:[#allocation8 + $0x374] ss:$24 sps:$4 sm:$0xff]  }
 0x25a   :  { %4275 = vmatpush2.bf16.msra.mxu0 %v8714_v22  ;;  %v8789_v22 = vld [vmem:[#allocation8 + $0x368] ss:$24 sps:$4 sm:$0xff]  }
 0x25b   :  { %4276 = vmatprep.subr.bf16.mxu0 %v8722_v23  ;;  %v8797_v23 = vld [vmem:[#allocation8 + $0x33c] ss:$24 sps:$4 sm:$0xff]  }
 0x25e   :  { %4277 = vmatpush2.bf16.msra.mxu0 %v8720_v24  ;;  %v8792_v24 = vld [vmem:[#allocation8 + $0x370] ss:$24 sps:$4 sm:$0xff]  }
 0x25f   :  { %4278 = vmatprep.subr.bf16.mxu0 %v8728_v25  ;;  %v8800_v25 = vld [vmem:[#allocation8 + $0x344] ss:$24 sps:$4 sm:$0xff]  }
 0x262   :  { %4279 = vmatpush2.bf16.msra.mxu0 %v8726_v26  ;;  %v8795_v26 = vld [vmem:[#allocation8 + $0x338] ss:$24 sps:$4 sm:$0xff]  }
 0x263   :  { %4280 = vmatprep.subr.bf16.mxu0 %v8734_v28  ;;  %v8803_v28 = vld [vmem:[#allocation8 + $0x30c] ss:$24 sps:$4 sm:$0xff]  }
 0x266   :  { %4281 = vmatpush2.bf16.msra.mxu0 %v8732_v30  ;;  %v8798_v30 = vld [vmem:[#allocation8 + $0x340] ss:$24 sps:$4 sm:$0xff]  }
 0x267   :  { %4282 = vmatprep.subr.bf16.mxu0 %v8740_v33  ;;  %v8806_v33 = vld [vmem:[#allocation8 + $0x314] ss:$24 sps:$4 sm:$0xff]  }
 0x26a   :  { %4283 = vmatpush2.bf16.msra.mxu0 %v8738_v39  ;;  %v8801_v39 = vld [vmem:[#allocation8 + $0x308] ss:$24 sps:$4 sm:$0xff]  }
 0x26b   :  { %4284 = vmatprep.subr.bf16.mxu0 %v8746_v41  ;;  %v8812_v41 = vld [vmem:[#allocation8 + $0x5e4] ss:$24 sps:$4 sm:$0xff]  }
 0x26e   :  { %4285 = vmatpush2.bf16.msra.mxu0 %v8744_v42  ;;  %v8815_v42 = vld [vmem:[#allocation8 + $0x5ac] ss:$24 sps:$4 sm:$0xff]  }
 0x26f   :  { %v2280_v46 = vpop.f32.mrf.mxu0  ;;  %4286 = vmatprep.subr.bf16.mxu0 %v8752_v44  ;;  %v8818_v44 = vld [vmem:[#allocation8 + $0x5b4] ss:$24 sps:$4 sm:$0xff]  }
 0x270   :  { %v2281_v50 = vadd.f32 %v2280_v46, %v2240_v45  ;;  %v8816_v45 = vld [vmem:[#allocation8 + $0x5b0] ss:$24 sps:$4 sm:$0xff]   ;;  %v8824_v46 = vld [vmem:[#allocation8 + $0x584] ss:$24 sps:$4 sm:$0xff]  }
 0x271   :  { %v2282_v51 = vpop.f32.mrf.mxu0 }
 0x272   :  { %v2283_v53 = vadd.f32 %v2282_v51, %v2242_v49  ;;  %4287 = vmatpush2.bf16.msra.mxu0 %v8750_v27  ;;  %v9843_v60 = vpack.c.bf16 %v2281_v50, %v2281_v50  ;;  %v8821_v27 = vld [vmem:[#allocation8 + $0x57c] ss:$24 sps:$4 sm:$0xff]   ;;  %v8827_v49 = vld [vmem:[#allocation8 + $0x54c] ss:$24 sps:$4 sm:$0xff]   ;;  %v8822_v50 = vld [vmem:[#allocation8 + $0x580] ss:$24 sps:$4 sm:$0xff]  }
 0x273   :  { %v2284_v56 = vpop.f32.mrf.mxu0  ;;  %4288 = vmatprep.subr.bf16.mxu0 %v8758_v47  ;;  %v8819_v47 = vld [vmem:[#allocation8 + $0x578] ss:$24 sps:$4 sm:$0xff]   ;;  %v8830_v51 = vld [vmem:[#allocation8 + $0x554] ss:$24 sps:$4 sm:$0xff]  }
 0x274   :  { %v9841_v57 = vpack.c.bf16 %v2283_v53, %v2283_v53  ;;  %v8825_v53 = vld [vmem:[#allocation8 + $0x548] ss:$24 sps:$4 sm:$0xff]  }
 0x275   :  { %v2285_v61 = vpop.f32.mrf.mxu0  ;;  %v8828_v56 = vld [vmem:[#allocation8 + $0x550] ss:$24 sps:$4 sm:$0xff]  }
 0x276   :  { %4289 = vmatpush2.bf16.msra.mxu0 %v8756_v54  ;;  %4167 = vmatprep.mubr.bf16.mxu1 %v9841_v57  ;;  %v8833_v54 = vld [vmem:[#allocation8 + $0x51c] ss:$24 sps:$4 sm:$0xff]   ;;  %v8831_v61 = vld [vmem:[#allocation8 + $0x518] ss:$24 sps:$4 sm:$0xff]  }
 0x277   :  { %4290 = vmatprep.mubr.bf16.mxu0 %v9841_v57  ;;  %v9847_v63 = vpop.f32.mrf.mxu1  ;;  %4168 = vmatmul.mubr.bf16.vlgmr.msra.gmra.mxu1 %v9843_v60 }
 0x278   :  { %4218 = vmatpush1.bf16.msra.mxu1 %v8759_v48  ;;  %4249 = vmatprep.mubr.bf16.mxu1 %v9813_v58  ;;  %v8836_v48 = vld [vmem:[#allocation8 + $0x524] ss:$24 sps:$4 sm:$0xff]  }
 0x279   :  { %4291 = vmatmul.mubr.bf16.vlgmr.msra.gmra.mxu0 %v9843_v60  ;;  %4340 = vmatprep.subr.bf16.mxu0 %v8764_v62  ;;  %v9852_v3 = vpop.f32.mrf.mxu1  ;;  %v8839_v62 = vld [vmem:[#allocation8 + $0x4ec] ss:$24 sps:$4 sm:$0xff]  }
 0x27a   :  { %4341 = vmatpush1.bf16.msra.mxu0 %v8762_v52  ;;  %4372 = vmatprep.mubr.bf16.mxu0 %v9813_v58  ;;  %v8780_v58 = vld [vmem:[#allocation8 + $0x3d0] ss:$24 sps:$4 sm:$0xff]   ;;  %v8834_v52 = vld [vmem:[#allocation8 + $0x520] ss:$24 sps:$4 sm:$0xff]  }
 0x27b   :  { %4219 = vmatprep.subr.bf16.mxu1 %v8767_v0  ;;  %v4091_v6 = vpop.f32.mrf.mxu1  ;;  %4342 = vmatprep.subr.bf16.mxu0 %v8770_v1  ;;  %v8842_v0 = vld [vmem:[#allocation8 + $0x4f4] ss:$24 sps:$4 sm:$0xff]   ;;  %v8837_v1 = vld [vmem:[#allocation8 + $0x4e8] ss:$24 sps:$4 sm:$0xff]  }
 0x27c   :  { %4220 = vmatpush1.bf16.msra.mxu1 %v8765_v2  ;;  %v8845_v2 = vld [vmem:[#allocation8 + $0x4bc] ss:$24 sps:$4 sm:$0xff]   ;;  %v8843_v6 = vld [vmem:[#allocation8 + $0x4b8] ss:$24 sps:$4 sm:$0xff]  }
 0x27d   :  { %v4092_v11 = vpop.f32.mrf.mxu1  ;;  %4221 = vmatprep.subr.bf16.mxu1 %v8773_v4  ;;  %v8840_v4 = vld [vmem:[#allocation8 + $0x4f0] ss:$24 sps:$4 sm:$0xff]  }
 0x27e   :  { %4343 = vmatpush1.bf16.msra.mxu0 %v8768_v5  ;;  %v8848_v5 = vld [vmem:[#allocation8 + $0x4c4] ss:$24 sps:$4 sm:$0xff]   ;;  %v8854_v11 = vld [vmem:[#allocation8 + $0x494] ss:$24 sps:$4 sm:$0xff]  }
 0x27f   :  { %4344 = vmatprep.subr.bf16.mxu0 %v8776_v8  ;;  %v8851_v8 = vld [vmem:[#allocation8 + $0x48c] ss:$24 sps:$4 sm:$0xff]  }
 0x280   :  { %4222 = vmatpush1.bf16.msra.mxu1 %v8771_v9  ;;  %v8846_v9 = vld [vmem:[#allocation8 + $0x4c0] ss:$24 sps:$4 sm:$0xff]  }
 0x281   :  { %4223 = vmatprep.subr.bf16.mxu1 %v8779_v29  ;;  %v8849_v29 = vld [vmem:[#allocation8 + $0x488] ss:$24 sps:$4 sm:$0xff]  }
 0x282   :  { %4345 = vmatpush1.bf16.msra.mxu0 %v8774_v12  ;;  %v9855_v12 = vld [vmem:[#allocation10] sm:$0x3f] }
 0x283   :  { %4346 = vmatprep.subr.bf16.mxu0 %v8782_v13  ;;  %v8857_v13 = vld [vmem:[#allocation8 + $0x164] ss:$24 sps:$4 sm:$0xff]  }
 0x284   :  { %4224 = vmatpush1.bf16.msra.mxu1 %v8777_v14  ;;  %v8852_v14 = vld [vmem:[#allocation8 + $0x490] ss:$24 sps:$4 sm:$0xff]  }
 0x285   :  { %4225 = vmatprep.subr.bf16.mxu1 %v8785_v32  ;;  %v8914_v32 = vld [vmem:[#allocation11 + $0x154] ss:$24 sps:$4 sm:$0xff]  }
 0x286   :  { %4347 = vmatpush1.bf16.msra.mxu0 %v8780_v58  ;;  %v2586_v58 = vrot.slane %v9855_v12, %v9777_v34 }
 0x287   :  { %4348 = vmatprep.subr.bf16.mxu0 %v8788_v15  ;;  %v8855_v15 = vld [vmem:[#allocation8 + $0x160] ss:$24 sps:$4 sm:$0xff]  }
 0x288   :  { %4226 = vmatpush1.bf16.msra.mxu1 %v8783_v17  ;;  %v8860_v17 = vld [vmem:[#allocation8 + $0x134] ss:$24 sps:$4 sm:$0xff]  }
 0x289   :  { %4227 = vmatprep.subr.bf16.mxu1 %v8791_v18  ;;  %v2590_v18 = vrot.slane %v9855_v12, %v9780_v38 }
 0x28a   :  { %4349 = vmatpush1.bf16.msra.mxu0 %v8786_v19  ;;  %v8912_v19 = vld [vmem:[#allocation11 + $0x150] ss:$24 sps:$4 sm:$0xff]  }
 0x28b   :  { %4350 = vmatprep.subr.bf16.mxu0 %v8794_v21  ;;  %v8920_v21 = vld [vmem:[#allocation11 + $0x124] ss:$24 sps:$4 sm:$0xff]  }
 0x28c   :  { %4228 = vmatpush1.bf16.msra.mxu1 %v8789_v22  ;;  %v4088_v22 = vadd.f32 %v9847_v63, %v2586_v58  ;;  %v8861_v63 = vld [vmem:[#allocation8 + $0x100] ss:$24 sps:$4 sm:$0xff]   ;;  %v8888_v58 = vld [vmem:[#allocation8 + $0x250] ss:$24 sps:$4 sm:$0xff]  }
 0x28d   :  { %4229 = vmatprep.subr.bf16.mxu1 %v8797_v23  ;;  %v8858_v23 = vld [vmem:[#allocation8 + $0x130] ss:$24 sps:$4 sm:$0xff]  }
 0x28e   :  { %4351 = vmatpush1.bf16.msra.mxu0 %v8792_v24 }
 0x28f   :  { %4352 = vmatprep.subr.bf16.mxu0 %v8800_v25  ;;  %v8863_v25 = vld [vmem:[#allocation8 + $0x104] ss:$24 sps:$4 sm:$0xff]  }
 0x290   :  { %4230 = vmatpush1.bf16.msra.mxu1 %v8795_v26  ;;  %v4090_v26 = vadd.f32 %v9852_v3, %v2590_v18  ;;  %v8864_v3 = vld [vmem:[#allocation8 + $0xd0] ss:$24 sps:$4 sm:$0xff]  }
 0x291   :  { %4231 = vmatprep.subr.bf16.mxu1 %v8803_v28  ;;  %v8986_v18 = vld [vmem:[#allocation11 + $0x214] ss:$24 sps:$4 sm:$0xff]  }
 0x292   :  { %4353 = vmatpush1.bf16.msra.mxu0 %v8798_v30  ;;  %v8918_v30 = vld [vmem:[#allocation11 + $0x120] ss:$24 sps:$4 sm:$0xff]  }
 0x293   :  { %4354 = vmatprep.subr.bf16.mxu0 %v8806_v33 }
 0x294   :  { %4232 = vmatpush1.bf16.msra.mxu1 %v8801_v39  ;;  %v8926_v39 = vld [vmem:[#allocation11 + $0xf4] ss:$24 sps:$4 sm:$0xff]  }
 0x295   :  { %4233 = vmatprep.subr.bf16.mxu1 %v8809_v7 }
 0x296   :  { %4355 = vmatpush1.bf16.msra.mxu0 %v8804_v40  ;;  %v8866_v40 = vld [vmem:[#allocation8 + $0xd4] ss:$24 sps:$4 sm:$0xff]  }
 0x297   :  { %4356 = vmatprep.subr.bf16.mxu0 %v8812_v41 }
 0x298   :  { %4234 = vmatpush2.bf16.msra.mxu1 %v8807_v36  ;;  %v8932_v36 = vld [vmem:[#allocation11 + $0xc4] ss:$24 sps:$4 sm:$0xff]  }
 0x299   :  { %4235 = vmatprep.subr.bf16.mxu1 %v8815_v42  ;;  %v8869_v42 = vld [vmem:[#allocation8 + $0xa4] ss:$24 sps:$4 sm:$0xff]  }
 0x29a   :  { %4357 = vmatpush2.bf16.msra.mxu0 %v8810_v43  ;;  %v8930_v43 = vld [vmem:[#allocation11 + $0xc0] ss:$24 sps:$4 sm:$0xff]  }
 0x29b   :  { %4358 = vmatprep.subr.bf16.mxu0 %v8818_v44  ;;  %v8938_v44 = vld [vmem:[#allocation11 + $0x94] ss:$24 sps:$4 sm:$0xff]  }
 0x29c   :  { %4236 = vmatpush2.bf16.msra.mxu1 %v8813_v10  ;;  %v8867_v10 = vld [vmem:[#allocation8 + $0xa0] ss:$24 sps:$4 sm:$0xff]  }
 0x29d   :  { %4237 = vmatprep.subr.bf16.mxu1 %v8821_v27  ;;  %v8872_v27 = vld [vmem:[#allocation8 + $0x74] ss:$24 sps:$4 sm:$0xff]  }
 0x29e   :  { %4359 = vmatpush2.bf16.msra.mxu0 %v8816_v45  ;;  %v8936_v45 = vld [vmem:[#allocation11 + $0x90] ss:$24 sps:$4 sm:$0xff]  }
 0x29f   :  { %4360 = vmatprep.subr.bf16.mxu0 %v8824_v46  ;;  %v8944_v46 = vld [vmem:[#allocation11 + $0x64] ss:$24 sps:$4 sm:$0xff]  }
 0x2a0   :  { %4238 = vmatpush2.bf16.msra.mxu1 %v8819_v47  ;;  %v8870_v47 = vld [vmem:[#allocation8 + $0x70] ss:$24 sps:$4 sm:$0xff]  }
 0x2a1   :  { %4239 = vmatprep.subr.bf16.mxu1 %v8827_v49  ;;  %v8875_v49 = vld [vmem:[#allocation8 + $0x44] ss:$24 sps:$4 sm:$0xff]  }
 0x2a2   :  { %4361 = vmatpush2.bf16.msra.mxu0 %v8822_v50  ;;  %v8942_v50 = vld [vmem:[#allocation11 + $0x60] ss:$24 sps:$4 sm:$0xff]  }
 0x2a3   :  { %4362 = vmatprep.subr.bf16.mxu0 %v8830_v51  ;;  %v8950_v51 = vld [vmem:[#allocation11 + $0x34] ss:$24 sps:$4 sm:$0xff]  }
 0x2a4   :  { %4240 = vmatpush2.bf16.msra.mxu1 %v8825_v53  ;;  %v8873_v53 = vld [vmem:[#allocation8 + $0x40] ss:$24 sps:$4 sm:$0xff]  }
 0x2a5   :  { %4241 = vmatprep.subr.bf16.mxu1 %v8833_v54  ;;  %v8878_v54 = vld [vmem:[#allocation8 + $0x14] ss:$24 sps:$4 sm:$0xff]  }
 0x2a6   :  { %4363 = vmatpush2.bf16.msra.mxu0 %v8828_v56  ;;  %v8948_v56 = vld [vmem:[#allocation11 + $0x30] ss:$24 sps:$4 sm:$0xff]  }
 0x2a7   :  { %4364 = vmatprep.subr.bf16.mxu0 %v8836_v48  ;;  %v8956_v48 = vld [vmem:[#allocation11 + $0x4] ss:$24 sps:$4 sm:$0xff]  }
 0x2a8   :  { %4242 = vmatpush2.bf16.msra.mxu1 %v8831_v61  ;;  %v8876_v61 = vld [vmem:[#allocation8 + $0x10] ss:$24 sps:$4 sm:$0xff]  }
 0x2a9   :  { %4243 = vmatprep.subr.bf16.mxu1 %v8839_v62  ;;  %v8881_v62 = vld [vmem:[#allocation8 + $0x2e4] ss:$24 sps:$4 sm:$0xff]  }
 0x2aa   :  { %4365 = vmatpush2.bf16.msra.mxu0 %v8834_v52  ;;  %v8954_v52 = vld [vmem:[#allocation11] ss:$24 sps:$4 sm:$0xff]  }
 0x2ab   :  { %4366 = vmatprep.subr.bf16.mxu0 %v8842_v0  ;;  %v8962_v0 = vld [vmem:[#allocation11 + $0x2d4] ss:$24 sps:$4 sm:$0xff]  }
 0x2ac   :  { %4244 = vmatpush2.bf16.msra.mxu1 %v8837_v1  ;;  %v8879_v1 = vld [vmem:[#allocation8 + $0x2e0] ss:$24 sps:$4 sm:$0xff]  }
 0x2ad   :  { %4245 = vmatprep.subr.bf16.mxu1 %v8845_v2  ;;  %v8884_v2 = vld [vmem:[#allocation8 + $0x2b4] ss:$24 sps:$4 sm:$0xff]  }
 0x2ae   :  { %4367 = vmatpush2.bf16.msra.mxu0 %v8840_v4  ;;  %v8960_v4 = vld [vmem:[#allocation11 + $0x2d0] ss:$24 sps:$4 sm:$0xff]  }
 0x2af   :  { %4368 = vmatprep.subr.bf16.mxu0 %v8848_v5  ;;  %v8968_v5 = vld [vmem:[#allocation11 + $0x2a4] ss:$24 sps:$4 sm:$0xff]  }
 0x2b0   :  { %4246 = vmatpush2.bf16.msra.mxu1 %v8843_v6  ;;  %v8882_v6 = vld [vmem:[#allocation8 + $0x2b0] ss:$24 sps:$4 sm:$0xff]  }
 0x2b1   :  { %4247 = vmatprep.subr.bf16.mxu1 %v8851_v8  ;;  %v8887_v8 = vld [vmem:[#allocation8 + $0x284] ss:$24 sps:$4 sm:$0xff]  }
 0x2b2   :  { %4369 = vmatpush2.bf16.msra.mxu0 %v8846_v9  ;;  %v8966_v9 = vld [vmem:[#allocation11 + $0x2a0] ss:$24 sps:$4 sm:$0xff]  }
 0x2b3   :  { %4370 = vmatprep.subr.bf16.mxu0 %v8854_v11  ;;  %v8974_v11 = vld [vmem:[#allocation11 + $0x274] ss:$24 sps:$4 sm:$0xff]  }
 0x2b4   :  { %4248 = vmatpush2.bf16.msra.mxu1 %v8849_v29  ;;  %v8885_v29 = vld [vmem:[#allocation8 + $0x280] ss:$24 sps:$4 sm:$0xff]  }
 0x2b5   :  { %4299 = vmatprep.subr.bf16.mxu1 %v8857_v13  ;;  %v8890_v13 = vld [vmem:[#allocation8 + $0x254] ss:$24 sps:$4 sm:$0xff]  }
 0x2b6   :  { %4371 = vmatpush2.bf16.msra.mxu0 %v8852_v14  ;;  %v8972_v14 = vld [vmem:[#allocation11 + $0x270] ss:$24 sps:$4 sm:$0xff]  }
 0x2b7   :  { %4250 = vmatmul.mubr.bf16.vlgmr.msra.gmra.mxu1 %v9815_v20  ;;  %6188 = vmatprep.subr.bf16.mxu0 %v8914_v32  ;;  %v8980_v32 = vld [vmem:[#allocation11 + $0x244] ss:$24 sps:$4 sm:$0xff]  }
 0x2b8   :  { %4300 = vmatpush1.bf16.msra.mxu1 %v8855_v15  ;;  %4331 = vmatprep.mubr.bf16.mxu1 %v9795_v59  ;;  %v8893_v15 = vld [vmem:[#allocation8 + $0x224] ss:$24 sps:$4 sm:$0xff]  }
 0x2b9   :  { %4373 = vmatmul.mubr.bf16.vlgmr.msra.gmra.mxu0 %v9815_v20  ;;  %v4128_v24 = vpop.f32.mrf.mxu0  ;;  %4301 = vmatprep.subr.bf16.mxu1 %v8860_v17  ;;  %v8924_v20 = vld [vmem:[#allocation11 + $0xf0] ss:$24 sps:$4 sm:$0xff]   ;;  %v8978_v17 = vld [vmem:[#allocation11 + $0x240] ss:$24 sps:$4 sm:$0xff]  }
 0x2ba   :  { %v9866_v28 = vadd.f32 %v4128_v24, %v4088_v22  ;;  %6189 = vmatpush1.bf16.msra.mxu0 %v8912_v19  ;;  %v8891_v19 = vld [vmem:[#allocation8 + $0x220] ss:$24 sps:$4 sm:$0xff]   ;;  %v8894_v24 = vld [vmem:[#allocation8 + $0x1f0] ss:$24 sps:$4 sm:$0xff]  }
 0x2bb   :  { %v4130_v33 = vpop.f32.mrf.mxu0  ;;  %6190 = vmatprep.subr.bf16.mxu0 %v8920_v21  ;;  %v8896_v21 = vld [vmem:[#allocation8 + $0x1f4] ss:$24 sps:$4 sm:$0xff]  }
 0x2bc   :  { %v9868_v7 = vadd.f32 %v4130_v33, %v4090_v26  ;;  %4302 = vmatpush1.bf16.msra.mxu1 %v8858_v23  ;;  %v8984_v22 = vld [vmem:[#allocation11 + $0x210] ss:$24 sps:$4 sm:$0xff]   ;;  %v8992_v23 = vld [vmem:[#allocation11 + $0x1e4] ss:$24 sps:$4 sm:$0xff]   ;;  %v8990_v26 = vld [vmem:[#allocation11 + $0x1e0] ss:$24 sps:$4 sm:$0xff]  }
 0x2bd   :  { %v4132_v59 = vpop.f32.mrf.mxu0  ;;  %4303 = vmatprep.subr.bf16.mxu1 %v8863_v25  ;;  %v8899_v25 = vld [vmem:[#allocation8 + $0x1c4] ss:$24 sps:$4 sm:$0xff]   ;;  %v8897_v33 = vld [vmem:[#allocation8 + $0x1c0] ss:$24 sps:$4 sm:$0xff]  }
 0x2be   :  { %6191 = vmatpush1.bf16.msra.mxu0 %v8918_v30  ;;  %v8995_v30 = vld [vmem:[#allocation11 + $0x1b4] ss:$24 sps:$4 sm:$0xff]   ;;  %v8998_v59 = vld [vmem:[#allocation11 + $0x184] ss:$24 sps:$4 sm:$0xff]  }
 0x2bf   :  { %v4133_v41 = vpop.f32.mrf.mxu0  ;;  %6192 = vmatprep.subr.bf16.mxu0 %v8926_v39  ;;  %v8902_v39 = vld [vmem:[#allocation8 + $0x194] ss:$24 sps:$4 sm:$0xff]  }
 0x2c0   :  { %4304 = vmatpush1.bf16.msra.mxu1 %v8861_v63  ;;  %v8993_v63 = vld [vmem:[#allocation11 + $0x1b0] ss:$24 sps:$4 sm:$0xff]   ;;  %v8996_v41 = vld [vmem:[#allocation11 + $0x180] ss:$24 sps:$4 sm:$0xff]  }
 0x2c1   :  { %4305 = vmatprep.subr.bf16.mxu1 %v8866_v40  ;;  %v8900_v40 = vld [vmem:[#allocation8 + $0x190] ss:$24 sps:$4 sm:$0xff]  }
 0x2c2   :  { %6193 = vmatpush1.bf16.msra.mxu0 %v8924_v20  ;;  %v8905_v20 = vld [vmem:[#allocation8 + $0x764] ss:$24 sps:$4 sm:$0xff]  }
 0x2c3   :  { %6194 = vmatprep.subr.bf16.mxu0 %v8932_v36  ;;  %v8903_v36 = vld [vmem:[#allocation8 + $0x760] ss:$24 sps:$4 sm:$0xff]  }
 0x2c4   :  { %4306 = vmatpush1.bf16.msra.mxu1 %v8864_v3  ;;  %v8908_v3 = vld [vmem:[#allocation8 + $0x734] ss:$24 sps:$4 sm:$0xff]  }
 0x2c5   :  { %4307 = vmatprep.subr.bf16.mxu1 %v8869_v42  ;;  %v8906_v42 = vld [vmem:[#allocation8 + $0x730] ss:$24 sps:$4 sm:$0xff]  }
 0x2c6   :  { %6195 = vmatpush1.bf16.msra.mxu0 %v8930_v43 }
 0x2c7   :  { %6196 = vmatprep.subr.bf16.mxu0 %v8938_v44  ;;  %v8911_v44 = vld [vmem:[#allocation8 + $0x704] ss:$24 sps:$4 sm:$0xff]  }
 0x2c8   :  { %4308 = vmatpush1.bf16.msra.mxu1 %v8867_v10 }
 0x2c9   :  { %4309 = vmatprep.subr.bf16.mxu1 %v8872_v27  ;;  %v8909_v27 = vld [vmem:[#allocation8 + $0x700] ss:$24 sps:$4 sm:$0xff]  }
 0x2ca   :  { %6197 = vmatpush1.bf16.msra.mxu0 %v8936_v45 }
 0x2cb   :  { %6198 = vmatprep.subr.bf16.mxu0 %v8944_v46  ;;  %v8917_v46 = vld [vmem:[#allocation8 + $0x6d4] ss:$24 sps:$4 sm:$0xff]  }
 0x2cc   :  { %4310 = vmatpush1.bf16.msra.mxu1 %v8870_v47 }
 0x2cd   :  { %4311 = vmatprep.subr.bf16.mxu1 %v8875_v49  ;;  %v8915_v49 = vld [vmem:[#allocation8 + $0x6d0] ss:$24 sps:$4 sm:$0xff]  }
 0x2ce   :  { %6199 = vmatpush1.bf16.msra.mxu0 %v8942_v50  ;;  %v8921_v50 = vld [vmem:[#allocation8 + $0x6a0] ss:$24 sps:$4 sm:$0xff]  }
 0x2cf   :  { %6200 = vmatprep.subr.bf16.mxu0 %v8950_v51  ;;  %v8927_v51 = vld [vmem:[#allocation8 + $0x670] ss:$24 sps:$4 sm:$0xff]  }
 0x2d0   :  { %4312 = vmatpush1.bf16.msra.mxu1 %v8873_v53  ;;  %v8935_v53 = vld [vmem:[#allocation8 + $0x644] ss:$24 sps:$4 sm:$0xff]  }
 0x2d1   :  { %4313 = vmatprep.subr.bf16.mxu1 %v8878_v54  ;;  %v8933_v54 = vld [vmem:[#allocation8 + $0x640] ss:$24 sps:$4 sm:$0xff]  }
 0x2d2   :  { %6201 = vmatpush1.bf16.msra.mxu0 %v8948_v56  ;;  %v8941_v56 = vld [vmem:[#allocation8 + $0x614] ss:$24 sps:$4 sm:$0xff]  }
 0x2d3   :  { %6202 = vmatprep.subr.bf16.mxu0 %v8956_v48  ;;  %v8939_v48 = vld [vmem:[#allocation8 + $0x610] ss:$24 sps:$4 sm:$0xff]  }
 0x2d4   :  { %4314 = vmatpush1.bf16.msra.mxu1 %v8876_v61  ;;  %v8947_v61 = vld [vmem:[#allocation8 + $0x8e4] ss:$24 sps:$4 sm:$0xff]  }
 0x2d5   :  { %4315 = vmatprep.subr.bf16.mxu1 %v8881_v62  ;;  %v8945_v62 = vld [vmem:[#allocation8 + $0x8e0] ss:$24 sps:$4 sm:$0xff]  }
 0x2d6   :  { %6203 = vmatpush1.bf16.msra.mxu0 %v8954_v52  ;;  %v8953_v52 = vld [vmem:[#allocation8 + $0x8b4] ss:$24 sps:$4 sm:$0xff]  }
 0x2d7   :  { %6204 = vmatprep.subr.bf16.mxu0 %v8962_v0  ;;  %v8951_v0 = vld [vmem:[#allocation8 + $0x8b0] ss:$24 sps:$4 sm:$0xff]  }
 0x2d8   :  { %4316 = vmatpush2.bf16.msra.mxu1 %v8879_v1  ;;  %v8959_v1 = vld [vmem:[#allocation8 + $0x884] ss:$24 sps:$4 sm:$0xff]  }
 0x2d9   :  { %4317 = vmatprep.subr.bf16.mxu1 %v8884_v2  ;;  %v8957_v2 = vld [vmem:[#allocation8 + $0x880] ss:$24 sps:$4 sm:$0xff]  }
 0x2da   :  { %6205 = vmatpush2.bf16.msra.mxu0 %v8960_v4  ;;  %v8965_v4 = vld [vmem:[#allocation8 + $0x854] ss:$24 sps:$4 sm:$0xff]  }
 0x2db   :  { %6206 = vmatprep.subr.bf16.mxu0 %v8968_v5  ;;  %v8963_v5 = vld [vmem:[#allocation8 + $0x850] ss:$24 sps:$4 sm:$0xff]  }
 0x2dc   :  { %4318 = vmatpush2.bf16.msra.mxu1 %v8882_v6  ;;  %v8971_v6 = vld [vmem:[#allocation8 + $0x824] ss:$24 sps:$4 sm:$0xff]  }
 0x2dd   :  { %4319 = vmatprep.subr.bf16.mxu1 %v8887_v8  ;;  %v8969_v8 = vld [vmem:[#allocation8 + $0x820] ss:$24 sps:$4 sm:$0xff]  }
 0x2de   :  { %6207 = vmatpush2.bf16.msra.mxu0 %v8966_v9  ;;  %v8977_v9 = vld [vmem:[#allocation8 + $0x7f4] ss:$24 sps:$4 sm:$0xff]  }
 0x2df   :  { %6208 = vmatprep.subr.bf16.mxu0 %v8974_v11  ;;  %v8975_v11 = vld [vmem:[#allocation8 + $0x7f0] ss:$24 sps:$4 sm:$0xff]  }
 0x2e0   :  { %4320 = vmatpush2.bf16.msra.mxu1 %v8885_v29  ;;  %v8983_v29 = vld [vmem:[#allocation8 + $0x7c4] ss:$24 sps:$4 sm:$0xff]  }
 0x2e1   :  { %4321 = vmatprep.subr.bf16.mxu1 %v8890_v13  ;;  %v8981_v13 = vld [vmem:[#allocation8 + $0x7c0] ss:$24 sps:$4 sm:$0xff]  }
 0x2e2   :  { %6209 = vmatpush2.bf16.msra.mxu0 %v8972_v14  ;;  %v8989_v14 = vld [vmem:[#allocation8 + $0x794] ss:$24 sps:$4 sm:$0xff]  }
 0x2e3   :  { %6210 = vmatprep.subr.bf16.mxu0 %v8980_v32  ;;  %v8987_v32 = vld [vmem:[#allocation8 + $0x790] ss:$24 sps:$4 sm:$0xff]  }
 0x2e4   :  { %4322 = vmatpush2.bf16.msra.mxu1 %v8888_v58  ;;  %v9001_v58 = vld [vmem:[#allocation11 + $0x454] ss:$24 sps:$4 sm:$0xff]  }
 0x2e5   :  { %4323 = vmatprep.subr.bf16.mxu1 %v8893_v15  ;;  %v8999_v15 = vld [vmem:[#allocation11 + $0x450] ss:$24 sps:$4 sm:$0xff]  }
 0x2e6   :  { %6211 = vmatpush2.bf16.msra.mxu0 %v8978_v17  ;;  %v9004_v17 = vld [vmem:[#allocation11 + $0x424] ss:$24 sps:$4 sm:$0xff]  }
 0x2e7   :  { %6212 = vmatprep.subr.bf16.mxu0 %v8986_v18 }
 0x2e8   :  { %4324 = vmatpush2.bf16.msra.mxu1 %v8891_v19  ;;  %v9002_v19 = vld [vmem:[#allocation11 + $0x420] ss:$24 sps:$4 sm:$0xff]  }
 0x2e9   :  { %4325 = vmatprep.subr.bf16.mxu1 %v8896_v21 }
 0x2ea   :  { %6213 = vmatpush2.bf16.msra.mxu0 %v8984_v22 }
 0x2eb   :  { %6214 = vmatprep.subr.bf16.mxu0 %v8992_v23 }
 0x2ec   :  { %4326 = vmatpush2.bf16.msra.mxu1 %v8894_v24  ;;  %v9007_v24 = vld [vmem:[#allocation11 + $0x3f4] ss:$24 sps:$4 sm:$0xff]  }
 0x2ed   :  { %4327 = vmatprep.subr.bf16.mxu1 %v8899_v25 }
 0x2ee   :  { %6215 = vmatpush2.bf16.msra.mxu0 %v8990_v26 }
 0x2ef   :  { %6216 = vmatprep.subr.bf16.mxu0 %v8995_v30 }
 0x2f0   :  { %4328 = vmatpush2.bf16.msra.mxu1 %v8897_v33 }
 0x2f1   :  { %4329 = vmatprep.subr.bf16.mxu1 %v8902_v39  ;;  %v9005_v39 = vld [vmem:[#allocation11 + $0x3f0] ss:$24 sps:$4 sm:$0xff]  }
 0x2f2   :  { %6217 = vmatpush2.bf16.msra.mxu0 %v8993_v63 }
 0x2f3   :  { %6218 = vmatprep.subr.bf16.mxu0 %v8998_v59 }
 0x2f4   :  { %4330 = vmatpush2.bf16.msra.mxu1 %v8900_v40  ;;  %v9097_v40 = vld [vmem:[#allocation11 + $0x754] ss:$24 sps:$4 sm:$0xff]  }
 0x2f5   :  { %4381 = vmatprep.subr.bf16.mxu1 %v8905_v20  ;;  %v9095_v20 = vld [vmem:[#allocation11 + $0x750] ss:$24 sps:$4 sm:$0xff]  }
 0x2f6   :  { %6219 = vmatpush2.bf16.msra.mxu0 %v8996_v41 }
 0x2f7   :  { %4332 = vmatmul.mubr.bf16.vlgmr.msra.gmra.mxu1 %v9797_v16  ;;  %v8923_v16 = vld [vmem:[#allocation8 + $0x6a4] ss:$24 sps:$4 sm:$0xff]   ;;  %6270 = vmatprep.subr.bf16.mxu0 %v9097_v40 }
 0x2f8   :  { %4382 = vmatpush1.bf16.msra.mxu1 %v8903_v36  ;;  %4413 = vmatprep.mubr.bf16.mxu1 %v9841_v57  ;;  %v8929_v57 = vld [vmem:[#allocation8 + $0x674] ss:$24 sps:$4 sm:$0xff]   ;;  %v9044_v40 = vld [vmem:[#allocation11 + $0x480] ss:$24 sps:$4 sm:$0xff]  }
 0x2f9   :  { %v9872_v43 = vpop.f32.mrf.mxu0  ;;  %4383 = vmatprep.subr.bf16.mxu1 %v8908_v3  ;;  %v9013_v36 = vld [vmem:[#allocation11 + $0x394] ss:$24 sps:$4 sm:$0xff]   ;;  %v9103_v3 = vld [vmem:[#allocation11 + $0x724] ss:$24 sps:$4 sm:$0xff]  }
 0x2fb   :  { %v9874_v10 = vpop.f32.mrf.mxu0 }
 0x2fc   :  { %4384 = vmatpush1.bf16.msra.mxu1 %v8906_v42  ;;  %v9101_v42 = vld [vmem:[#allocation11 + $0x720] ss:$24 sps:$4 sm:$0xff]  }
 0x2fd   :  { %v4214_v45 = vpop.f32.mrf.mxu0  ;;  %4385 = vmatprep.subr.bf16.mxu1 %v8911_v44  ;;  %v9011_v44 = vld [vmem:[#allocation11 + $0x390] ss:$24 sps:$4 sm:$0xff]  }
 0x2fe   :  { %v9109_v45 = vld [vmem:[#allocation11 + $0x6f4] ss:$24 sps:$4 sm:$0xff]  }
 0x2ff   :  { %v4215_v47 = vpop.f32.mrf.mxu0 }
 0x300   :  { %4386 = vmatpush1.bf16.msra.mxu1 %v8909_v27  ;;  %v9016_v27 = vld [vmem:[#allocation11 + $0x364] ss:$24 sps:$4 sm:$0xff]   ;;  %v9014_v47 = vld [vmem:[#allocation11 + $0x360] ss:$24 sps:$4 sm:$0xff]  }
 0x301   :  { %4387 = vmatprep.subr.bf16.mxu1 %v8917_v46  ;;  %v9107_v46 = vld [vmem:[#allocation11 + $0x6f0] ss:$24 sps:$4 sm:$0xff]  }
 0x304   :  { %4388 = vmatpush1.bf16.msra.mxu1 %v8915_v49  ;;  %v9019_v49 = vld [vmem:[#allocation11 + $0x334] ss:$24 sps:$4 sm:$0xff]  }
 0x305   :  { %4389 = vmatprep.subr.bf16.mxu1 %v8923_v16  ;;  %v9115_v16 = vld [vmem:[#allocation11 + $0x6c4] ss:$24 sps:$4 sm:$0xff]  }
 0x308   :  { %4390 = vmatpush1.bf16.msra.mxu1 %v8921_v50  ;;  %v9113_v50 = vld [vmem:[#allocation11 + $0x6c0] ss:$24 sps:$4 sm:$0xff]  }
 0x309   :  { %4391 = vmatprep.subr.bf16.mxu1 %v8929_v57  ;;  %v9017_v57 = vld [vmem:[#allocation11 + $0x330] ss:$24 sps:$4 sm:$0xff]  }
 0x30c   :  { %4392 = vmatpush1.bf16.msra.mxu1 %v8927_v51  ;;  %v9022_v51 = vld [vmem:[#allocation11 + $0x304] ss:$24 sps:$4 sm:$0xff]  }
 0x30d   :  { %4393 = vmatprep.subr.bf16.mxu1 %v8935_v53  ;;  %v9121_v53 = vld [vmem:[#allocation11 + $0x694] ss:$24 sps:$4 sm:$0xff]  }
 0x310   :  { %4394 = vmatpush1.bf16.msra.mxu1 %v8933_v54  ;;  %v9119_v54 = vld [vmem:[#allocation11 + $0x690] ss:$24 sps:$4 sm:$0xff]  }
 0x311   :  { %4395 = vmatprep.subr.bf16.mxu1 %v8941_v56  ;;  %v9020_v56 = vld [vmem:[#allocation11 + $0x300] ss:$24 sps:$4 sm:$0xff]  }
 0x314   :  { %4396 = vmatpush1.bf16.msra.mxu1 %v8939_v48  ;;  %v9025_v48 = vld [vmem:[#allocation11 + $0x5d4] ss:$24 sps:$4 sm:$0xff]  }
 0x315   :  { %4397 = vmatprep.subr.bf16.mxu1 %v8947_v61  ;;  %v9127_v61 = vld [vmem:[#allocation11 + $0x664] ss:$24 sps:$4 sm:$0xff]  }
 0x318   :  { %4398 = vmatpush2.bf16.msra.mxu1 %v8945_v62  ;;  %v9125_v62 = vld [vmem:[#allocation11 + $0x660] ss:$24 sps:$4 sm:$0xff]  }
 0x319   :  { %4399 = vmatprep.subr.bf16.mxu1 %v8953_v52  ;;  %v9023_v52 = vld [vmem:[#allocation11 + $0x5d0] ss:$24 sps:$4 sm:$0xff]  }
 0x31c   :  { %4400 = vmatpush2.bf16.msra.mxu1 %v8951_v0  ;;  %v9028_v0 = vld [vmem:[#allocation11 + $0x5a4] ss:$24 sps:$4 sm:$0xff]  }
 0x31d   :  { %4401 = vmatprep.subr.bf16.mxu1 %v8959_v1  ;;  %v9133_v1 = vld [vmem:[#allocation11 + $0x634] ss:$24 sps:$4 sm:$0xff]  }
 0x320   :  { %4402 = vmatpush2.bf16.msra.mxu1 %v8957_v2  ;;  %v9131_v2 = vld [vmem:[#allocation11 + $0x630] ss:$24 sps:$4 sm:$0xff]  }
 0x321   :  { %4403 = vmatprep.subr.bf16.mxu1 %v8965_v4  ;;  %v9026_v4 = vld [vmem:[#allocation11 + $0x5a0] ss:$24 sps:$4 sm:$0xff]  }
 0x324   :  { %4404 = vmatpush2.bf16.msra.mxu1 %v8963_v5  ;;  %v9031_v5 = vld [vmem:[#allocation11 + $0x574] ss:$24 sps:$4 sm:$0xff]  }
 0x325   :  { %4405 = vmatprep.subr.bf16.mxu1 %v8971_v6  ;;  %v9139_v6 = vld [vmem:[#allocation11 + $0x604] ss:$24 sps:$4 sm:$0xff]  }
 0x328   :  { %4406 = vmatpush2.bf16.msra.mxu1 %v8969_v8  ;;  %v9137_v8 = vld [vmem:[#allocation11 + $0x600] ss:$24 sps:$4 sm:$0xff]  }
 0x329   :  { %4407 = vmatprep.subr.bf16.mxu1 %v8977_v9  ;;  %v9029_v9 = vld [vmem:[#allocation11 + $0x570] ss:$24 sps:$4 sm:$0xff]  }
 0x32c   :  { %4408 = vmatpush2.bf16.msra.mxu1 %v8975_v11  ;;  %v9034_v11 = vld [vmem:[#allocation11 + $0x544] ss:$24 sps:$4 sm:$0xff]  }
 0x32d   :  { %4409 = vmatprep.subr.bf16.mxu1 %v8983_v29  ;;  %v9145_v29 = vld [vmem:[#allocation11 + $0x8d4] ss:$24 sps:$4 sm:$0xff]  }
 0x330   :  { %4410 = vmatpush2.bf16.msra.mxu1 %v8981_v13  ;;  %v9143_v13 = vld [vmem:[#allocation11 + $0x8d0] ss:$24 sps:$4 sm:$0xff]  }
 0x331   :  { %4411 = vmatprep.subr.bf16.mxu1 %v8989_v14  ;;  %v9032_v14 = vld [vmem:[#allocation11 + $0x540] ss:$24 sps:$4 sm:$0xff]  }
 0x334   :  { %4412 = vmatpush2.bf16.msra.mxu1 %v8987_v32  ;;  %v9037_v32 = vld [vmem:[#allocation11 + $0x514] ss:$24 sps:$4 sm:$0xff]  }
 0x335   :  { %6229 = vmatprep.subr.bf16.mxu1 %v9001_v58  ;;  %v9151_v58 = vld [vmem:[#allocation11 + $0x8a4] ss:$24 sps:$4 sm:$0xff]  }
 0x337   :  { %4414 = vmatmul.mubr.bf16.vlgmr.msra.gmra.mxu1 %v9843_v60  ;;  %v4169_v18 = vpop.f32.mrf.mxu1 }
 0x338   :  { %6230 = vmatpush1.bf16.msra.mxu1 %v8999_v15  ;;  %v4170_v21 = vadd.f32 %v4169_v18, %v9866_v28  ;;  %v9010_v28 = vld [vmem:[#allocation11 + $0x3c4] ss:$24 sps:$4 sm:$0xff]   ;;  %v9149_v15 = vld [vmem:[#allocation11 + $0x8a0] ss:$24 sps:$4 sm:$0xff]  }
 0x339   :  { %v9878_v22 = vpop.f32.mrf.mxu0  ;;  %v4171_v23 = vpop.f32.mrf.mxu1  ;;  %6231 = vmatprep.subr.bf16.mxu1 %v9004_v17  ;;  %v9035_v17 = vld [vmem:[#allocation11 + $0x510] ss:$24 sps:$4 sm:$0xff]   ;;  %v9040_v18 = vld [vmem:[#allocation11 + $0x4e4] ss:$24 sps:$4 sm:$0xff]  }
 0x33a   :  { %v4172_v25 = vadd.f32 %v4171_v23, %v9868_v7  ;;  %v9885_v60 = vpack.c.bf16 %v4170_v21, %v4170_v21  ;;  %v9008_v7 = vld [vmem:[#allocation11 + $0x3c0] ss:$24 sps:$4 sm:$0xff]   ;;  %v9155_v21 = vld [vmem:[#allocation11 + $0x870] ss:$24 sps:$4 sm:$0xff]  }
 0x33b   :  { %v9881_v26 = vpop.f32.mrf.mxu0  ;;  %v4173_v30 = vpop.f32.mrf.mxu1  ;;  %v9038_v23 = vld [vmem:[#allocation11 + $0x4e0] ss:$24 sps:$4 sm:$0xff]  }
 0x33c   :  { %v9883_v33 = vpack.c.bf16 %v4172_v25, %v4172_v25  ;;  %6232 = vmatpush1.bf16.msra.mxu1 %v9002_v19  ;;  %v9157_v19 = vld [vmem:[#allocation11 + $0x874] ss:$24 sps:$4 sm:$0xff]   ;;  %v9163_v25 = vld [vmem:[#allocation11 + $0x844] ss:$24 sps:$4 sm:$0xff]   ;;  %v9161_v30 = vld [vmem:[#allocation11 + $0x840] ss:$24 sps:$4 sm:$0xff]  }
 0x33d   :  { %v4296_v63 = vpop.f32.mrf.mxu0  ;;  %v4174_v59 = vpop.f32.mrf.mxu1  ;;  %6233 = vmatprep.subr.bf16.mxu1 %v9007_v24  ;;  %v9043_v24 = vld [vmem:[#allocation11 + $0x4b4] ss:$24 sps:$4 sm:$0xff]  }
 0x33e   :  { %6220 = vmatprep.mubr.bf16.mxu0 %v9883_v33  ;;  %v9046_v63 = vld [vmem:[#allocation11 + $0x484] ss:$24 sps:$4 sm:$0xff]   ;;  %v9169_v59 = vld [vmem:[#allocation11 + $0x814] ss:$24 sps:$4 sm:$0xff]  }
 0x33f   :  { %v4297_v41 = vpop.f32.mrf.mxu0  ;;  %6221 = vmatmul.mubr.bf16.vlgmr.msra.gmra.mxu0 %v9885_v60 }
 0x340   :  { %6234 = vmatpush1.bf16.msra.mxu1 %v9005_v39  ;;  %6271 = vmatpush1.bf16.msra.mxu0 %v9095_v20  ;;  %v9041_v39 = vld [vmem:[#allocation11 + $0x4b0] ss:$24 sps:$4 sm:$0xff]   ;;  %v9049_v20 = vld [vmem:[#allocation11 + $0x15c] ss:$24 sps:$4 sm:$0xff]  }
 0x341   :  { %6235 = vmatprep.subr.bf16.mxu1 %v9010_v28  ;;  %6272 = vmatprep.subr.bf16.mxu0 %v9103_v3  ;;  %v9167_v28 = vld [vmem:[#allocation11 + $0x810] ss:$24 sps:$4 sm:$0xff]   ;;  %v9175_v41 = vld [vmem:[#allocation11 + $0x7e4] ss:$24 sps:$4 sm:$0xff]   ;;  %v2598_v3 = vrot.slane %v9855_v12, %v9805_v35 }
 0x344   :  { %6236 = vmatpush1.bf16.msra.mxu1 %v9008_v7  ;;  %6273 = vmatpush1.bf16.msra.mxu0 %v9101_v42  ;;  %v2594_v7 = vrot.slane %v9855_v12, %v9802_v55  ;;  %v9181_v42 = vld [vmem:[#allocation11 + $0x7b4] ss:$24 sps:$4 sm:$0xff]  }
 0x345   :  { %6237 = vmatprep.subr.bf16.mxu1 %v9013_v36  ;;  %6274 = vmatprep.subr.bf16.mxu0 %v9109_v45  ;;  %v9173_v36 = vld [vmem:[#allocation11 + $0x7e0] ss:$24 sps:$4 sm:$0xff]  }
 0x348   :  { %6238 = vmatpush1.bf16.msra.mxu1 %v9011_v44  ;;  %6275 = vmatpush1.bf16.msra.mxu0 %v9107_v46  ;;  %v4211_v44 = vadd.f32 %v9872_v43, %v2594_v7  ;;  %v4213_v46 = vadd.f32 %v9874_v10, %v2598_v3  ;;  %v9193_v10 = vld [vmem:[#allocation11 + $0x45c] ss:$24 sps:$4 sm:$0xff]  }
 0x349   :  { %6239 = vmatprep.subr.bf16.mxu1 %v9016_v27  ;;  %6276 = vmatprep.subr.bf16.mxu0 %v9115_v16  ;;  %v9179_v27 = vld [vmem:[#allocation11 + $0x7b0] ss:$24 sps:$4 sm:$0xff]  }
 0x34c   :  { %6240 = vmatpush1.bf16.msra.mxu1 %v9014_v47  ;;  %6277 = vmatpush1.bf16.msra.mxu0 %v9113_v50  ;;  %v9187_v50 = vld [vmem:[#allocation11 + $0x784] ss:$24 sps:$4 sm:$0xff]  }
 0x34d   :  { %6241 = vmatprep.subr.bf16.mxu1 %v9019_v49  ;;  %6278 = vmatprep.subr.bf16.mxu0 %v9121_v53  ;;  %v9185_v53 = vld [vmem:[#allocation11 + $0x780] ss:$24 sps:$4 sm:$0xff]  }
 0x350   :  { %6242 = vmatpush1.bf16.msra.mxu1 %v9017_v57  ;;  %6279 = vmatpush1.bf16.msra.mxu0 %v9119_v54 }
 0x351   :  { %6243 = vmatprep.subr.bf16.mxu1 %v9022_v51  ;;  %6280 = vmatprep.subr.bf16.mxu0 %v9127_v61 }
 0x354   :  { %6244 = vmatpush1.bf16.msra.mxu1 %v9020_v56  ;;  %6281 = vmatpush1.bf16.msra.mxu0 %v9125_v62 }
 0x355   :  { %6245 = vmatprep.subr.bf16.mxu1 %v9025_v48  ;;  %6282 = vmatprep.subr.bf16.mxu0 %v9133_v1 }
 0x358   :  { %6246 = vmatpush2.bf16.msra.mxu1 %v9023_v52  ;;  %6283 = vmatpush1.bf16.msra.mxu0 %v9131_v2  ;;  %v9047_v52 = vld [vmem:[#allocation11 + $0x158] ss:$24 sps:$4 sm:$0xff]   ;;  %v9052_v2 = vld [vmem:[#allocation11 + $0x12c] ss:$24 sps:$4 sm:$0xff]  }
 0x359   :  { %6247 = vmatprep.subr.bf16.mxu1 %v9028_v0  ;;  %6284 = vmatprep.subr.bf16.mxu0 %v9139_v6  ;;  %v9056_v6 = vld [vmem:[#allocation11 + $0xc8] ss:$24 sps:$4 sm:$0xff]  }
 0x35c   :  { %6248 = vmatpush2.bf16.msra.mxu1 %v9026_v4  ;;  %6285 = vmatpush1.bf16.msra.mxu0 %v9137_v8  ;;  %v9053_v4 = vld [vmem:[#allocation11 + $0xf8] ss:$24 sps:$4 sm:$0xff]   ;;  %v9061_v8 = vld [vmem:[#allocation11 + $0x9c] ss:$24 sps:$4 sm:$0xff]  }
 0x35d   :  { %6249 = vmatprep.subr.bf16.mxu1 %v9031_v5  ;;  %6286 = vmatprep.subr.bf16.mxu0 %v9145_v29  ;;  %v9058_v5 = vld [vmem:[#allocation11 + $0xcc] ss:$24 sps:$4 sm:$0xff]   ;;  %v9062_v29 = vld [vmem:[#allocation11 + $0x68] ss:$24 sps:$4 sm:$0xff]  }
 0x360   :  { %6250 = vmatpush2.bf16.msra.mxu1 %v9029_v9  ;;  %6287 = vmatpush2.bf16.msra.mxu0 %v9143_v13  ;;  %v9059_v9 = vld [vmem:[#allocation11 + $0x98] ss:$24 sps:$4 sm:$0xff]   ;;  %v9067_v13 = vld [vmem:[#allocation11 + $0x3c] ss:$24 sps:$4 sm:$0xff]  }
 0x361   :  { %6251 = vmatprep.subr.bf16.mxu1 %v9034_v11  ;;  %6288 = vmatprep.subr.bf16.mxu0 %v9151_v58  ;;  %v9064_v11 = vld [vmem:[#allocation11 + $0x6c] ss:$24 sps:$4 sm:$0xff]   ;;  %v9068_v58 = vld [vmem:[#allocation11 + $0x8] ss:$24 sps:$4 sm:$0xff]  }
 0x364   :  { %6252 = vmatpush2.bf16.msra.mxu1 %v9032_v14  ;;  %6289 = vmatpush2.bf16.msra.mxu0 %v9149_v15  ;;  %v9065_v14 = vld [vmem:[#allocation11 + $0x38] ss:$24 sps:$4 sm:$0xff]   ;;  %v9073_v15 = vld [vmem:[#allocation11 + $0x2dc] ss:$24 sps:$4 sm:$0xff]  }
 0x365   :  { %6253 = vmatprep.subr.bf16.mxu1 %v9037_v32  ;;  %6290 = vmatprep.subr.bf16.mxu0 %v9157_v19  ;;  %v9070_v32 = vld [vmem:[#allocation11 + $0xc] ss:$24 sps:$4 sm:$0xff]   ;;  %v9074_v19 = vld [vmem:[#allocation11 + $0x2a8] ss:$24 sps:$4 sm:$0xff]  }
 0x368   :  { %6254 = vmatpush2.bf16.msra.mxu1 %v9035_v17  ;;  %6291 = vmatpush2.bf16.msra.mxu0 %v9155_v21  ;;  %v9071_v17 = vld [vmem:[#allocation11 + $0x2d8] ss:$24 sps:$4 sm:$0xff]   ;;  %v9079_v21 = vld [vmem:[#allocation11 + $0x27c] ss:$24 sps:$4 sm:$0xff]  }
 0x369   :  { %6255 = vmatprep.subr.bf16.mxu1 %v9040_v18  ;;  %6292 = vmatprep.subr.bf16.mxu0 %v9163_v25  ;;  %v9076_v18 = vld [vmem:[#allocation11 + $0x2ac] ss:$24 sps:$4 sm:$0xff]   ;;  %v9080_v25 = vld [vmem:[#allocation11 + $0x248] ss:$24 sps:$4 sm:$0xff]  }
 0x36c   :  { %6256 = vmatpush2.bf16.msra.mxu1 %v9038_v23  ;;  %6293 = vmatpush2.bf16.msra.mxu0 %v9161_v30  ;;  %v9077_v23 = vld [vmem:[#allocation11 + $0x278] ss:$24 sps:$4 sm:$0xff]   ;;  %v9085_v30 = vld [vmem:[#allocation11 + $0x21c] ss:$24 sps:$4 sm:$0xff]  }
 0x36d   :  { %6257 = vmatprep.subr.bf16.mxu1 %v9043_v24  ;;  %6294 = vmatprep.subr.bf16.mxu0 %v9169_v59  ;;  %v9082_v24 = vld [vmem:[#allocation11 + $0x24c] ss:$24 sps:$4 sm:$0xff]   ;;  %v9086_v59 = vld [vmem:[#allocation11 + $0x1e8] ss:$24 sps:$4 sm:$0xff]  }
 0x370   :  { %6258 = vmatpush2.bf16.msra.mxu1 %v9041_v39  ;;  %6295 = vmatpush2.bf16.msra.mxu0 %v9167_v28  ;;  %v9083_v39 = vld [vmem:[#allocation11 + $0x218] ss:$24 sps:$4 sm:$0xff]   ;;  %v9091_v28 = vld [vmem:[#allocation11 + $0x1bc] ss:$24 sps:$4 sm:$0xff]  }
 0x371   :  { %6259 = vmatprep.subr.bf16.mxu1 %v9046_v63  ;;  %6296 = vmatprep.subr.bf16.mxu0 %v9175_v41  ;;  %v9088_v63 = vld [vmem:[#allocation11 + $0x1ec] ss:$24 sps:$4 sm:$0xff]  }
 0x372   :  { %v9094_v41 = vld [vmem:[#allocation11 + $0x18c] ss:$24 sps:$4 sm:$0xff]  }
 0x374   :  { %6260 = vmatpush2.bf16.msra.mxu1 %v9044_v40  ;;  %6297 = vmatpush2.bf16.msra.mxu0 %v9173_v36  ;;  %v9089_v40 = vld [vmem:[#allocation11 + $0x1b8] ss:$24 sps:$4 sm:$0xff]   ;;  %v9092_v36 = vld [vmem:[#allocation11 + $0x188] ss:$24 sps:$4 sm:$0xff]  }
 0x375   :  { %6311 = vmatprep.subr.bf16.mxu1 %v9049_v20  ;;  %6298 = vmatprep.subr.bf16.mxu0 %v9181_v42  ;;  %v9100_v42 = vld [vmem:[#allocation11 + $0x75c] ss:$24 sps:$4 sm:$0xff]  }
 0x377   :  { %v4251_v45 = vpop.f32.mrf.mxu1 }
 0x378   :  { %v4252_v47 = vadd.f32 %v4251_v45, %v4211_v44  ;;  %6299 = vmatpush2.bf16.msra.mxu0 %v9179_v27  ;;  %v9098_v27 = vld [vmem:[#allocation11 + $0x758] ss:$24 sps:$4 sm:$0xff]   ;;  %v9106_v45 = vld [vmem:[#allocation11 + $0x72c] ss:$24 sps:$4 sm:$0xff]  }
 0x379   :  { %v4253_v49 = vpop.f32.mrf.mxu1  ;;  %v9895_v16 = vpop.f32.mrf.mxu0  ;;  %6300 = vmatprep.subr.bf16.mxu0 %v9187_v50  ;;  %v9118_v50 = vld [vmem:[#allocation11 + $0x6cc] ss:$24 sps:$4 sm:$0xff]  }
 0x37a   :  { %v4293_v57 = vadd.f32 %v9878_v22, %v4252_v47  ;;  %v4254_v51 = vadd.f32 %v4253_v49, %v4213_v46  ;;  %v9050_v22 = vld [vmem:[#allocation11 + $0x128] ss:$24 sps:$4 sm:$0xff]   ;;  %v9112_v47 = vld [vmem:[#allocation11 + $0x6fc] ss:$24 sps:$4 sm:$0xff]   ;;  %v9110_v49 = vld [vmem:[#allocation11 + $0x6f8] ss:$24 sps:$4 sm:$0xff]  }
 0x37b   :  { %v4255_v54 = vpop.f32.mrf.mxu1  ;;  %v9898_v56 = vpop.f32.mrf.mxu0  ;;  %v9104_v46 = vld [vmem:[#allocation11 + $0x728] ss:$24 sps:$4 sm:$0xff]  }
 0x37c   :  { %v4295_v43 = vadd.f32 %v9881_v26, %v4254_v51  ;;  %6301 = vmatpush2.bf16.msra.mxu0 %v9185_v53  ;;  %v9903_v0 = vpack.c.bf16 %v4293_v57, %v4293_v57  ;;  %v9055_v26 = vld [vmem:[#allocation11 + $0xfc] ss:$24 sps:$4 sm:$0xff]   ;;  %v9116_v57 = vld [vmem:[#allocation11 + $0x6c8] ss:$24 sps:$4 sm:$0xff]   ;;  %v9122_v53 = vld [vmem:[#allocation11 + $0x698] ss:$24 sps:$4 sm:$0xff]  }
 0x37d   :  { %v4256_v48 = vpop.f32.mrf.mxu1  ;;  %v4378_v61 = vpop.f32.mrf.mxu0  ;;  %6352 = vmatprep.subr.bf16.mxu0 %v9193_v10  ;;  %v9124_v51 = vld [vmem:[#allocation11 + $0x69c] ss:$24 sps:$4 sm:$0xff]   ;;  %v9130_v54 = vld [vmem:[#allocation11 + $0x66c] ss:$24 sps:$4 sm:$0xff]  }
 0x37e   :  { %v9901_v62 = vpack.c.bf16 %v4295_v43, %v4295_v43  ;;  %v9128_v43 = vld [vmem:[#allocation11 + $0x668] ss:$24 sps:$4 sm:$0xff]   ;;  %v9136_v48 = vld [vmem:[#allocation11 + $0x63c] ss:$24 sps:$4 sm:$0xff]   ;;  %v9134_v61 = vld [vmem:[#allocation11 + $0x638] ss:$24 sps:$4 sm:$0xff]  }
 0x37f   :  { %v4379_v1 = vpop.f32.mrf.mxu0  ;;  %v9142_v10 = vld [vmem:[#allocation11 + $0x60c] ss:$24 sps:$4 sm:$0xff]  }
 0x380   :  { %6261 = vmatprep.mubr.bf16.mxu1 %v9901_v62  ;;  %v9148_v1 = vld [vmem:[#allocation11 + $0x8dc] ss:$24 sps:$4 sm:$0xff]  }
 0x381   :  { %6262 = vmatmul.mubr.bf16.vlgmr.msra.gmra.mxu1 %v9903_v0 }
 0x382   :  { %6312 = vmatpush1.bf16.msra.mxu1 %v9047_v52  ;;  %6343 = vmatprep.mubr.bf16.mxu1 %v9883_v33  ;;  %v9140_v52 = vld [vmem:[#allocation11 + $0x608] ss:$24 sps:$4 sm:$0xff]  }
 0x383   :  { %6313 = vmatprep.subr.bf16.mxu1 %v9052_v2  ;;  %v9146_v2 = vld [vmem:[#allocation11 + $0x8d8] ss:$24 sps:$4 sm:$0xff]  }
 0x386   :  { %6314 = vmatpush1.bf16.msra.mxu1 %v9050_v22  ;;  %v9154_v22 = vld [vmem:[#allocation11 + $0x8ac] ss:$24 sps:$4 sm:$0xff]  }
 0x387   :  { %6315 = vmatprep.subr.bf16.mxu1 %v9055_v26  ;;  %v9152_v26 = vld [vmem:[#allocation11 + $0x8a8] ss:$24 sps:$4 sm:$0xff]  }
 0x38a   :  { %6316 = vmatpush1.bf16.msra.mxu1 %v9053_v4  ;;  %v9160_v4 = vld [vmem:[#allocation11 + $0x87c] ss:$24 sps:$4 sm:$0xff]  }
 0x38b   :  { %6317 = vmatprep.subr.bf16.mxu1 %v9058_v5  ;;  %v9158_v5 = vld [vmem:[#allocation11 + $0x878] ss:$24 sps:$4 sm:$0xff]  }
 0x38e   :  { %6318 = vmatpush1.bf16.msra.mxu1 %v9056_v6  ;;  %v9166_v6 = vld [vmem:[#allocation11 + $0x84c] ss:$24 sps:$4 sm:$0xff]  }
 0x38f   :  { %6319 = vmatprep.subr.bf16.mxu1 %v9061_v8  ;;  %v9164_v8 = vld [vmem:[#allocation11 + $0x848] ss:$24 sps:$4 sm:$0xff]  }
 0x392   :  { %6320 = vmatpush1.bf16.msra.mxu1 %v9059_v9  ;;  %v9172_v9 = vld [vmem:[#allocation11 + $0x81c] ss:$24 sps:$4 sm:$0xff]  }
 0x393   :  { %6321 = vmatprep.subr.bf16.mxu1 %v9064_v11  ;;  %v9170_v11 = vld [vmem:[#allocation11 + $0x818] ss:$24 sps:$4 sm:$0xff]  }
 0x396   :  { %6322 = vmatpush1.bf16.msra.mxu1 %v9062_v29  ;;  %v2602_v29 = vrot.slane %v9855_v12, %v9830_v31 }
 0x397   :  { %6323 = vmatprep.subr.bf16.mxu1 %v9067_v13  ;;  %v9178_v13 = vld [vmem:[#allocation11 + $0x7ec] ss:$24 sps:$4 sm:$0xff]  }
 0x39a   :  { %6324 = vmatpush1.bf16.msra.mxu1 %v9065_v14  ;;  %v2606_v14 = vrot.slane %v9855_v12, %v9833_v37 }
 0x39b   :  { %6325 = vmatprep.subr.bf16.mxu1 %v9070_v32  ;;  %v9176_v32 = vld [vmem:[#allocation11 + $0x7e8] ss:$24 sps:$4 sm:$0xff]  }
 0x39e   :  { %6326 = vmatpush1.bf16.msra.mxu1 %v9068_v58 }
 0x39f   :  { %6327 = vmatprep.subr.bf16.mxu1 %v9073_v15  ;;  %v9184_v15 = vld [vmem:[#allocation11 + $0x7bc] ss:$24 sps:$4 sm:$0xff]  }
 0x3a2   :  { %6328 = vmatpush2.bf16.msra.mxu1 %v9071_v17 }
 0x3a3   :  { %6329 = vmatprep.subr.bf16.mxu1 %v9076_v18  ;;  %v9182_v18 = vld [vmem:[#allocation11 + $0x7b8] ss:$24 sps:$4 sm:$0xff]  }
 0x3a6   :  { %6330 = vmatpush2.bf16.msra.mxu1 %v9074_v19 }
 0x3a7   :  { %6331 = vmatprep.subr.bf16.mxu1 %v9079_v21 }
 0x3aa   :  { %6332 = vmatpush2.bf16.msra.mxu1 %v9077_v23  ;;  %v9190_v23 = vld [vmem:[#allocation11 + $0x78c] ss:$24 sps:$4 sm:$0xff]  }
 0x3ab   :  { %6333 = vmatprep.subr.bf16.mxu1 %v9082_v24 }
 0x3ae   :  { %6334 = vmatpush2.bf16.msra.mxu1 %v9080_v25 }
 0x3af   :  { %6335 = vmatprep.subr.bf16.mxu1 %v9085_v30 }
 0x3b2   :  { %6336 = vmatpush2.bf16.msra.mxu1 %v9083_v39  ;;  %v9188_v39 = vld [vmem:[#allocation11 + $0x788] ss:$24 sps:$4 sm:$0xff]  }
 0x3b3   :  { %6337 = vmatprep.subr.bf16.mxu1 %v9088_v63 }
 0x3b6   :  { %6338 = vmatpush2.bf16.msra.mxu1 %v9086_v59 }
 0x3b7   :  { %v9908_v20 = vpop.f32.mrf.mxu1  ;;  %6339 = vmatprep.subr.bf16.mxu1 %v9091_v28  ;;  %v9191_v28 = vld [vmem:[#allocation11 + $0x458] ss:$24 sps:$4 sm:$0xff]  }
 0x3b8   :  { %v4334_v58 = vadd.f32 %v9908_v20, %v2602_v29  ;;  %v9236_v29 = vld [vmem:[#allocation11 + $0x310] ss:$24 sps:$4 sm:$0xff]  }
 0x3b9   :  { %v9910_v7 = vpop.f32.mrf.mxu1 }
 0x3ba   :  { %6340 = vmatpush2.bf16.msra.mxu1 %v9089_v40  ;;  %v4336_v17 = vadd.f32 %v9910_v7, %v2606_v14  ;;  %v4375_v19 = vadd.f32 %v9895_v16, %v4334_v58  ;;  %v9194_v16 = vld [vmem:[#allocation11 + $0x460] ss:$24 sps:$4 sm:$0xff]   ;;  %v9199_v7 = vld [vmem:[#allocation11 + $0x42c] ss:$24 sps:$4 sm:$0xff]  }
 0x3bb   :  { %v4337_v3 = vpop.f32.mrf.mxu1  ;;  %6341 = vmatprep.subr.bf16.mxu1 %v9094_v41  ;;  %v9196_v41 = vld [vmem:[#allocation11 + $0x464] ss:$24 sps:$4 sm:$0xff]   ;;  %v9239_v14 = vld [vmem:[#allocation11 + $0x5d8] ss:$24 sps:$4 sm:$0xff]  }
 0x3bc   :  { %v4377_v24 = vadd.f32 %v9898_v56, %v4336_v17  ;;  %v9197_v3 = vld [vmem:[#allocation11 + $0x428] ss:$24 sps:$4 sm:$0xff]  }
 0x3bd   :  { %v4338_v44 = vpop.f32.mrf.mxu1  ;;  %v9242_v58 = vld [vmem:[#allocation11 + $0x5e0] ss:$24 sps:$4 sm:$0xff]  }
 0x3be   :  { %6342 = vmatpush2.bf16.msra.mxu1 %v9092_v36  ;;  %v9202_v36 = vld [vmem:[#allocation11 + $0x434] ss:$24 sps:$4 sm:$0xff]   ;;  %v9245_v17 = vld [vmem:[#allocation11 + $0x5a8] ss:$24 sps:$4 sm:$0xff]  }
 0x3bf   :  { %6393 = vmatprep.subr.bf16.mxu1 %v9100_v42  ;;  %v9205_v44 = vld [vmem:[#allocation11 + $0x3fc] ss:$24 sps:$4 sm:$0xff]  }
 0x3c1   :  { %6344 = vmatmul.mubr.bf16.vlgmr.msra.gmra.mxu1 %v9885_v60 }
 0x3c2   :  { %6394 = vmatpush1.bf16.msra.mxu1 %v9098_v27  ;;  %v9200_v27 = vld [vmem:[#allocation11 + $0x430] ss:$24 sps:$4 sm:$0xff]  }
 0x3c3   :  { %6395 = vmatprep.subr.bf16.mxu1 %v9106_v45 }
 0x3c6   :  { %6396 = vmatpush1.bf16.msra.mxu1 %v9104_v46  ;;  %v9208_v46 = vld [vmem:[#allocation11 + $0x404] ss:$24 sps:$4 sm:$0xff]  }
 0x3c7   :  { %6397 = vmatprep.subr.bf16.mxu1 %v9112_v47  ;;  %v9203_v47 = vld [vmem:[#allocation11 + $0x3f8] ss:$24 sps:$4 sm:$0xff]  }
 0x3ca   :  { %6398 = vmatpush1.bf16.msra.mxu1 %v9110_v49 }
 0x3cb   :  { %6399 = vmatprep.subr.bf16.mxu1 %v9118_v50  ;;  %v9211_v50 = vld [vmem:[#allocation11 + $0x3cc] ss:$24 sps:$4 sm:$0xff]  }
 0x3ce   :  { %6400 = vmatpush1.bf16.msra.mxu1 %v9116_v57  ;;  %v9206_v57 = vld [vmem:[#allocation11 + $0x400] ss:$24 sps:$4 sm:$0xff]  }
 0x3cf   :  { %6401 = vmatprep.subr.bf16.mxu1 %v9124_v51  ;;  %v9214_v51 = vld [vmem:[#allocation11 + $0x3d4] ss:$24 sps:$4 sm:$0xff]  }
 0x3d2   :  { %6402 = vmatpush1.bf16.msra.mxu1 %v9122_v53  ;;  %v9209_v53 = vld [vmem:[#allocation11 + $0x3c8] ss:$24 sps:$4 sm:$0xff]  }
 0x3d3   :  { %6403 = vmatprep.subr.bf16.mxu1 %v9130_v54  ;;  %v9217_v54 = vld [vmem:[#allocation11 + $0x39c] ss:$24 sps:$4 sm:$0xff]  }
 0x3d6   :  { %6404 = vmatpush1.bf16.msra.mxu1 %v9128_v43  ;;  %v9220_v43 = vld [vmem:[#allocation11 + $0x3a4] ss:$24 sps:$4 sm:$0xff]  }
 0x3d7   :  { %6405 = vmatprep.subr.bf16.mxu1 %v9136_v48  ;;  %v9215_v48 = vld [vmem:[#allocation11 + $0x398] ss:$24 sps:$4 sm:$0xff]  }
 0x3da   :  { %6406 = vmatpush1.bf16.msra.mxu1 %v9134_v61  ;;  %v9223_v61 = vld [vmem:[#allocation11 + $0x36c] ss:$24 sps:$4 sm:$0xff]  }
 0x3db   :  { %6407 = vmatprep.subr.bf16.mxu1 %v9142_v10  ;;  %v9218_v10 = vld [vmem:[#allocation11 + $0x3a0] ss:$24 sps:$4 sm:$0xff]  }
 0x3de   :  { %6408 = vmatpush1.bf16.msra.mxu1 %v9140_v52  ;;  %v9226_v52 = vld [vmem:[#allocation11 + $0x374] ss:$24 sps:$4 sm:$0xff]  }
 0x3df   :  { %6409 = vmatprep.subr.bf16.mxu1 %v9148_v1  ;;  %v9221_v1 = vld [vmem:[#allocation11 + $0x368] ss:$24 sps:$4 sm:$0xff]  }
 0x3e2   :  { %6410 = vmatpush2.bf16.msra.mxu1 %v9146_v2  ;;  %v9229_v2 = vld [vmem:[#allocation11 + $0x33c] ss:$24 sps:$4 sm:$0xff]  }
 0x3e3   :  { %6411 = vmatprep.subr.bf16.mxu1 %v9154_v22  ;;  %v9224_v22 = vld [vmem:[#allocation11 + $0x370] ss:$24 sps:$4 sm:$0xff]  }
 0x3e6   :  { %6412 = vmatpush2.bf16.msra.mxu1 %v9152_v26  ;;  %v9232_v26 = vld [vmem:[#allocation11 + $0x344] ss:$24 sps:$4 sm:$0xff]  }
 0x3e7   :  { %6413 = vmatprep.subr.bf16.mxu1 %v9160_v4  ;;  %v9227_v4 = vld [vmem:[#allocation11 + $0x338] ss:$24 sps:$4 sm:$0xff]  }
 0x3ea   :  { %6414 = vmatpush2.bf16.msra.mxu1 %v9158_v5  ;;  %v9235_v5 = vld [vmem:[#allocation11 + $0x30c] ss:$24 sps:$4 sm:$0xff]  }
 0x3eb   :  { %6415 = vmatprep.subr.bf16.mxu1 %v9166_v6  ;;  %v9230_v6 = vld [vmem:[#allocation11 + $0x340] ss:$24 sps:$4 sm:$0xff]  }
 0x3ee   :  { %6416 = vmatpush2.bf16.msra.mxu1 %v9164_v8  ;;  %v9238_v8 = vld [vmem:[#allocation11 + $0x314] ss:$24 sps:$4 sm:$0xff]  }
 0x3ef   :  { %6417 = vmatprep.subr.bf16.mxu1 %v9172_v9  ;;  %v9233_v9 = vld [vmem:[#allocation11 + $0x308] ss:$24 sps:$4 sm:$0xff]  }
 0x3f2   :  { %6418 = vmatpush2.bf16.msra.mxu1 %v9170_v11  ;;  %v9241_v11 = vld [vmem:[#allocation11 + $0x5dc] ss:$24 sps:$4 sm:$0xff]  }
 0x3f3   :  { %6419 = vmatprep.subr.bf16.mxu1 %v9178_v13  ;;  %v9244_v13 = vld [vmem:[#allocation11 + $0x5e4] ss:$24 sps:$4 sm:$0xff]  }
 0x3f6   :  { %6420 = vmatpush2.bf16.msra.mxu1 %v9176_v32  ;;  %v9247_v32 = vld [vmem:[#allocation11 + $0x5ac] ss:$24 sps:$4 sm:$0xff]  }
 0x3f7   :  { %v4415_v21 = vpop.f32.mrf.mxu1  ;;  %6421 = vmatprep.subr.bf16.mxu1 %v9184_v15  ;;  %v9250_v15 = vld [vmem:[#allocation11 + $0x5b4] ss:$24 sps:$4 sm:$0xff]  }
 0x3f8   :  { %v4416_v25 = vadd.f32 %v4415_v21, %v4375_v19  ;;  %v9248_v19 = vld [vmem:[#allocation11 + $0x5b0] ss:$24 sps:$4 sm:$0xff]   ;;  %v9256_v21 = vld [vmem:[#allocation11 + $0x584] ss:$24 sps:$4 sm:$0xff]  }
 0x3f9   :  { %v4417_v30 = vpop.f32.mrf.mxu1 }
 0x3fa   :  { %v4418_v12 = vadd.f32 %v4417_v30, %v4377_v24  ;;  %6422 = vmatpush2.bf16.msra.mxu1 %v9182_v18  ;;  %v9923_v40 = vpack.c.bf16 %v4416_v25, %v4416_v25  ;;  %v9253_v18 = vld [vmem:[#allocation11 + $0x57c] ss:$24 sps:$4 sm:$0xff]   ;;  %v9259_v24 = vld [vmem:[#allocation11 + $0x54c] ss:$24 sps:$4 sm:$0xff]   ;;  %v9254_v25 = vld [vmem:[#allocation11 + $0x580] ss:$24 sps:$4 sm:$0xff]  }
 0x3fb   :  { %v4419_v63 = vpop.f32.mrf.mxu1  ;;  %6423 = vmatprep.subr.bf16.mxu1 %v9190_v23  ;;  %v9251_v23 = vld [vmem:[#allocation11 + $0x578] ss:$24 sps:$4 sm:$0xff]   ;;  %v9262_v30 = vld [vmem:[#allocation11 + $0x554] ss:$24 sps:$4 sm:$0xff]  }
 0x3fc   :  { %v9921_v59 = vpack.c.bf16 %v4418_v12, %v4418_v12  ;;  %v9257_v12 = vld [vmem:[#allocation11 + $0x548] ss:$24 sps:$4 sm:$0xff]  }
 0x3fd   :  { %v4420_v20 = vpop.f32.mrf.mxu1  ;;  %v9260_v63 = vld [vmem:[#allocation11 + $0x550] ss:$24 sps:$4 sm:$0xff]  }
 0x3fe   :  { %6424 = vmatpush2.bf16.msra.mxu1 %v9188_v39  ;;  %6302 = vmatprep.mubr.bf16.mxu0 %v9921_v59  ;;  %v9265_v39 = vld [vmem:[#allocation11 + $0x51c] ss:$24 sps:$4 sm:$0xff]   ;;  %v9263_v20 = vld [vmem:[#allocation11 + $0x518] ss:$24 sps:$4 sm:$0xff]  }
 0x3ff   :  { %6425 = vmatprep.mubr.bf16.mxu1 %v9921_v59  ;;  %6303 = vmatmul.mubr.bf16.vlgmr.msra.gmra.mxu0 %v9923_v40  ;;  %v9928_v56 = vpop.f32.mrf.mxu0 }
 0x400   :  { %6353 = vmatpush1.bf16.msra.mxu0 %v9191_v28  ;;  %6384 = vmatprep.mubr.bf16.mxu0 %v9901_v62  ;;  %v9268_v28 = vld [vmem:[#allocation11 + $0x524] ss:$24 sps:$4 sm:$0xff]  }
 0x401   :  { %6426 = vmatmul.mubr.bf16.vlgmr.msra.gmra.mxu1 %v9923_v40  ;;  %6475 = vmatprep.subr.bf16.mxu1 %v9196_v41  ;;  %v9932_v42 = vpop.f32.mrf.mxu0  ;;  %v9271_v41 = vld [vmem:[#allocation11 + $0x4ec] ss:$24 sps:$4 sm:$0xff]  }
 0x402   :  { %6476 = vmatpush1.bf16.msra.mxu1 %v9194_v16  ;;  %6507 = vmatprep.mubr.bf16.mxu1 %v9901_v62  ;;  %v9212_v62 = vld [vmem:[#allocation11 + $0x3d0] ss:$24 sps:$4 sm:$0xff]   ;;  %v9266_v16 = vld [vmem:[#allocation11 + $0x520] ss:$24 sps:$4 sm:$0xff]  }
 0x403   :  { %6354 = vmatprep.subr.bf16.mxu0 %v9199_v7  ;;  %v6226_v45 = vpop.f32.mrf.mxu0  ;;  %6477 = vmatprep.subr.bf16.mxu1 %v9202_v36  ;;  %v9274_v7 = vld [vmem:[#allocation11 + $0x4f4] ss:$24 sps:$4 sm:$0xff]   ;;  %v9269_v36 = vld [vmem:[#allocation11 + $0x4e8] ss:$24 sps:$4 sm:$0xff]  }
 0x404   :  { %6355 = vmatpush1.bf16.msra.mxu0 %v9197_v3  ;;  %v9277_v3 = vld [vmem:[#allocation11 + $0x4bc] ss:$24 sps:$4 sm:$0xff]   ;;  %v9275_v45 = vld [vmem:[#allocation11 + $0x4b8] ss:$24 sps:$4 sm:$0xff]  }
 0x405   :  { %v6227_v49 = vpop.f32.mrf.mxu0  ;;  %6356 = vmatprep.subr.bf16.mxu0 %v9205_v44  ;;  %v9272_v44 = vld [vmem:[#allocation11 + $0x4f0] ss:$24 sps:$4 sm:$0xff]  }
 0x406   :  { %6478 = vmatpush1.bf16.msra.mxu1 %v9200_v27  ;;  %v9280_v27 = vld [vmem:[#allocation11 + $0x4c4] ss:$24 sps:$4 sm:$0xff]   ;;  %v9286_v49 = vld [vmem:[#allocation11 + $0x494] ss:$24 sps:$4 sm:$0xff]  }
 0x407   :  { %6479 = vmatprep.subr.bf16.mxu1 %v9208_v46  ;;  %v9283_v46 = vld [vmem:[#allocation11 + $0x48c] ss:$24 sps:$4 sm:$0xff]  }
 0x408   :  { %6357 = vmatpush1.bf16.msra.mxu0 %v9203_v47  ;;  %v9278_v47 = vld [vmem:[#allocation11 + $0x4c0] ss:$24 sps:$4 sm:$0xff]  }
 0x409   :  { %6358 = vmatprep.subr.bf16.mxu0 %v9211_v50  ;;  %v9281_v50 = vld [vmem:[#allocation11 + $0x488] ss:$24 sps:$4 sm:$0xff]  }
 0x40a   :  { %6480 = vmatpush1.bf16.msra.mxu1 %v9206_v57  ;;  %v9935_v57 = vld [vmem:[#allocation13] sm:$0x3f] }
 0x40b   :  { %6481 = vmatprep.subr.bf16.mxu1 %v9214_v51  ;;  %v9289_v51 = vld [vmem:[#allocation11 + $0x164] ss:$24 sps:$4 sm:$0xff]  }
 0x40c   :  { %6359 = vmatpush1.bf16.msra.mxu0 %v9209_v53  ;;  %v9284_v53 = vld [vmem:[#allocation11 + $0x490] ss:$24 sps:$4 sm:$0xff]  }
 0x40d   :  { %6360 = vmatprep.subr.bf16.mxu0 %v9217_v54  ;;  %v9368_v54 = vld [vmem:[#allocation14 + $0x78] sm:$0xff]  }
 0x40e   :  { %6482 = vmatpush1.bf16.msra.mxu1 %v9212_v62  ;;  %v4721_v62 = vrot.slane %v9935_v57, %v9777_v34 }
 0x40f   :  { %6483 = vmatprep.subr.bf16.mxu1 %v9220_v43  ;;  %v9287_v43 = vld [vmem:[#allocation11 + $0x160] ss:$24 sps:$4 sm:$0xff]  }
 0x410   :  { %6361 = vmatpush1.bf16.msra.mxu0 %v9215_v48  ;;  %v9292_v48 = vld [vmem:[#allocation11 + $0x134] ss:$24 sps:$4 sm:$0xff]  }
 0x411   :  { %6362 = vmatprep.subr.bf16.mxu0 %v9223_v61  ;;  %v4725_v61 = vrot.slane %v9935_v57, %v9780_v38 }
 0x412   :  { %6484 = vmatpush1.bf16.msra.mxu1 %v9218_v10  ;;  %v9369_v10 = vld [vmem:[#allocation14 + $0x38] sm:$0xff]  }
 0x413   :  { %6485 = vmatprep.subr.bf16.mxu1 %v9226_v52  ;;  %v9373_v52 = vld [vmem:[#allocation14 + $0x70] sm:$0xff]  }
 0x414   :  { %6363 = vmatpush1.bf16.msra.mxu0 %v9221_v1  ;;  %v6223_v1 = vadd.f32 %v9928_v56, %v4721_v62  ;;  %v9293_v56 = vld [vmem:[#allocation11 + $0x100] ss:$24 sps:$4 sm:$0xff]   ;;  %v9332_v62 = vld [vmem:[#allocation11 + $0x190] ss:$24 sps:$4 sm:$0xff]  }
 0x415   :  { %6364 = vmatprep.subr.bf16.mxu0 %v9229_v2  ;;  %v9290_v2 = vld [vmem:[#allocation11 + $0x130] ss:$24 sps:$4 sm:$0xff]  }
 0x416   :  { %6486 = vmatpush1.bf16.msra.mxu1 %v9224_v22  ;;  %v9295_v22 = vld [vmem:[#allocation11 + $0x104] ss:$24 sps:$4 sm:$0xff]  }
 0x417   :  { %6487 = vmatprep.subr.bf16.mxu1 %v9232_v26  ;;  %v6225_v26 = vadd.f32 %v9932_v42, %v4725_v61  ;;  %v9296_v42 = vld [vmem:[#allocation11 + $0xd0] ss:$24 sps:$4 sm:$0xff]   ;;  %v9340_v61 = vld [vmem:[#allocation11 + $0x734] ss:$24 sps:$4 sm:$0xff]  }
 0x418   :  { %6365 = vmatpush1.bf16.msra.mxu0 %v9227_v4  ;;  %v9374_v4 = vld [vmem:[#allocation14 + $0x30] sm:$0xff]  }
 0x419   :  { %6366 = vmatprep.subr.bf16.mxu0 %v9235_v5 }
 0x41a   :  { %6488 = vmatpush1.bf16.msra.mxu1 %v9230_v6  ;;  %v9378_v6 = vld [vmem:[#allocation14 + $0x68] sm:$0xff]  }
 0x41b   :  { %6489 = vmatprep.subr.bf16.mxu1 %v9238_v8 }
 0x41c   :  { %6367 = vmatpush1.bf16.msra.mxu0 %v9233_v9  ;;  %v9298_v9 = vld [vmem:[#allocation11 + $0xd4] ss:$24 sps:$4 sm:$0xff]  }
 0x41d   :  { %6368 = vmatprep.subr.bf16.mxu0 %v9241_v11 }
 0x41e   :  { %6490 = vmatpush1.bf16.msra.mxu1 %v9236_v29  ;;  %v9383_v29 = vld [vmem:[#allocation14 + $0x60] sm:$0xff]  }
 0x41f   :  { %6491 = vmatprep.subr.bf16.mxu1 %v9244_v13  ;;  %v9301_v13 = vld [vmem:[#allocation11 + $0xa4] ss:$24 sps:$4 sm:$0xff]  }
 0x420   :  { %6369 = vmatpush2.bf16.msra.mxu0 %v9239_v14  ;;  %v9384_v14 = vld [vmem:[#allocation14 + $0x20] sm:$0xff]  }
 0x421   :  { %6370 = vmatprep.subr.bf16.mxu0 %v9247_v32  ;;  %v9388_v32 = vld [vmem:[#allocation14 + $0x58] sm:$0xff]  }
 0x422   :  { %6492 = vmatpush2.bf16.msra.mxu1 %v9242_v58  ;;  %v9299_v58 = vld [vmem:[#allocation11 + $0xa0] ss:$24 sps:$4 sm:$0xff]  }
 0x423   :  { %6493 = vmatprep.subr.bf16.mxu1 %v9250_v15  ;;  %v9304_v15 = vld [vmem:[#allocation11 + $0x74] ss:$24 sps:$4 sm:$0xff]  }
 0x424   :  { %6371 = vmatpush2.bf16.msra.mxu0 %v9245_v17  ;;  %v9389_v17 = vld [vmem:[#allocation14 + $0x18] sm:$0xff]  }
 0x425   :  { %6372 = vmatprep.subr.bf16.mxu0 %v9253_v18  ;;  %v9393_v18 = vld [vmem:[#allocation14 + $0x50] sm:$0xff]  }
 0x426   :  { %6494 = vmatpush2.bf16.msra.mxu1 %v9248_v19  ;;  %v9302_v19 = vld [vmem:[#allocation11 + $0x70] ss:$24 sps:$4 sm:$0xff]  }
 0x427   :  { %6495 = vmatprep.subr.bf16.mxu1 %v9256_v21  ;;  %v9307_v21 = vld [vmem:[#allocation11 + $0x44] ss:$24 sps:$4 sm:$0xff]  }
 0x428   :  { %6373 = vmatpush2.bf16.msra.mxu0 %v9251_v23  ;;  %v9394_v23 = vld [vmem:[#allocation14 + $0x10] sm:$0xff]  }
 0x429   :  { %6374 = vmatprep.subr.bf16.mxu0 %v9259_v24  ;;  %v9395_v24 = vld [vmem:[#allocation14 + $0x48] sm:$0xff]  }
 0x42a   :  { %6496 = vmatpush2.bf16.msra.mxu1 %v9254_v25  ;;  %v9305_v25 = vld [vmem:[#allocation11 + $0x40] ss:$24 sps:$4 sm:$0xff]  }
 0x42b   :  { %6497 = vmatprep.subr.bf16.mxu1 %v9262_v30  ;;  %v9310_v30 = vld [vmem:[#allocation11 + $0x14] ss:$24 sps:$4 sm:$0xff]  }
 0x42c   :  { %6375 = vmatpush2.bf16.msra.mxu0 %v9257_v12  ;;  %v9396_v12 = vld [vmem:[#allocation14 + $0x8] sm:$0xff]  }
 0x42d   :  { %6376 = vmatprep.subr.bf16.mxu0 %v9265_v39  ;;  %v9397_v39 = vld [vmem:[#allocation14 + $0x40] sm:$0xff]  }
 0x42e   :  { %6498 = vmatpush2.bf16.msra.mxu1 %v9260_v63  ;;  %v9308_v63 = vld [vmem:[#allocation11 + $0x10] ss:$24 sps:$4 sm:$0xff]  }
 0x42f   :  { %6499 = vmatprep.subr.bf16.mxu1 %v9268_v28  ;;  %v9313_v28 = vld [vmem:[#allocation11 + $0x2e4] ss:$24 sps:$4 sm:$0xff]  }
 0x430   :  { %6377 = vmatpush2.bf16.msra.mxu0 %v9263_v20  ;;  %v9398_v20 = vld [vmem:[#allocation14] sm:$0xff]  }
 0x431   :  { %6378 = vmatprep.subr.bf16.mxu0 %v9271_v41  ;;  %v9399_v41 = vld [vmem:[#allocation14 + $0xf8] sm:$0xff]  }
 0x432   :  { %6500 = vmatpush2.bf16.msra.mxu1 %v9266_v16  ;;  %v9311_v16 = vld [vmem:[#allocation11 + $0x2e0] ss:$24 sps:$4 sm:$0xff]  }
 0x433   :  { %6501 = vmatprep.subr.bf16.mxu1 %v9274_v7  ;;  %v9316_v7 = vld [vmem:[#allocation11 + $0x2b4] ss:$24 sps:$4 sm:$0xff]  }
 0x434   :  { %6379 = vmatpush2.bf16.msra.mxu0 %v9269_v36  ;;  %v9314_v36 = vld [vmem:[#allocation11 + $0x2b0] ss:$24 sps:$4 sm:$0xff]  }
 0x435   :  { %6380 = vmatprep.subr.bf16.mxu0 %v9277_v3  ;;  %v9319_v3 = vld [vmem:[#allocation11 + $0x284] ss:$24 sps:$4 sm:$0xff]  }
 0x436   :  { %6502 = vmatpush2.bf16.msra.mxu1 %v9272_v44  ;;  %v9317_v44 = vld [vmem:[#allocation11 + $0x280] ss:$24 sps:$4 sm:$0xff]  }
 0x437   :  { %6503 = vmatprep.subr.bf16.mxu1 %v9280_v27  ;;  %v9322_v27 = vld [vmem:[#allocation11 + $0x254] ss:$24 sps:$4 sm:$0xff]  }
 0x438   :  { %6381 = vmatpush2.bf16.msra.mxu0 %v9275_v45  ;;  %v9320_v45 = vld [vmem:[#allocation11 + $0x250] ss:$24 sps:$4 sm:$0xff]  }
 0x439   :  { %6382 = vmatprep.subr.bf16.mxu0 %v9283_v46  ;;  %v9325_v46 = vld [vmem:[#allocation11 + $0x224] ss:$24 sps:$4 sm:$0xff]  }
 0x43a   :  { %6504 = vmatpush2.bf16.msra.mxu1 %v9278_v47  ;;  %v9323_v47 = vld [vmem:[#allocation11 + $0x220] ss:$24 sps:$4 sm:$0xff]  }
 0x43b   :  { %6505 = vmatprep.subr.bf16.mxu1 %v9286_v49  ;;  %v9328_v49 = vld [vmem:[#allocation11 + $0x1f4] ss:$24 sps:$4 sm:$0xff]  }
 0x43c   :  { %6383 = vmatpush2.bf16.msra.mxu0 %v9281_v50  ;;  %v9326_v50 = vld [vmem:[#allocation11 + $0x1f0] ss:$24 sps:$4 sm:$0xff]  }
 0x43d   :  { %6434 = vmatprep.subr.bf16.mxu0 %v9289_v51  ;;  %v9331_v51 = vld [vmem:[#allocation11 + $0x1c4] ss:$24 sps:$4 sm:$0xff]  }
 0x43e   :  { %6506 = vmatpush2.bf16.msra.mxu1 %v9284_v53  ;;  %v9329_v53 = vld [vmem:[#allocation11 + $0x1c0] ss:$24 sps:$4 sm:$0xff]  }
 0x43f   :  { %6385 = vmatmul.mubr.bf16.vlgmr.msra.gmra.mxu0 %v9903_v0  ;;  %8007 = vmatprep.subr.bf16.mxu1 %v9368_v54  ;;  %v9334_v54 = vld [vmem:[#allocation11 + $0x194] ss:$24 sps:$4 sm:$0xff]  }
 0x440   :  { %6435 = vmatpush1.bf16.msra.mxu0 %v9287_v43  ;;  %6466 = vmatprep.mubr.bf16.mxu0 %v9883_v33  ;;  %v9337_v43 = vld [vmem:[#allocation11 + $0x764] ss:$24 sps:$4 sm:$0xff]  }
 0x441   :  { %6508 = vmatmul.mubr.bf16.vlgmr.msra.gmra.mxu1 %v9903_v0  ;;  %v6263_v34 = vpop.f32.mrf.mxu1  ;;  %6436 = vmatprep.subr.bf16.mxu0 %v9292_v48  ;;  %v9379_v0 = vld [vmem:[#allocation14 + $0x28] sm:$0xff]   ;;  %v9335_v48 = vld [vmem:[#allocation11 + $0x760] ss:$24 sps:$4 sm:$0xff]  }
 0x442   :  { %v9946_v38 = vadd.f32 %v6263_v34, %v6223_v1  ;;  %8008 = vmatpush3.bf16.msra.mxu1 %v9369_v10  ;;  %v9338_v10 = vld [vmem:[#allocation11 + $0x730] ss:$24 sps:$4 sm:$0xff]   ;;  %v9343_v1 = vld [vmem:[#allocation11 + $0x704] ss:$24 sps:$4 sm:$0xff]   ;;  %v9341_v34 = vld [vmem:[#allocation11 + $0x700] ss:$24 sps:$4 sm:$0xff]  }
 0x443   :  { %v6265_v5 = vpop.f32.mrf.mxu1  ;;  %8009 = vmatprep.subr.bf16.mxu1 %v9373_v52 }
 0x444   :  { %v9948_v8 = vadd.f32 %v6265_v5, %v6225_v26  ;;  %6437 = vmatpush1.bf16.msra.mxu0 %v9290_v2  ;;  %v9346_v26 = vld [vmem:[#allocation11 + $0x6d4] ss:$24 sps:$4 sm:$0xff]   ;;  %v9344_v5 = vld [vmem:[#allocation11 + $0x6d0] ss:$24 sps:$4 sm:$0xff]  }
 0x445   :  { %v6267_v33 = vpop.f32.mrf.mxu1  ;;  %6438 = vmatprep.subr.bf16.mxu0 %v9295_v22 }
 0x446   :  { %8010 = vmatpush3.bf16.msra.mxu1 %v9374_v4  ;;  %v9355_v33 = vld [vmem:[#allocation11 + $0x644] ss:$24 sps:$4 sm:$0xff]  }
 0x447   :  { %v6268_v11 = vpop.f32.mrf.mxu1  ;;  %8011 = vmatprep.subr.bf16.mxu1 %v9378_v6  ;;  %v9347_v6 = vld [vmem:[#allocation11 + $0x6a0] ss:$24 sps:$4 sm:$0xff]  }
 0x448   :  { %6439 = vmatpush1.bf16.msra.mxu0 %v9293_v56  ;;  %v9350_v56 = vld [vmem:[#allocation11 + $0x670] ss:$24 sps:$4 sm:$0xff]  }
 0x449   :  { %6440 = vmatprep.subr.bf16.mxu0 %v9298_v9  ;;  %v9353_v9 = vld [vmem:[#allocation11 + $0x640] ss:$24 sps:$4 sm:$0xff]   ;;  %v9356_v11 = vld [vmem:[#allocation11 + $0x610] ss:$24 sps:$4 sm:$0xff]  }
 0x44a   :  { %8012 = vmatpush3.bf16.msra.mxu1 %v9379_v0  ;;  %v9358_v0 = vld [vmem:[#allocation11 + $0x614] ss:$24 sps:$4 sm:$0xff]  }
 0x44b   :  { %8013 = vmatprep.subr.bf16.mxu1 %v9383_v29  ;;  %v9361_v29 = vld [vmem:[#allocation11 + $0x8e4] ss:$24 sps:$4 sm:$0xff]  }
 0x44c   :  { %6441 = vmatpush1.bf16.msra.mxu0 %v9296_v42  ;;  %v9359_v42 = vld [vmem:[#allocation11 + $0x8e0] ss:$24 sps:$4 sm:$0xff]  }
 0x44d   :  { %6442 = vmatprep.subr.bf16.mxu0 %v9301_v13  ;;  %v9364_v13 = vld [vmem:[#allocation11 + $0x8b4] ss:$24 sps:$4 sm:$0xff]  }
 0x44e   :  { %8014 = vmatpush3.bf16.msra.mxu1 %v9384_v14  ;;  %v9362_v14 = vld [vmem:[#allocation11 + $0x8b0] ss:$24 sps:$4 sm:$0xff]  }
 0x44f   :  { %8015 = vmatprep.subr.bf16.mxu1 %v9388_v32  ;;  %v9367_v32 = vld [vmem:[#allocation11 + $0x884] ss:$24 sps:$4 sm:$0xff]  }
 0x450   :  { %6443 = vmatpush1.bf16.msra.mxu0 %v9299_v58  ;;  %v9365_v58 = vld [vmem:[#allocation11 + $0x880] ss:$24 sps:$4 sm:$0xff]  }
 0x451   :  { %6444 = vmatprep.subr.bf16.mxu0 %v9304_v15  ;;  %v9372_v15 = vld [vmem:[#allocation11 + $0x854] ss:$24 sps:$4 sm:$0xff]  }
 0x452   :  { %8016 = vmatpush3.bf16.msra.mxu1 %v9389_v17  ;;  %v9370_v17 = vld [vmem:[#allocation11 + $0x850] ss:$24 sps:$4 sm:$0xff]  }
 0x453   :  { %8017 = vmatprep.subr.bf16.mxu1 %v9393_v18  ;;  %v9377_v18 = vld [vmem:[#allocation11 + $0x824] ss:$24 sps:$4 sm:$0xff]  }
 0x454   :  { %6445 = vmatpush1.bf16.msra.mxu0 %v9302_v19  ;;  %v9375_v19 = vld [vmem:[#allocation11 + $0x820] ss:$24 sps:$4 sm:$0xff]  }
 0x455   :  { %6446 = vmatprep.subr.bf16.mxu0 %v9307_v21  ;;  %v9382_v21 = vld [vmem:[#allocation11 + $0x7f4] ss:$24 sps:$4 sm:$0xff]  }
 0x456   :  { %8018 = vmatpush3.bf16.msra.mxu1 %v9394_v23  ;;  %v9380_v23 = vld [vmem:[#allocation11 + $0x7f0] ss:$24 sps:$4 sm:$0xff]  }
 0x457   :  { %8019 = vmatprep.subr.bf16.mxu1 %v9395_v24  ;;  %v9387_v24 = vld [vmem:[#allocation11 + $0x7c4] ss:$24 sps:$4 sm:$0xff]  }
 0x458   :  { %6447 = vmatpush1.bf16.msra.mxu0 %v9305_v25  ;;  %v9385_v25 = vld [vmem:[#allocation11 + $0x7c0] ss:$24 sps:$4 sm:$0xff]  }
 0x459   :  { %6448 = vmatprep.subr.bf16.mxu0 %v9310_v30  ;;  %v9392_v30 = vld [vmem:[#allocation11 + $0x794] ss:$24 sps:$4 sm:$0xff]  }
 0x45a   :  { %8020 = vmatpush3.bf16.msra.mxu1 %v9396_v12  ;;  %v9390_v12 = vld [vmem:[#allocation11 + $0x790] ss:$24 sps:$4 sm:$0xff]  }
 0x45b   :  { %8021 = vmatprep.subr.bf16.mxu1 %v9397_v39 }
 0x45c   :  { %6449 = vmatpush1.bf16.msra.mxu0 %v9308_v63 }
 0x45d   :  { %6450 = vmatprep.subr.bf16.mxu0 %v9313_v28 }
 0x45e   :  { %8022 = vmatpush3.bf16.msra.mxu1 %v9398_v20 }
 0x45f   :  { %8029 = vmatprep.subr.bf16.mxu1 %v9399_v41 }
 0x460   :  { %6451 = vmatpush2.bf16.msra.mxu0 %v9311_v16 }
 0x461   :  { %6452 = vmatprep.subr.bf16.mxu0 %v9316_v7 }
 0x464   :  { %6453 = vmatpush2.bf16.msra.mxu0 %v9314_v36 }
 0x465   :  { %6454 = vmatprep.subr.bf16.mxu0 %v9319_v3  ;;  %v9400_v3 = vld [vmem:[#allocation14 + $0xb8] sm:$0xff]  }
 0x468   :  { %6455 = vmatpush2.bf16.msra.mxu0 %v9317_v44  ;;  %v9401_v44 = vld [vmem:[#allocation14 + $0xf0] sm:$0xff]  }
 0x469   :  { %6456 = vmatprep.subr.bf16.mxu0 %v9322_v27 }
 0x46c   :  { %6457 = vmatpush2.bf16.msra.mxu0 %v9320_v45 }
 0x46d   :  { %6458 = vmatprep.subr.bf16.mxu0 %v9325_v46 }
 0x470   :  { %6459 = vmatpush2.bf16.msra.mxu0 %v9323_v47  ;;  %v9415_v47 = vld [vmem:[#allocation14 + $0x178] sm:$0xff]  }
 0x471   :  { %6460 = vmatprep.subr.bf16.mxu0 %v9328_v49  ;;  %v9416_v49 = vld [vmem:[#allocation14 + $0x138] sm:$0xff]  }
 0x474   :  { %6461 = vmatpush2.bf16.msra.mxu0 %v9326_v50 }
 0x475   :  { %6462 = vmatprep.subr.bf16.mxu0 %v9331_v51  ;;  %v9403_v51 = vld [vmem:[#allocation14 + $0xe8] sm:$0xff]  }
 0x478   :  { %6463 = vmatpush2.bf16.msra.mxu0 %v9329_v53  ;;  %v9419_v53 = vld [vmem:[#allocation14 + $0x168] sm:$0xff]  }
 0x479   :  { %6464 = vmatprep.subr.bf16.mxu0 %v9334_v54  ;;  %v9404_v54 = vld [vmem:[#allocation14 + $0xa8] sm:$0xff]  }
 0x47c   :  { %6465 = vmatpush2.bf16.msra.mxu0 %v9332_v62  ;;  %v9420_v62 = vld [vmem:[#allocation14 + $0x128] sm:$0xff]  }
 0x47d   :  { %6516 = vmatprep.subr.bf16.mxu0 %v9337_v43  ;;  %v9405_v43 = vld [vmem:[#allocation14 + $0xe0] sm:$0xff]  }
 0x47f   :  { %6467 = vmatmul.mubr.bf16.vlgmr.msra.gmra.mxu0 %v9885_v60  ;;  %v9349_v60 = vld [vmem:[#allocation11 + $0x6a4] ss:$24 sps:$4 sm:$0xff]  }
 0x480   :  { %6517 = vmatpush1.bf16.msra.mxu0 %v9335_v48  ;;  %6548 = vmatprep.mubr.bf16.mxu0 %v9921_v59  ;;  %v9352_v59 = vld [vmem:[#allocation11 + $0x674] ss:$24 sps:$4 sm:$0xff]  }
 0x481   :  { %v9952_v52 = vpop.f32.mrf.mxu1  ;;  %6518 = vmatprep.subr.bf16.mxu0 %v9340_v61  ;;  %v9421_v48 = vld [vmem:[#allocation14 + $0x160] sm:$0xff]  }
 0x482   :  { %v9406_v61 = vld [vmem:[#allocation14 + $0xa0] sm:$0xff]  }
 0x483   :  { %v9954_v2 = vpop.f32.mrf.mxu1 }
 0x484   :  { %6519 = vmatpush1.bf16.msra.mxu0 %v9338_v10  ;;  %v9422_v10 = vld [vmem:[#allocation14 + $0x120] sm:$0xff]  }
 0x485   :  { %v6349_v22 = vpop.f32.mrf.mxu1  ;;  %6520 = vmatprep.subr.bf16.mxu0 %v9343_v1  ;;  %v9407_v1 = vld [vmem:[#allocation14 + $0xd8] sm:$0xff]  }
 0x486   :  { %v9408_v22 = vld [vmem:[#allocation14 + $0x98] sm:$0xff]  }
 0x487   :  { %v6350_v4 = vpop.f32.mrf.mxu1 }
 0x488   :  { %6521 = vmatpush1.bf16.msra.mxu0 %v9341_v34  ;;  %v9423_v34 = vld [vmem:[#allocation14 + $0x158] sm:$0xff]   ;;  %v9409_v4 = vld [vmem:[#allocation14 + $0xd0] sm:$0xff]  }
 0x489   :  { %6522 = vmatprep.subr.bf16.mxu0 %v9346_v26  ;;  %v9424_v26 = vld [vmem:[#allocation14 + $0x118] sm:$0xff]  }
 0x48c   :  { %6523 = vmatpush1.bf16.msra.mxu0 %v9344_v5  ;;  %v9425_v5 = vld [vmem:[#allocation14 + $0x150] sm:$0xff]  }
 0x48d   :  { %6524 = vmatprep.subr.bf16.mxu0 %v9349_v60  ;;  %v9410_v60 = vld [vmem:[#allocation14 + $0x90] sm:$0xff]  }
 0x490   :  { %6525 = vmatpush1.bf16.msra.mxu0 %v9347_v6  ;;  %v9426_v6 = vld [vmem:[#allocation14 + $0x110] sm:$0xff]  }
 0x491   :  { %6526 = vmatprep.subr.bf16.mxu0 %v9352_v59  ;;  %v9411_v59 = vld [vmem:[#allocation14 + $0xc8] sm:$0xff]  }
 0x494   :  { %6527 = vmatpush1.bf16.msra.mxu0 %v9350_v56  ;;  %v9412_v56 = vld [vmem:[#allocation14 + $0x88] sm:$0xff]  }
 0x495   :  { %6528 = vmatprep.subr.bf16.mxu0 %v9355_v33  ;;  %v9413_v33 = vld [vmem:[#allocation14 + $0xc0] sm:$0xff]  }
 0x498   :  { %6529 = vmatpush1.bf16.msra.mxu0 %v9353_v9  ;;  %v9414_v9 = vld [vmem:[#allocation14 + $0x80] sm:$0xff]  }
 0x499   :  { %6530 = vmatprep.subr.bf16.mxu0 %v9358_v0  ;;  %v4729_v0 = vrot.slane %v9935_v57, %v9802_v55  ;;  %v9430_v55 = vld [vmem:[#allocation14 + $0x100] sm:$0xff]  }
 0x49c   :  { %6531 = vmatpush1.bf16.msra.mxu0 %v9356_v11  ;;  %v4733_v11 = vrot.slane %v9935_v57, %v9805_v35 }
 0x49d   :  { %6532 = vmatprep.subr.bf16.mxu0 %v9361_v29  ;;  %v9427_v29 = vld [vmem:[#allocation14 + $0x148] sm:$0xff]  }
 0x4a0   :  { %6533 = vmatpush2.bf16.msra.mxu0 %v9359_v42  ;;  %v6346_v42 = vadd.f32 %v9952_v52, %v4729_v0 }
 0x4a1   :  { %6534 = vmatprep.subr.bf16.mxu0 %v9364_v13  ;;  %v9428_v13 = vld [vmem:[#allocation14 + $0x108] sm:$0xff]  }
 0x4a4   :  { %6535 = vmatpush2.bf16.msra.mxu0 %v9362_v14 }
 0x4a5   :  { %6536 = vmatprep.subr.bf16.mxu0 %v9367_v32  ;;  %v6348_v32 = vadd.f32 %v9954_v2, %v4733_v11 }
 0x4a8   :  { %6537 = vmatpush2.bf16.msra.mxu0 %v9365_v58 }
 0x4a9   :  { %6538 = vmatprep.subr.bf16.mxu0 %v9372_v15 }
 0x4ac   :  { %6539 = vmatpush2.bf16.msra.mxu0 %v9370_v17 }
 0x4ad   :  { %6540 = vmatprep.subr.bf16.mxu0 %v9377_v18  ;;  %v9429_v18 = vld [vmem:[#allocation14 + $0x140] sm:$0xff]  }
 0x4b0   :  { %6541 = vmatpush2.bf16.msra.mxu0 %v9375_v19 }
 0x4b1   :  { %6542 = vmatprep.subr.bf16.mxu0 %v9382_v21 }
 0x4b4   :  { %6543 = vmatpush2.bf16.msra.mxu0 %v9380_v23 }
 0x4b5   :  { %6544 = vmatprep.subr.bf16.mxu0 %v9387_v24 }
 0x4b8   :  { %6545 = vmatpush2.bf16.msra.mxu0 %v9385_v25 }
 0x4b9   :  { %6546 = vmatprep.subr.bf16.mxu0 %v9392_v30 }
 0x4bc   :  { %6547 = vmatpush2.bf16.msra.mxu0 %v9390_v12 }
 0x4bd   :  { %8051 = vmatprep.subr.bf16.mxu0 %v9415_v47 }
 0x4bf   :  { %6549 = vmatmul.mubr.bf16.vlgmr.msra.gmra.mxu0 %v9923_v40  ;;  %v6304_v39 = vpop.f32.mrf.mxu0  ;;  %v9417_v40 = vld [vmem:[#allocation14 + $0x170] sm:$0xff]  }
 0x4c0   :  { %v6305_v63 = vadd.f32 %v6304_v39, %v9946_v38  ;;  %v9402_v38 = vld [vmem:[#allocation14 + $0xb0] sm:$0xff]   ;;  %8052 = vmatpush3.bf16.msra.mxu0 %v9416_v49 }
 0x4c1   :  { %v9958_v28 = vpop.f32.mrf.mxu1  ;;  %v6306_v20 = vpop.f32.mrf.mxu0  ;;  %8053 = vmatprep.subr.bf16.mxu0 %v9417_v40 }
 0x4c2   :  { %v6307_v41 = vadd.f32 %v6306_v20, %v9948_v8  ;;  %v6557_v27 = vpack.c.bf16 %v6305_v63, %v6305_v63  ;;  %v9418_v8 = vld [vmem:[#allocation14 + $0x130] sm:$0xff]  }
 0x4c3   :  { %v9961_v16 = vpop.f32.mrf.mxu1  ;;  %v6308_v7 = vpop.f32.mrf.mxu0 }
 0x4c4   :  { %v6558_v36 = vpack.c.bf16 %v6307_v41, %v6307_v41  ;;  %8054 = vmatpush3.bf16.msra.mxu0 %v9418_v8  ;;  %v4741_v7 = vrot.slane %v9935_v57, %v9833_v37  ;;  %v7958_v37 = vld [vmem:[#allocation16] ss:$0 sm:$0xff] }
 0x4c5   :  { %v6431_v45 = vpop.f32.mrf.mxu1  ;;  %v6309_v46 = vpop.f32.mrf.mxu0  ;;  %8055 = vmatprep.subr.bf16.mxu0 %v9419_v53 }
 0x4c6   :  { %6986 = vmatprep.mubr.bf16.mxu1 %v6558_v36 }
 0x4c7   :  { %v6432_v50 = vpop.f32.mrf.mxu1  ;;  %6987 = vmatmul.mubr.bf16.vlgmr.msra.gmra.mxu1 %v6557_v27 }
 0x4c8   :  { %8030 = vmatpush3.bf16.msra.mxu1 %v9400_v3  ;;  %8056 = vmatpush3.bf16.msra.mxu0 %v9420_v62 }
 0x4c9   :  { %8031 = vmatprep.subr.bf16.mxu1 %v9401_v44  ;;  %8057 = vmatprep.subr.bf16.mxu0 %v9421_v48 }
 0x4cc   :  { %8032 = vmatpush3.bf16.msra.mxu1 %v9402_v38  ;;  %8058 = vmatpush3.bf16.msra.mxu0 %v9422_v10 }
 0x4cd   :  { %8033 = vmatprep.subr.bf16.mxu1 %v9403_v51  ;;  %8059 = vmatprep.subr.bf16.mxu0 %v9423_v34 }
 0x4d0   :  { %8034 = vmatpush3.bf16.msra.mxu1 %v9404_v54  ;;  %8060 = vmatpush3.bf16.msra.mxu0 %v9424_v26 }
 0x4d1   :  { %8035 = vmatprep.subr.bf16.mxu1 %v9405_v43  ;;  %8061 = vmatprep.subr.bf16.mxu0 %v9425_v5 }
 0x4d4   :  { %8036 = vmatpush3.bf16.msra.mxu1 %v9406_v61  ;;  %8062 = vmatpush3.bf16.msra.mxu0 %v9426_v6 }
 0x4d5   :  { %8037 = vmatprep.subr.bf16.mxu1 %v9407_v1  ;;  %8063 = vmatprep.subr.bf16.mxu0 %v9427_v29 }
 0x4d8   :  { %8038 = vmatpush3.bf16.msra.mxu1 %v9408_v22  ;;  %8064 = vmatpush3.bf16.msra.mxu0 %v9428_v13 }
 0x4d9   :  { %8039 = vmatprep.subr.bf16.mxu1 %v9409_v4  ;;  %8065 = vmatprep.subr.bf16.mxu0 %v9429_v18 }
 0x4dc   :  { %8040 = vmatpush3.bf16.msra.mxu1 %v9410_v60  ;;  %8066 = vmatpush3.bf16.msra.mxu0 %v9430_v55 }
 0x4dd   :  { %8041 = vmatprep.subr.bf16.mxu1 %v9411_v59 }
 0x4e0   :  { %8042 = vmatpush3.bf16.msra.mxu1 %v9412_v56 }
 0x4e1   :  { %8043 = vmatprep.subr.bf16.mxu1 %v9413_v33 }
 0x4e4   :  { %8044 = vmatpush3.bf16.msra.mxu1 %v9414_v9 }
 0x4ff   :  { %v6386_v14 = vpop.f32.mrf.mxu0 }
 0x500   :  { %v6387_v58 = vadd.f32 %v6386_v14, %v6346_v42 }
 0x501   :  { %v6388_v15 = vpop.f32.mrf.mxu0  ;;  %v6509_v17 = vpop.f32.mrf.mxu1 }
 0x502   :  { %v6428_v19 = vadd.f32 %v9958_v28, %v6387_v58  ;;  %v6389_v21 = vadd.f32 %v6388_v15, %v6348_v32  ;;  %v4737_v28 = vrot.slane %v9935_v57, %v9830_v31 }
 0x503   :  { %v6390_v23 = vpop.f32.mrf.mxu0  ;;  %v6511_v24 = vpop.f32.mrf.mxu1 }
 0x504   :  { %v6430_v35 = vadd.f32 %v9961_v16, %v6389_v21  ;;  %v6559_v12 = vpack.c.bf16 %v6428_v19, %v6428_v19 }
 0x505   :  { %v6391_v52 = vpop.f32.mrf.mxu0  ;;  %v6513_v25 = vpop.f32.mrf.mxu1 }
 0x506   :  { %v6560_v30 = vpack.c.bf16 %v6430_v35, %v6430_v35 }
 0x507   :  { %v6514_v2 = vpop.f32.mrf.mxu1 }
 0x508   :  { %7026 = vmatprep.mubr.bf16.mxu1 %v6560_v30 }
 0x509   :  { %7027 = vmatmul.mubr.bf16.vlgmr.msra.gmra.mxu1 %v6559_v12 }
 0x53f   :  { %v6468_v39 = vpop.f32.mrf.mxu0 }
 0x540   :  { %v6469_v36 = vadd.f32 %v6468_v39, %v4737_v28 }
 0x541   :  { %v6470_v63 = vpop.f32.mrf.mxu0 }
 0x542   :  { %v6471_v16 = vadd.f32 %v6470_v63, %v4741_v7  ;;  %v6510_v3 = vadd.f32 %v6509_v17, %v6469_v36 }
 0x543   :  { %v6472_v20 = vpop.f32.mrf.mxu0 }
 0x544   :  { %v6512_v27 = vadd.f32 %v6511_v24, %v6471_v16 }
 0x545   :  { %v6473_v41 = vpop.f32.mrf.mxu0 }
 0x57f   :  { %v6550_v44 = vpop.f32.mrf.mxu0 }
 0x580   :  { %v6551_v45 = vadd.f32 %v6550_v44, %v6510_v3 }
 0x581   :  { %v6552_v46 = vpop.f32.mrf.mxu0 }
 0x582   :  { %v6553_v47 = vadd.f32 %v6552_v46, %v6512_v27  ;;  %v6561_v50 = vpack.c.bf16 %v6551_v45, %v6551_v45 }
 0x583   :  { %v6554_v49 = vpop.f32.mrf.mxu0 }
 0x584   :  { %v6562_v40 = vpack.c.bf16 %v6553_v47, %v6553_v47 }
 0x585   :  { %v6555_v38 = vpop.f32.mrf.mxu0 }
 0x586   :  { %7066 = vmatprep.mubr.bf16.mxu0 %v6562_v40 }
 0x587   :  { %7067 = vmatmul.mubr.bf16.vlgmr.msra.gmra.mxu0 %v6561_v50  ;;  %v8023_v8 = vpop.f32.mrf.mxu1 }
 0x589   :  { %v8024_v51 = vpop.f32.mrf.mxu1 }
 0x58a   :  { %v8025_v31 = vadd.f32 %v8024_v51, %v8023_v8 }
 0x58b   :  { %v8026_v53 = vpop.f32.mrf.mxu1 }
 0x58c   :  { %v6989_v43 = vadd.f32 %v8025_v31, %v7958_v37 }
 0x58d   :  { %v8027_v54 = vpop.f32.mrf.mxu1 }
 0x5c9   :  { %v8045_v57 = vpop.f32.mrf.mxu1 }
 0x5cb   :  { %v8046_v62 = vpop.f32.mrf.mxu1 }
 0x5cc   :  { %v8047_v48 = vadd.f32 %v8046_v62, %v8045_v57 }
 0x5cd   :  { %v8048_v61 = vpop.f32.mrf.mxu1 }
 0x5ce   :  { %v7029_v10 = vadd.f32 %v8047_v48, %v6989_v43 }
 0x5cf   :  { %v8049_v1 = vpop.f32.mrf.mxu1 }
 0x647   :  { %v8067_v34 = vpop.f32.mrf.mxu0 }
 0x649   :  { %v8068_v22 = vpop.f32.mrf.mxu0 }
 0x64a   :  { %v8069_v26 = vadd.f32 %v8068_v22, %v8067_v34 }
 0x64b   :  { %v8070_v4 = vpop.f32.mrf.mxu0 }
 0x64c   :  { %v7069_v5 = vadd.f32 %v8069_v26, %v7029_v10 }
 0x64d   :  { %v8071_v60 = vpop.f32.mrf.mxu0 }
 0x64e   :  { %7074 = vst [vmem:[#allocation17] sm:$0xff] %v7069_v5 }
 0x64f   :  { %9623 = shalt.err (!%p9620_p7)
}
 0x650   :  { %7084 = dma.vmem_to_hbm [thread:$0]  %s7082_s8, 128, %s9987_s9, [#allocation4]  }
 0x651   :  { %9642 = dma.done.wait [#allocation4], 128  }
 0x652   :  { %9643 = vsyncadd [#allocation4], 4294967168 }
 0x653   :  { %7088 = vsyncpa [#allocation3], 1 }
 0x654   :  { %7089 = vsyncpa [#allocation6], 1 }
 0x655   :  { %7090 = vsyncpa [#allocation9], 1 }
 0x656   :  { %7091 = vsyncpa [#allocation12], 1 }
 0x657   :  { %7092 = vsyncpa [#allocation15], 1 }
 0x658   :  { %7093 = vsyncpa [#allocation4], 1 }

</bundles_post_ra>
